<compile_context>
chip_gen: v7x
topology: tpu7x:2x2x1
jax: 0.10.0
libtpu: 0.0.40
codegen_flags: <defaults>
</compile_context>

<pallas_src>
import numpy as np
import jax
import jax.numpy as jnp
from jax import lax
from jax.experimental import pallas as pl
from jax.experimental.pallas import tpu as pltpu


def _round_up(x: int, m: int) -> int:
    return ((x + m - 1) // m) * m


def _cdiv(a: int, b: int) -> int:
    return -(-a // b)


# ----------------------------------------------------------------------------
# Host-side packing: convs -> dense matrices, lane padding, bf16 casting.
# ----------------------------------------------------------------------------
def _conv_as_dense(w, b, in_shape, out_hw):
    """Dense matrix for a VALID, stride-1 conv acting on CHW-flattened vectors.

    w: (OC, IC, KH, KW) PyTorch-layout weight, b: (OC,) bias.
    Rows are indexed by the CHW-flattened input (ic*IH*IW + ih*IW + iw),
    columns by the CHW-flattened output (oc*OH*OW + oh*OW + ow).
    """
    w = np.asarray(w, np.float32)
    b = np.asarray(b, np.float32)
    OC, IC, KH, KW = w.shape
    ICc, IH, IW = in_shape
    assert ICc == IC
    OH, OW = out_hw
    M = np.zeros((IC * IH * IW, OC * OH * OW), np.float32)
    ic_idx = np.arange(IC)
    for oc in range(OC):
        for oh in range(OH):
            for ow in range(OW):
                col = (oc * OH + oh) * OW + ow
                for kh in range(KH):
                    for kw in range(KW):
                        rows = ic_idx * (IH * IW) + (oh + kh) * IW + (ow + kw)
                        M[rows, col] = w[oc, :, kh, kw]
    bias = np.repeat(b, OH * OW)
    return M, bias


def pack_params(params, num_actions):
    """Turn PyTorch-layout DQN parameters into kernel-ready device arrays."""
    # conv1: (B, 6*7*7=294) -> (B, 800); conv2: (B, 800) -> (B, 1024 CHW flat)
    m1, b1f = _conv_as_dense(params["conv1_w"], params["conv1_b"], (6, 7, 7), (5, 5))
    m2, b2f = _conv_as_dense(params["conv2_w"], params["conv2_b"], (32, 5, 5), (4, 4))

    # Pad conv1's contraction rows 294 -> 384 (3*128): the streamed input block
    # becomes lane-dense and m1's sublane dim is a multiple of 16 (bf16 pack).
    k_in = m1.shape[0]                       # 294
    k_pad = _round_up(k_in, 128)             # 384
    m1 = np.pad(m1, ((0, k_pad - k_in), (0, 0)))

    # Pad conv1's output features 800 -> 896 (multiple of 128) for lane-dense
    # stores; pad conv2's contraction rows to match (zero rows <- zero lanes).
    n1p = _round_up(m1.shape[1], 128)
    m1 = np.pad(m1, ((0, 0), (0, n1p - m1.shape[1])))
    b1f = np.pad(b1f, (0, n1p - b1f.shape[0]))
    m2 = np.pad(m2, ((0, n1p - m2.shape[0]), (0, 0)))

    w3 = np.asarray(params["fc3_w"], np.float32).T          # (1024, 512)
    b3f = np.asarray(params["fc3_b"], np.float32)

    # Pad tiny num_actions up to a full 128-lane slab (sliced in the wrapper).
    nap = _round_up(max(num_actions, 1), 128)
    w4 = np.asarray(params["fc4_w"], np.float32).T           # (512, A)
    w4 = np.pad(w4, ((0, 0), (0, nap - num_actions)))
    b4f = np.pad(np.asarray(params["fc4_b"], np.float32), (0, nap - num_actions))

    wdt = jnp.bfloat16  # MXU-friendly; f32 accumulation in-kernel.
    return dict(
        k_in=k_in, k_pad=k_pad,
        m1=jnp.asarray(m1, wdt), b1=jnp.asarray(b1f, jnp.float32).reshape(1, -1),
        m2=jnp.asarray(m2, wdt), b2=jnp.asarray(b2f, jnp.float32).reshape(1, -1),
        w3=jnp.asarray(w3, wdt), b3=jnp.asarray(b3f, jnp.float32).reshape(1, -1),
        w4=jnp.asarray(w4, wdt), b4=jnp.asarray(b4f, jnp.float32).reshape(1, -1),
    )


# ----------------------------------------------------------------------------
# The fused kernel: conv1 -> conv2 -> fc3 -> fc4, all in one grid step.
# Row sub-tiles are statically unrolled so the VPU epilogue of one sub-tile
# overlaps the next sub-tile's MXU matmuls (v6e/v7x win; harmless on v5e).
# ----------------------------------------------------------------------------
def _make_dqn_kernel(bt: int, st: int):
    n_sub = bt // st

    def kernel(x_ref, m1_ref, b1_ref, m2_ref, b2_ref,
               w3_ref, b3_ref, w4_ref, b4_ref, out_ref):
        m1 = m1_ref[...]
        b1 = b1_ref[...]
        m2 = m2_ref[...]
        b2 = b2_ref[...]
        w3 = w3_ref[...]
        b3 = b3_ref[...]
        w4 = w4_ref[...]
        b4 = b4_ref[...]
        for s in range(n_sub):
            rows = pl.ds(s * st, st)
            # conv1 (dense Toeplitz matmul), f32 accumulation, bias + ReLU.
            h = jnp.dot(x_ref[rows, :], m1, preferred_element_type=jnp.float32)
            h = jnp.maximum(h + b1, 0.0)
            # conv2 (dense Toeplitz matmul); padded lanes of h are exactly 0.
            h = jnp.dot(h.astype(m2.dtype), m2, preferred_element_type=jnp.float32)
            h = jnp.maximum(h + b2, 0.0)
            # fc3: columns of m2 already follow PyTorch's CHW flatten order.
            h = jnp.dot(h.astype(w3.dtype), w3, preferred_element_type=jnp.float32)
            h = jnp.maximum(h + b3, 0.0)
            # fc4: lane-dense (st, 128) logit slab; logits live in [:, :A].
            out_ref[rows, :] = (
                jnp.dot(h.astype(w4.dtype), w4, preferred_element_type=jnp.float32)
                + b4)

    return kernel


def dqn_forward(x, packed, num_actions, batch_tile=1024):
    """x: (B, 6, 7, 7) float32 NCHW.  Returns (B, num_actions) float32 logits."""
    B = x.shape[0]
    k_in, k_pad = packed["k_in"], packed["k_pad"]

    # Balanced batch tiling: minimal pad waste, and force >= 2 grid steps for
    # reasonably large B so the "parallel" axis can shard over v7x's two TCs.
    num_tiles = max(1, _cdiv(B, batch_tile))
    if num_tiles == 1 and B >= 64:
        num_tiles = 2
    bt = _round_up(_cdiv(B, num_tiles), 8)
    b_pad = bt * num_tiles

    # Row sub-tiles inside the kernel (epilogue/MXU overlap) for large tiles.
    st = bt
    if bt >= 512:
        for cand in (256, 128):
            if bt % cand == 0:
                st = cand
                break

    # Single fused pre-op: CHW flatten (== PyTorch x.view(B,-1)), pad batch
    # rows and K lanes (294 -> 384), cast to bf16.
    x_flat = jnp.pad(x.reshape(B, -1),
                     ((0, b_pad - B), (0, k_pad - k_in))).astype(jnp.bfloat16)

    m1, b1 = packed["m1"], packed["b1"]
    m2, b2 = packed["m2"], packed["b2"]
    w3, b3 = packed["w3"], packed["b3"]
    w4, b4 = packed["w4"], packed["b4"]
    n_out = w4.shape[1]                                    # 128

    def const_spec(arr):
        # Weights: constant index_map + single-buffered -> DMA'd exactly once,
        # VMEM-resident across the whole grid, no wasted double buffer.
        return pl.BlockSpec(arr.shape, lambda i: (0, 0),
                            pipeline_mode=pl.Buffered(1))

    weights = (m1, b1, m2, b2, w3, b3, w4, b4)
    flops = 2 * b_pad * (k_pad * m1.shape[1] + m2.shape[0] * m2.shape[1]
                         + w3.shape[0] * w3.shape[1] + w4.shape[0] * w4.shape[1])
    bytes_accessed = (x_flat.size * x_flat.dtype.itemsize
                      + sum(a.size * a.dtype.itemsize for a in weights)
                      + b_pad * n_out * 4)

    out = pl.pallas_call(
        _make_dqn_kernel(bt, st),
        out_shape=jax.ShapeDtypeStruct((b_pad, n_out), jnp.float32),
        grid_spec=pltpu.PrefetchScalarGridSpec(
            num_scalar_prefetch=0,
            grid=(num_tiles,),
            in_specs=[
                pl.BlockSpec((bt, k_pad), lambda i: (i, 0)),   # streamed input
                const_spec(m1), const_spec(b1),
                const_spec(m2), const_spec(b2),
                const_spec(w3), const_spec(b3),
                const_spec(w4), const_spec(b4),
            ],
            out_specs=pl.BlockSpec((bt, n_out), lambda i: (i, 0)),
        ),
        compiler_params=pltpu.CompilerParams(
            dimension_semantics=("parallel",),          # shard batch across TCs
            vmem_limit_bytes=48 * 1024 * 1024,          # safe under v7x's 64 MiB
        ),
        cost_estimate=pl.CostEstimate(
            flops=flops, transcendentals=0, bytes_accessed=bytes_accessed),
    )(x_flat, *weights)

    return out[:B, :num_actions]


# ----------------------------------------------------------------------------
# Pure-JAX reference (with matched bf16 quantization of weights/activations).
# ----------------------------------------------------------------------------
def reference_forward(x, params):
    q = lambda a: jnp.asarray(a, jnp.float32).astype(jnp.bfloat16).astype(jnp.float32)
    dn = ("NCHW", "OIHW", "NCHW")
    y = lax.conv_general_dilated(q(x), q(params["conv1_w"]), (1, 1), "VALID",
                                 dimension_numbers=dn)
    y = jax.nn.relu(y + params["conv1_b"][None, :, None, None])
    y = lax.conv_general_dilated(q(y), q(params["conv2_w"]), (1, 1), "VALID",
                                 dimension_numbers=dn)
    y = jax.nn.relu(y + params["conv2_b"][None, :, None, None])
    y = q(y).reshape(y.shape[0], -1)                      # PyTorch x.view(B, -1)
    y = jax.nn.relu(jnp.dot(y, q(params["fc3_w"]).T) + params["fc3_b"])
    return jnp.dot(q(y), q(params["fc4_w"]).T) + params["fc4_b"]


# ----------------------------------------------------------------------------
if __name__ == "__main__":
    num_actions = 4
    B = 4
    key = jax.random.PRNGKey(0)
    ks = jax.random.split(key, 9)

    def uinit(k, shape, fan_in):
        bound = 1.0 / np.sqrt(fan_in)
        return jax.random.uniform(k, shape, jnp.float32, -bound, bound)

    params = dict(
        conv1_w=uinit(ks[0], (32, 6, 3, 3), 6 * 3 * 3),
        conv1_b=uinit(ks[1], (32,), 6 * 3 * 3),
        conv2_w=uinit(ks[2], (64, 32, 2, 2), 32 * 2 * 2),
        conv2_b=uinit(ks[3], (64,), 32 * 2 * 2),
        fc3_w=uinit(ks[4], (512, 1024), 1024),
        fc3_b=uinit(ks[5], (512,), 1024),
        fc4_w=uinit(ks[6], (num_actions, 512), 512),
        fc4_b=uinit(ks[7], (num_actions,), 512),
    )
    x = jax.random.normal(ks[8], (B, 6, 7, 7), jnp.float32)

    packed = pack_params(params, num_actions)
    logits = jax.block_until_ready(dqn_forward(x, packed, num_actions))

    ref = jax.block_until_ready(reference_forward(x, params))
    np.testing.assert_allclose(np.asarray(logits), np.asarray(ref),
                               rtol=2e-2, atol=2e-2)
    print("KERNEL_OK")
</pallas_src>

<mosaic_0001>
module attributes {stable_mosaic.version = 11 : i64} {
  func.func @kernel(%arg0: i32, %arg1: memref<8x384xbf16, #tpu.memory_space<vmem>>, %arg2: memref<384x896xbf16, #tpu.memory_space<vmem>>, %arg3: memref<1x896xf32, #tpu.memory_space<vmem>>, %arg4: memref<896x1024xbf16, #tpu.memory_space<vmem>>, %arg5: memref<1x1024xf32, #tpu.memory_space<vmem>>, %arg6: memref<1024x512xbf16, #tpu.memory_space<vmem>>, %arg7: memref<1x512xf32, #tpu.memory_space<vmem>>, %arg8: memref<512x128xbf16, #tpu.memory_space<vmem>>, %arg9: memref<1x128xf32, #tpu.memory_space<vmem>>, %arg10: memref<8x128xf32, #tpu.memory_space<vmem>>) attributes {dimension_semantics = [#tpu.dimension_semantics<parallel>], iteration_bounds = array<i64: 1>, scalar_prefetch = 0 : i64, scratch_operands = 0 : i64, tpu.core_type = #tpu.core_type<tc>, window_params = [{transform_indices = @transform_0, window_bounds = array<i64: 8, 384>}, {pipeline_mode = #tpu.pipeline_mode<synchronous>, transform_indices = @transform_1, window_bounds = array<i64: 384, 896>}, {pipeline_mode = #tpu.pipeline_mode<synchronous>, transform_indices = @transform_2, window_bounds = array<i64: 1, 896>}, {pipeline_mode = #tpu.pipeline_mode<synchronous>, transform_indices = @transform_3, window_bounds = array<i64: 896, 1024>}, {pipeline_mode = #tpu.pipeline_mode<synchronous>, transform_indices = @transform_4, window_bounds = array<i64: 1, 1024>}, {pipeline_mode = #tpu.pipeline_mode<synchronous>, transform_indices = @transform_5, window_bounds = array<i64: 1024, 512>}, {pipeline_mode = #tpu.pipeline_mode<synchronous>, transform_indices = @transform_6, window_bounds = array<i64: 1, 512>}, {pipeline_mode = #tpu.pipeline_mode<synchronous>, transform_indices = @transform_7, window_bounds = array<i64: 512, 128>}, {pipeline_mode = #tpu.pipeline_mode<synchronous>, transform_indices = @transform_8, window_bounds = array<i64: 1, 128>}, {transform_indices = @transform_9, window_bounds = array<i64: 8, 128>}]} {
    %c0 = arith.constant 0 : index
    %c0_0 = arith.constant 0 : index
    %0 = vector.load %arg2[%c0, %c0_0] : memref<384x896xbf16, #tpu.memory_space<vmem>>, vector<384x896xbf16>
    %c0_1 = arith.constant 0 : index
    %c0_2 = arith.constant 0 : index
    %1 = vector.load %arg3[%c0_1, %c0_2] : memref<1x896xf32, #tpu.memory_space<vmem>>, vector<1x896xf32>
    %c0_3 = arith.constant 0 : index
    %c0_4 = arith.constant 0 : index
    %2 = vector.load %arg4[%c0_3, %c0_4] : memref<896x1024xbf16, #tpu.memory_space<vmem>>, vector<896x1024xbf16>
    %c0_5 = arith.constant 0 : index
    %c0_6 = arith.constant 0 : index
    %3 = vector.load %arg5[%c0_5, %c0_6] : memref<1x1024xf32, #tpu.memory_space<vmem>>, vector<1x1024xf32>
    %c0_7 = arith.constant 0 : index
    %c0_8 = arith.constant 0 : index
    %4 = vector.load %arg6[%c0_7, %c0_8] : memref<1024x512xbf16, #tpu.memory_space<vmem>>, vector<1024x512xbf16>
    %c0_9 = arith.constant 0 : index
    %c0_10 = arith.constant 0 : index
    %5 = vector.load %arg7[%c0_9, %c0_10] : memref<1x512xf32, #tpu.memory_space<vmem>>, vector<1x512xf32>
    %c0_11 = arith.constant 0 : index
    %c0_12 = arith.constant 0 : index
    %6 = vector.load %arg8[%c0_11, %c0_12] : memref<512x128xbf16, #tpu.memory_space<vmem>>, vector<512x128xbf16>
    %c0_13 = arith.constant 0 : index
    %c0_14 = arith.constant 0 : index
    %7 = vector.load %arg9[%c0_13, %c0_14] : memref<1x128xf32, #tpu.memory_space<vmem>>, vector<1x128xf32>
    %c0_15 = arith.constant 0 : index
    %c0_16 = arith.constant 0 : index
    %8 = vector.load %arg1[%c0_15, %c0_16] : memref<8x384xbf16, #tpu.memory_space<vmem>>, vector<8x384xbf16>
    %cst = arith.constant dense<0.000000e+00> : vector<8x896xf32>
    %9 = tpu.matmul %8, %0, %cst {dimension_numbers = #tpu.dot_dimension_numbers<[1], [0], [0], [1], [0, 0, 1, 1], [], []>} : vector<8x384xbf16>, vector<384x896xbf16>, vector<8x896xf32> -> vector<8x896xf32>
    %10 = vector.broadcast %1 : vector<1x896xf32> to vector<8x896xf32>
    %11 = arith.addf %9, %10 : vector<8x896xf32>
    %cst_17 = arith.constant 0.000000e+00 : f32
    %12 = vector.broadcast %cst_17 : f32 to vector<8x896xf32>
    %13 = arith.maximumf %11, %12 : vector<8x896xf32>
    %14 = arith.truncf %13 : vector<8x896xf32> to vector<8x896xbf16>
    %cst_18 = arith.constant dense<0.000000e+00> : vector<8x1024xf32>
    %15 = tpu.matmul %14, %2, %cst_18 {dimension_numbers = #tpu.dot_dimension_numbers<[1], [0], [0], [1], [0, 0, 1, 1], [], []>} : vector<8x896xbf16>, vector<896x1024xbf16>, vector<8x1024xf32> -> vector<8x1024xf32>
    %16 = vector.broadcast %3 : vector<1x1024xf32> to vector<8x1024xf32>
    %17 = arith.addf %15, %16 : vector<8x1024xf32>
    %cst_19 = arith.constant 0.000000e+00 : f32
    %18 = vector.broadcast %cst_19 : f32 to vector<8x1024xf32>
    %19 = arith.maximumf %17, %18 : vector<8x1024xf32>
    %20 = arith.truncf %19 : vector<8x1024xf32> to vector<8x1024xbf16>
    %cst_20 = arith.constant dense<0.000000e+00> : vector<8x512xf32>
    %21 = tpu.matmul %20, %4, %cst_20 {dimension_numbers = #tpu.dot_dimension_numbers<[1], [0], [0], [1], [0, 0, 1, 1], [], []>} : vector<8x1024xbf16>, vector<1024x512xbf16>, vector<8x512xf32> -> vector<8x512xf32>
    %22 = vector.broadcast %5 : vector<1x512xf32> to vector<8x512xf32>
    %23 = arith.addf %21, %22 : vector<8x512xf32>
    %cst_21 = arith.constant 0.000000e+00 : f32
    %24 = vector.broadcast %cst_21 : f32 to vector<8x512xf32>
    %25 = arith.maximumf %23, %24 : vector<8x512xf32>
    %26 = arith.truncf %25 : vector<8x512xf32> to vector<8x512xbf16>
    %cst_22 = arith.constant dense<0.000000e+00> : vector<8x128xf32>
    %27 = tpu.matmul %26, %6, %cst_22 {dimension_numbers = #tpu.dot_dimension_numbers<[1], [0], [0], [1], [0, 0, 1, 1], [], []>} : vector<8x512xbf16>, vector<512x128xbf16>, vector<8x128xf32> -> vector<8x128xf32>
    %28 = vector.broadcast %7 : vector<1x128xf32> to vector<8x128xf32>
    %29 = arith.addf %27, %28 : vector<8x128xf32>
    %c0_23 = arith.constant 0 : index
    %c0_24 = arith.constant 0 : index
    %30 = vector.load %arg10[%c0_23, %c0_24] : memref<8x128xf32, #tpu.memory_space<vmem>>, vector<8x128xf32>
    tpu.vector_store %arg10[%c0_23, %c0_24], %29 {strides = array<i32>} : memref<8x128xf32, #tpu.memory_space<vmem>>, vector<8x128xf32>,
    return
  }
  func.func @transform_0(%arg0: i32) -> (i32, i32) {
    %c0_i32 = arith.constant 0 : i32
    %c0_i32_0 = arith.constant 0 : i32
    return %arg0, %c0_i32 : i32, i32
  }
  func.func @transform_1(%arg0: i32) -> (i32, i32) {
    %c0_i32 = arith.constant 0 : i32
    %c0_i32_0 = arith.constant 0 : i32
    %c0_i32_1 = arith.constant 0 : i32
    return %c0_i32, %c0_i32_0 : i32, i32
  }
  func.func @transform_2(%arg0: i32) -> (i32, i32) {
    %c0_i32 = arith.constant 0 : i32
    %c0_i32_0 = arith.constant 0 : i32
    %c0_i32_1 = arith.constant 0 : i32
    return %c0_i32, %c0_i32_0 : i32, i32
  }
  func.func @transform_3(%arg0: i32) -> (i32, i32) {
    %c0_i32 = arith.constant 0 : i32
    %c0_i32_0 = arith.constant 0 : i32
    %c0_i32_1 = arith.constant 0 : i32
    return %c0_i32, %c0_i32_0 : i32, i32
  }
  func.func @transform_4(%arg0: i32) -> (i32, i32) {
    %c0_i32 = arith.constant 0 : i32
    %c0_i32_0 = arith.constant 0 : i32
    %c0_i32_1 = arith.constant 0 : i32
    return %c0_i32, %c0_i32_0 : i32, i32
  }
  func.func @transform_5(%arg0: i32) -> (i32, i32) {
    %c0_i32 = arith.constant 0 : i32
    %c0_i32_0 = arith.constant 0 : i32
    %c0_i32_1 = arith.constant 0 : i32
    return %c0_i32, %c0_i32_0 : i32, i32
  }
  func.func @transform_6(%arg0: i32) -> (i32, i32) {
    %c0_i32 = arith.constant 0 : i32
    %c0_i32_0 = arith.constant 0 : i32
    %c0_i32_1 = arith.constant 0 : i32
    return %c0_i32, %c0_i32_0 : i32, i32
  }
  func.func @transform_7(%arg0: i32) -> (i32, i32) {
    %c0_i32 = arith.constant 0 : i32
    %c0_i32_0 = arith.constant 0 : i32
    %c0_i32_1 = arith.constant 0 : i32
    return %c0_i32, %c0_i32_0 : i32, i32
  }
  func.func @transform_8(%arg0: i32) -> (i32, i32) {
    %c0_i32 = arith.constant 0 : i32
    %c0_i32_0 = arith.constant 0 : i32
    %c0_i32_1 = arith.constant 0 : i32
    return %c0_i32, %c0_i32_0 : i32, i32
  }
  func.func @transform_9(%arg0: i32) -> (i32, i32) {
    %c0_i32 = arith.constant 0 : i32
    %c0_i32_0 = arith.constant 0 : i32
    return %arg0, %c0_i32 : i32, i32
  }
}

</mosaic_0001>

<bundles_post_ra>
// kernel: tpu_custom_call.1
= control target key start
LH: loop header
LB: loop body
LE: loop exit
PB: predicated region body
PF: predicated region fallthrough
CT: control target
= control target key end

     0   :  { %14 = vsyncpa [#allocation3], 0  ;;  %s9622_s0 = inlined_call_operand.hbm [shape: bf16[8,384], index: 0, kind: input, shape index: {}]   ;;  %s9623_s1 = inlined_call_operand.hbm [shape: bf16[384,896], index: 1, kind: input, shape index: {}]   ;;  %s9624_s2 = inlined_call_operand.hbm [shape: f32[1,896], index: 2, kind: input, shape index: {}]   ;;  %s9625_s3 = inlined_call_operand.hbm [shape: bf16[896,1024], index: 3, kind: input, shape index: {}]   ;;  %s9626_s4 = inlined_call_operand.hbm [shape: f32[1,1024], index: 4, kind: input, shape index: {}]   ;;  %s9627_s5 = inlined_call_operand.hbm [shape: bf16[1024,512], index: 5, kind: input, shape index: {}]   ;;  %s9628_s6 = inlined_call_operand.hbm [shape: f32[1,512], index: 6, kind: input, shape index: {}]   ;;  %s9629_s7 = inlined_call_operand.hbm [shape: bf16[512,128], index: 7, kind: input, shape index: {}]   ;;  %s9630_s8 = inlined_call_operand.hbm [shape: f32[1,128], index: 8, kind: input, shape index: {}]   ;;  %s9631_s9 = inlined_call_operand.hbm [shape: f32[8,128], index: 9, kind: output, shape index: {}]  }
   0x1   :  { %15 = vsyncpa [#allocation6], 0 }
   0x2   :  { %16 = vsyncpa [#allocation9], 0 }
   0x3   :  { %17 = vsyncpa [#allocation12], 0 }
   0x4   :  { %18 = vsyncpa [#allocation15], 0 }
   0x5   :  { %19 = vsyncpa [#allocation4], 0  ;;  %s9269_s30 = smov [#allocation5]   ;;  %s9037_s13 = scalar_lea.hbm %s9623_s1, 21504 }
   0x6   :  { %s35_s10 = sshll.u32 %s9269_s30, 4  ;;  %p9038_p0 = scmp.ne.s32.totalorder %s9623_s1, %s9037_s13  ;;  %s36_s10 = int_to_ptr.vmem [resolvable:$true] %s35_s10 }
   0x7   :  { %p9041_p1 = scmp.lt.u32.totalorder %s9037_s13, %s9623_s1 }
   0x9   :  { %p9043_p2 = pnand %p9041_p1, %p9038_p0 }
   0xb   :  { %9046 = shalt.err (!%p9043_p2)
}
   0xc   :  { %s9047_s18 = scalar_lea.vmem %s36_s10, 21504  ;;  %p9052_p4 = scmp.lt.s32.totalorder %s36_s10, %s36_s10 }
   0xd   :  { %p9048_p3 = scmp.ne.s32.totalorder %s36_s10, %s9047_s18  ;;  %p9053_p5 = scmp.lt.s32.totalorder %s9047_s18, %s9047_s18 }
   0xf   :  { %p9054_p6 = por %p9053_p5, %p9052_p4 }
  0x11   :  { %p9055_p7 = pnand %p9054_p6, %p9048_p3 }
  0x13   :  { %9058 = shalt.err (!%p9055_p7)
}
  0x14   :  { %s9270_s19 = smov 448   ;;  %s9271_s20 = smov 28  }
  0x15   :  { %41 = dma.hbm_to_vmem [thread:$0]  %s9623_s1, 21504, %s36_s10, [#allocation6], %s9270_s19, %s9270_s19, %s9271_s20  }
  0x16   :  { %s9272_s23 = smov [#allocation8]   ;;  %s9059_s27 = scalar_lea.hbm %s9625_s3, 57344 }
  0x17   :  { %s57_s24 = sshll.u32 %s9272_s23, 4  ;;  %p9060_p8 = scmp.ne.s32.totalorder %s9625_s3, %s9059_s27  ;;  %s58_s24 = int_to_ptr.vmem [resolvable:$true] %s57_s24 }
  0x18   :  { %p9063_p9 = scmp.lt.u32.totalorder %s9059_s27, %s9625_s3 }
  0x1a   :  { %p9065_p10 = pnand %p9063_p9, %p9060_p8 }
  0x1c   :  { %9068 = shalt.err (!%p9065_p10)
}
  0x1d   :  { %s9069_s12 = scalar_lea.vmem %s58_s24, 57344  ;;  %p9074_p12 = scmp.lt.s32.totalorder %s58_s24, %s58_s24 }
  0x1e   :  { %p9070_p11 = scmp.ne.s32.totalorder %s58_s24, %s9069_s12  ;;  %p9075_p13 = scmp.lt.s32.totalorder %s9069_s12, %s9069_s12 }
  0x20   :  { %p9076_p0 = por %p9075_p13, %p9074_p12 }
  0x22   :  { %p9077_p1 = pnand %p9076_p0, %p9070_p11 }
  0x24   :  { %9080 = shalt.err (!%p9077_p1)
}
  0x25   :  { %s9273_s1 = smov 512   ;;  %s9274_s10 = smov 32  }
  0x26   :  { %63 = dma.hbm_to_vmem [thread:$0]  %s9625_s3, 57344, %s58_s24, [#allocation9], %s9273_s1, %s9273_s1, %s9274_s10  }
  0x27   :  { %s9275_s15 = smov [#allocation11]   ;;  %s9081_s19 = scalar_lea.hbm %s9627_s5, 32768 }
  0x28   :  { %s79_s16 = sshll.u32 %s9275_s15, 4  ;;  %p9082_p2 = scmp.ne.s32.totalorder %s9627_s5, %s9081_s19  ;;  %s80_s16 = int_to_ptr.vmem [resolvable:$true] %s79_s16 }
  0x29   :  { %p9085_p3 = scmp.lt.u32.totalorder %s9081_s19, %s9627_s5 }
  0x2b   :  { %p9087_p4 = pnand %p9085_p3, %p9082_p2 }
  0x2d   :  { %9090 = shalt.err (!%p9087_p4)
}
  0x2e   :  { %s9091_s25 = scalar_lea.vmem %s80_s16, 32768  ;;  %p9096_p6 = scmp.lt.s32.totalorder %s80_s16, %s80_s16 }
  0x2f   :  { %p9092_p5 = scmp.ne.s32.totalorder %s80_s16, %s9091_s25  ;;  %p9097_p7 = scmp.lt.s32.totalorder %s9091_s25, %s9091_s25 }
  0x31   :  { %p9098_p8 = por %p9097_p7, %p9096_p6 }
  0x33   :  { %p9099_p9 = pnand %p9098_p8, %p9092_p5 }
  0x35   :  { %9102 = shalt.err (!%p9099_p9)
}
  0x36   :  { %s9276_s3 = smov 256   ;;  %s9277_s24 = smov 16  }
  0x37   :  { %85 = dma.hbm_to_vmem [thread:$0]  %s9627_s5, 32768, %s80_s16, [#allocation12], %s9276_s3, %s9276_s3, %s9277_s24  }
  0x38   :  { %s9278_s28 = smov [#allocation14]   ;;  %s9103_s12 = scalar_lea.hbm %s9629_s7, 4096 }
  0x39   :  { %s101_s29 = sshll.u32 %s9278_s28, 4  ;;  %p9104_p10 = scmp.ne.s32.totalorder %s9629_s7, %s9103_s12  ;;  %s102_s29 = int_to_ptr.vmem [resolvable:$true] %s101_s29 }
  0x3a   :  { %p9107_p11 = scmp.lt.u32.totalorder %s9103_s12, %s9629_s7 }
  0x3c   :  { %p9109_p12 = pnand %p9107_p11, %p9104_p10 }
  0x3e   :  { %9112 = shalt.err (!%p9109_p12)
}
  0x3f   :  { %s9113_s15 = scalar_lea.vmem %s102_s29, 4096  ;;  %p9118_p0 = scmp.lt.s32.totalorder %s102_s29, %s102_s29 }
  0x40   :  { %p9114_p13 = scmp.ne.s32.totalorder %s102_s29, %s9113_s15  ;;  %p9119_p1 = scmp.lt.s32.totalorder %s9113_s15, %s9113_s15 }
  0x42   :  { %p9120_p2 = por %p9119_p1, %p9118_p0 }
  0x44   :  { %p9121_p3 = pnand %p9120_p2, %p9114_p13 }
  0x46   :  { %9124 = shalt.err (!%p9121_p3)
}
  0x47   :  { %s9279_s5 = smov 64   ;;  %s9280_s16 = smov 4  }
  0x48   :  { %107 = dma.hbm_to_vmem [thread:$0]  %s9629_s7, 4096, %s102_s29, [#allocation15], %s9279_s5, %s9279_s5, %s9280_s16  }
  0x49   :  { %s9281_s19 = smov [#allocation2]   ;;  %s9282_s21 = smov [#allocation7]  }
  0x4a   :  { %s26_s20 = sshll.u32 %s9281_s19, 4  ;;  %s48_s22 = sshll.u32 %s9282_s21, 4  ;;  %s27_s20 = int_to_ptr.vmem [resolvable:$true] %s26_s20  ;;  %s49_s22 = int_to_ptr.vmem [resolvable:$true] %s48_s22 }
  0x4b   :  { %s9125_s3 = scalar_lea.hbm %s9622_s0, 192 }
  0x4c   :  { %p9126_p4 = scmp.ne.s32.totalorder %s9622_s0, %s9125_s3  ;;  %p9129_p5 = scmp.lt.u32.totalorder %s9125_s3, %s9622_s0 }
  0x4e   :  { %p9131_p6 = pnand %p9129_p5, %p9126_p4 }
  0x50   :  { %9134 = shalt.err (!%p9131_p6)
}
  0x51   :  { %s9135_s7 = scalar_lea.vmem %s27_s20, 192  ;;  %p9140_p8 = scmp.lt.s32.totalorder %s27_s20, %s27_s20 }
  0x52   :  { %p9136_p7 = scmp.ne.s32.totalorder %s27_s20, %s9135_s7  ;;  %p9141_p9 = scmp.lt.s32.totalorder %s9135_s7, %s9135_s7 }
  0x54   :  { %p9142_p10 = por %p9141_p9, %p9140_p8 }
  0x56   :  { %p9143_p11 = pnand %p9142_p10, %p9136_p7 }
  0x58   :  { %9146 = shalt.err (!%p9143_p11)
}
  0x59   :  { %29 = dma.hbm_to_vmem [thread:$0]  %s9622_s0, 192, %s27_s20, [#allocation3]  }
  0x5a   :  { %s9147_s1 = scalar_lea.hbm %s9624_s2, 112 }
  0x5b   :  { %p9148_p12 = scmp.ne.s32.totalorder %s9624_s2, %s9147_s1  ;;  %p9151_p13 = scmp.lt.u32.totalorder %s9147_s1, %s9624_s2 }
  0x5d   :  { %p9153_p0 = pnand %p9151_p13, %p9148_p12 }
  0x5f   :  { %9156 = shalt.err (!%p9153_p0)
}
  0x60   :  { %s9157_s5 = scalar_lea.vmem %s49_s22, 112  ;;  %s9161_s16 = scalar_lea.vmem %s49_s22, 128 }
  0x61   :  { %p9158_p1 = scmp.ne.s32.totalorder %s49_s22, %s9157_s5  ;;  %p9162_p2 = scmp.lt.s32.totalorder %s49_s22, %s49_s22 }
  0x62   :  { %p9163_p3 = scmp.lt.s32.totalorder %s9161_s16, %s9157_s5 }
  0x64   :  { %p9164_p4 = por %p9163_p3, %p9162_p2 }
  0x66   :  { %p9165_p5 = pnand %p9164_p4, %p9158_p1 }
  0x68   :  { %9168 = shalt.err (!%p9165_p5)
}
  0x69   :  { %51 = dma.hbm_to_vmem [thread:$0]  %s9624_s2, 112, %s49_s22, [#allocation6]  }
  0x6a   :  { %s9283_s18 = smov [#allocation10]   ;;  %s9284_s20 = smov [#allocation13]  }
  0x6b   :  { %s70_s19 = sshll.u32 %s9283_s18, 4  ;;  %s92_s21 = sshll.u32 %s9284_s20, 4  ;;  %s71_s19 = int_to_ptr.vmem [resolvable:$true] %s70_s19  ;;  %s93_s21 = int_to_ptr.vmem [resolvable:$true] %s92_s21 }
  0x6c   :  { %s9169_s3 = scalar_lea.hbm %s9626_s4, 128 }
  0x6d   :  { %p9170_p6 = scmp.ne.s32.totalorder %s9626_s4, %s9169_s3  ;;  %p9173_p7 = scmp.lt.u32.totalorder %s9169_s3, %s9626_s4 }
  0x6f   :  { %p9175_p8 = pnand %p9173_p7, %p9170_p6 }
  0x71   :  { %9178 = shalt.err (!%p9175_p8)
}
  0x72   :  { %s9179_s2 = scalar_lea.vmem %s71_s19, 128  ;;  %p9184_p10 = scmp.lt.s32.totalorder %s71_s19, %s71_s19 }
  0x73   :  { %p9180_p9 = scmp.ne.s32.totalorder %s71_s19, %s9179_s2  ;;  %p9185_p11 = scmp.lt.s32.totalorder %s9179_s2, %s9179_s2 }
  0x75   :  { %p9186_p12 = por %p9185_p11, %p9184_p10 }
  0x77   :  { %p9187_p13 = pnand %p9186_p12, %p9180_p9 }
  0x79   :  { %9190 = shalt.err (!%p9187_p13)
}
  0x7a   :  { %73 = dma.hbm_to_vmem [thread:$0]  %s9626_s4, 128, %s71_s19, [#allocation9]  }
  0x7b   :  { %s9191_s11 = scalar_lea.hbm %s9628_s6, 64 }
  0x7c   :  { %p9192_p0 = scmp.ne.s32.totalorder %s9628_s6, %s9191_s11  ;;  %p9195_p1 = scmp.lt.u32.totalorder %s9191_s11, %s9628_s6 }
  0x7e   :  { %p9197_p2 = pnand %p9195_p1, %p9192_p0 }
  0x80   :  { %9200 = shalt.err (!%p9197_p2)
}
  0x81   :  { %s9201_s14 = scalar_lea.vmem %s93_s21, 64  ;;  %p9206_p4 = scmp.lt.s32.totalorder %s93_s21, %s93_s21 }
  0x82   :  { %p9202_p3 = scmp.ne.s32.totalorder %s93_s21, %s9201_s14  ;;  %p9207_p5 = scmp.lt.s32.totalorder %s9201_s14, %s9201_s14 }
  0x84   :  { %p9208_p6 = por %p9207_p5, %p9206_p4 }
  0x86   :  { %p9209_p7 = pnand %p9208_p6, %p9202_p3 }
  0x88   :  { %9212 = shalt.err (!%p9209_p7)
}
  0x89   :  { %95 = dma.hbm_to_vmem [thread:$0]  %s9628_s6, 64, %s93_s21, [#allocation12]  }
  0x8a   :  { %s9285_s5 = smov [#allocation16]   ;;  %s9213_s18 = scalar_lea.hbm %s9630_s8, 16 }
  0x8b   :  { %s114_s16 = sshll.u32 %s9285_s5, 4  ;;  %p9214_p8 = scmp.ne.s32.totalorder %s9630_s8, %s9213_s18  ;;  %s115_s16 = int_to_ptr.vmem [resolvable:$true] %s114_s16 }
  0x8c   :  { %p9217_p9 = scmp.lt.u32.totalorder %s9213_s18, %s9630_s8 }
  0x8e   :  { %p9219_p10 = pnand %p9217_p9, %p9214_p8 }
  0x90   :  { %9222 = shalt.err (!%p9219_p10)
}
  0x91   :  { %s9223_s3 = scalar_lea.vmem %s115_s16, 16  ;;  %s9227_s6 = scalar_lea.vmem %s115_s16, 32 }
  0x92   :  { %p9224_p11 = scmp.ne.s32.totalorder %s115_s16, %s9223_s3  ;;  %p9228_p12 = scmp.lt.s32.totalorder %s115_s16, %s115_s16 }
  0x93   :  { %p9229_p13 = scmp.lt.s32.totalorder %s9227_s6, %s9223_s3 }
  0x95   :  { %p9230_p0 = por %p9229_p13, %p9228_p12 }
  0x97   :  { %p9231_p1 = pnand %p9230_p0, %p9224_p11 }
  0x99   :  { %9234 = shalt.err (!%p9231_p1)
}
  0x9a   :  { %117 = dma.hbm_to_vmem [thread:$0]  %s9630_s8, 16, %s115_s16, [#allocation15]  }
  0x9b   :  { %9257 = dma.done.wait [#allocation3], 192  }
  0x9c   :  { %9258 = vsyncadd [#allocation3], 4294967104 }
  0x9d   :  { %9259 = dma.done.wait [#allocation6], 21616  }
  0x9e   :  { %9260 = vsyncadd [#allocation6], 4294945680 }
  0x9f   :  { %9261 = dma.done.wait [#allocation9], 57472  }
  0xa0   :  { %9262 = vsyncadd [#allocation9], 4294909824 }
  0xa1   :  { %9263 = dma.done.wait [#allocation12], 32832  }
  0xa2   :  { %9264 = vsyncadd [#allocation12], 4294934464 }
  0xa3   :  { %9265 = dma.done.wait [#allocation15], 4112  }
  0xa4   :  { %9266 = vsyncadd [#allocation15], 4294963184  ;;  %v8377_v0 = vld [vmem:[#allocation5 + $0x4] ss:$28 sps:$4 sm:$0xff]   ;;  %v8380_v2 = vld [vmem:[#allocation5 + $0x3c] ss:$28 sps:$4 sm:$0xff]  }
  0xa5   :  { %v8379_v1 = vld [vmem:[#allocation5] ss:$28 sps:$4 sm:$0xff]   ;;  %2023 = vmatprep.subr.bf16.mxu0 %v8377_v0  ;;  %v8382_v3 = vld [vmem:[#allocation5 + $0x38] ss:$28 sps:$4 sm:$0xff]   ;;  %v8385_v5 = vld [vmem:[#allocation5 + $0x70] ss:$28 sps:$4 sm:$0xff]  }
  0xa6   :  { %2024 = vmatpush1.bf16.msra.mxu0 %v8379_v1  ;;  %v8383_v4 = vld [vmem:[#allocation5 + $0x74] ss:$28 sps:$4 sm:$0xff]   ;;  %v8386_v6 = vld [vmem:[#allocation5 + $0xac] ss:$28 sps:$4 sm:$0xff]   ;;  %v8389_v10 = vld [vmem:[#allocation5 + $0xe4] ss:$28 sps:$4 sm:$0xff]  }
  0xa7   :  { %2025 = vmatprep.subr.bf16.mxu0 %v8380_v2  ;;  %v8388_v7 = vld [vmem:[#allocation5 + $0xa8] ss:$28 sps:$4 sm:$0xff]   ;;  %v8409_v12 = vld [vmem:[#allocation5 + $0x40] ss:$28 sps:$4 sm:$0xff]   ;;  %v8415_v16 = vld [vmem:[#allocation5 + $0x78] ss:$28 sps:$4 sm:$0xff]  }
  0xa8   :  { %v8401_v8 = vld [vmem:[#allocation5 + $0xc] ss:$28 sps:$4 sm:$0xff]   ;;  %v8407_v11 = vld [vmem:[#allocation5 + $0x44] ss:$28 sps:$4 sm:$0xff]   ;;  %v8392_v14 = vld [vmem:[#allocation5 + $0x11c] ss:$28 sps:$4 sm:$0xff]  }
  0xa9   :  { %v8403_v9 = vld [vmem:[#allocation5 + $0x8] ss:$28 sps:$4 sm:$0xff]   ;;  %2105 = vmatprep.subr.bf16.mxu1 %v8401_v8  ;;  %v8391_v13 = vld [vmem:[#allocation5 + $0xe0] ss:$28 sps:$4 sm:$0xff]   ;;  %v8394_v17 = vld [vmem:[#allocation5 + $0x118] ss:$28 sps:$4 sm:$0xff]  }
  0xaa   :  { %2026 = vmatpush1.bf16.msra.mxu0 %v8382_v3  ;;  %2106 = vmatpush1.bf16.msra.mxu1 %v8403_v9  ;;  %v8413_v15 = vld [vmem:[#allocation5 + $0x7c] ss:$28 sps:$4 sm:$0xff]   ;;  %v8419_v18 = vld [vmem:[#allocation5 + $0xb4] ss:$28 sps:$4 sm:$0xff]   ;;  %v8425_v22 = vld [vmem:[#allocation5 + $0xec] ss:$28 sps:$4 sm:$0xff]  }
  0xab   :  { %2027 = vmatprep.subr.bf16.mxu0 %v8383_v4  ;;  %2107 = vmatprep.subr.bf16.mxu1 %v8407_v11  ;;  %v8395_v19 = vld [vmem:[#allocation5 + $0x154] ss:$28 sps:$4 sm:$0xff]   ;;  %v8398_v23 = vld [vmem:[#allocation5 + $0x18c] ss:$28 sps:$4 sm:$0xff]   ;;  %v8431_v26 = vld [vmem:[#allocation5 + $0x124] ss:$28 sps:$4 sm:$0xff]  }
  0xac   :  { %v8421_v20 = vld [vmem:[#allocation5 + $0xb0] ss:$28 sps:$4 sm:$0xff]   ;;  %v8427_v24 = vld [vmem:[#allocation5 + $0xe8] ss:$28 sps:$4 sm:$0xff]   ;;  %v8433_v28 = vld [vmem:[#allocation5 + $0x120] ss:$28 sps:$4 sm:$0xff]  }
  0xad   :  { %v8397_v21 = vld [vmem:[#allocation5 + $0x150] ss:$28 sps:$4 sm:$0xff]   ;;  %v8400_v25 = vld [vmem:[#allocation5 + $0x188] ss:$28 sps:$4 sm:$0xff]   ;;  %v8406_v29 = vld [vmem:[#allocation5 + $0x1c0] ss:$28 sps:$4 sm:$0xff]  }
  0xae   :  { %2028 = vmatpush1.bf16.msra.mxu0 %v8385_v5  ;;  %2108 = vmatpush1.bf16.msra.mxu1 %v8409_v12  ;;  %v8404_v27 = vld [vmem:[#allocation5 + $0x1c4] ss:$28 sps:$4 sm:$0xff]   ;;  %v8437_v30 = vld [vmem:[#allocation5 + $0x15c] ss:$28 sps:$4 sm:$0xff]   ;;  %v8443_v36 = vld [vmem:[#allocation5 + $0x194] ss:$28 sps:$4 sm:$0xff]  }
  0xaf   :  { %2029 = vmatprep.subr.bf16.mxu0 %v8386_v6  ;;  %2109 = vmatprep.subr.bf16.mxu1 %v8413_v15  ;;  %v8410_v31 = vld [vmem:[#allocation5 + $0x1fc] ss:$28 sps:$4 sm:$0xff]   ;;  %v8416_v37 = vld [vmem:[#allocation5 + $0x234] ss:$28 sps:$4 sm:$0xff]   ;;  %v8449_v40 = vld [vmem:[#allocation5 + $0x1cc] ss:$28 sps:$4 sm:$0xff]  }
  0xb0   :  { %v1110_v32 = vld [vmem:[#allocation2] sm:$0xff]  ;;  %v8418_v38 = vld [vmem:[#allocation5 + $0x230] ss:$28 sps:$4 sm:$0xff]   ;;  %v8424_v42 = vld [vmem:[#allocation5 + $0x268] ss:$28 sps:$4 sm:$0xff]   ;;  %vm9288_vm0 = vmmov 0  }
  0xb1   :  { %v8412_v33 = vld [vmem:[#allocation5 + $0x1f8] ss:$28 sps:$4 sm:$0xff]   ;;  %v9448_v35 = vcombine.high %v1110_v32, %v1110_v32  ;;  %v8445_v39 = vld [vmem:[#allocation5 + $0x190] ss:$28 sps:$4 sm:$0xff]   ;;  %v8451_v43 = vld [vmem:[#allocation5 + $0x1c8] ss:$28 sps:$4 sm:$0xff]   ;;  %v9452_v62 = vcombine.low %v1110_v32, %v1110_v32 }
  0xb2   :  { %2030 = vmatpush1.bf16.msra.mxu0 %v8388_v7  ;;  %2110 = vmatpush1.bf16.msra.mxu1 %v8415_v16  ;;  %v8439_v34 = vld [vmem:[#allocation5 + $0x158] ss:$28 sps:$4 sm:$0xff]   ;;  %v8422_v41 = vld [vmem:[#allocation5 + $0x26c] ss:$28 sps:$4 sm:$0xff]   ;;  %v8457_v44 = vld [vmem:[#allocation5 + $0x204] ss:$28 sps:$4 sm:$0xff]  }
  0xb3   :  { %2031 = vmatprep.subr.bf16.mxu0 %v8389_v10  ;;  %2111 = vmatprep.subr.bf16.mxu1 %v8419_v18  ;;  %v8428_v45 = vld [vmem:[#allocation5 + $0x2a4] ss:$28 sps:$4 sm:$0xff]   ;;  %v8463_v48 = vld [vmem:[#allocation5 + $0x23c] ss:$28 sps:$4 sm:$0xff]   ;;  %v8469_v52 = vld [vmem:[#allocation5 + $0x274] ss:$28 sps:$4 sm:$0xff]  }
  0xb4   :  { %2055 = vmatprep.mubr.bf16.mxu0 %v9448_v35  ;;  %2137 = vmatprep.mubr.bf16.mxu1 %v9448_v35  ;;  %v8430_v46 = vld [vmem:[#allocation5 + $0x2a0] ss:$28 sps:$4 sm:$0xff]   ;;  %v8436_v50 = vld [vmem:[#allocation5 + $0x2d8] ss:$28 sps:$4 sm:$0xff]   ;;  %v8442_v54 = vld [vmem:[#allocation5 + $0x310] ss:$28 sps:$4 sm:$0xff]  }
  0xb5   :  { %v8459_v47 = vld [vmem:[#allocation5 + $0x200] ss:$28 sps:$4 sm:$0xff]   ;;  %v8465_v51 = vld [vmem:[#allocation5 + $0x238] ss:$28 sps:$4 sm:$0xff]   ;;  %v8471_v55 = vld [vmem:[#allocation5 + $0x270] ss:$28 sps:$4 sm:$0xff]  }
  0xb6   :  { %2032 = vmatpush1.bf16.msra.mxu0 %v8391_v13  ;;  %2112 = vmatpush1.bf16.msra.mxu1 %v8421_v20  ;;  %v8434_v49 = vld [vmem:[#allocation5 + $0x2dc] ss:$28 sps:$4 sm:$0xff]   ;;  %v8440_v53 = vld [vmem:[#allocation5 + $0x314] ss:$28 sps:$4 sm:$0xff]   ;;  %v8475_v56 = vld [vmem:[#allocation5 + $0x2ac] ss:$28 sps:$4 sm:$0xff]  }
  0xb7   :  { %2033 = vmatprep.subr.bf16.mxu0 %v8392_v14  ;;  %2113 = vmatprep.subr.bf16.mxu1 %v8425_v22  ;;  %v8446_v57 = vld [vmem:[#allocation5 + $0x34c] ss:$28 sps:$4 sm:$0xff]   ;;  %v8481_v60 = vld [vmem:[#allocation5 + $0x2e4] ss:$28 sps:$4 sm:$0xff]   ;;  %v8487_v1 = vld [vmem:[#allocation5 + $0x31c] ss:$28 sps:$4 sm:$0xff]  }
  0xb8   :  { %v8477_v58 = vld [vmem:[#allocation5 + $0x2a8] ss:$28 sps:$4 sm:$0xff]   ;;  %v8483_v63 = vld [vmem:[#allocation5 + $0x2e0] ss:$28 sps:$4 sm:$0xff]   ;;  %v8489_v3 = vld [vmem:[#allocation5 + $0x318] ss:$28 sps:$4 sm:$0xff]  }
  0xb9   :  { %v8448_v59 = vld [vmem:[#allocation5 + $0x348] ss:$28 sps:$4 sm:$0xff]   ;;  %v8453_v0 = vld [vmem:[#allocation5 + $0x380] ss:$28 sps:$4 sm:$0xff]   ;;  %v8460_v4 = vld [vmem:[#allocation5 + $0x3b8] ss:$28 sps:$4 sm:$0xff]  }
  0xba   :  { %2034 = vmatpush1.bf16.msra.mxu0 %v8394_v17  ;;  %2114 = vmatpush1.bf16.msra.mxu1 %v8427_v24  ;;  %v8455_v61 = vld [vmem:[#allocation5 + $0x384] ss:$28 sps:$4 sm:$0xff]   ;;  %v8462_v2 = vld [vmem:[#allocation5 + $0x3bc] ss:$28 sps:$4 sm:$0xff]   ;;  %v8493_v5 = vld [vmem:[#allocation5 + $0x354] ss:$28 sps:$4 sm:$0xff]  }
  0xbb   :  { %2035 = vmatprep.subr.bf16.mxu0 %v8395_v19  ;;  %2115 = vmatprep.subr.bf16.mxu1 %v8431_v26  ;;  %v8468_v6 = vld [vmem:[#allocation5 + $0x3f4] ss:$28 sps:$4 sm:$0xff]   ;;  %v9286_v7 = vmov 0   ;;  %v8501_v10 = vld [vmem:[#allocation5 + $0x38c] ss:$28 sps:$4 sm:$0xff]   ;;  %s9289_s8 = smov [#allocation17]  }
  0xbc   :  { %v8495_v8 = vld [vmem:[#allocation5 + $0x350] ss:$28 sps:$4 sm:$0xff]   ;;  %v8499_v12 = vld [vmem:[#allocation5 + $0x388] ss:$28 sps:$4 sm:$0xff]   ;;  %v8506_v16 = vld [vmem:[#allocation5 + $0x3c0] ss:$28 sps:$4 sm:$0xff]  }
  0xbd   :  { %v8466_v9 = vld [vmem:[#allocation5 + $0x3f0] ss:$28 sps:$4 sm:$0xff]   ;;  %v8472_v13 = vld [vmem:[#allocation5 + $0x428] ss:$28 sps:$4 sm:$0xff]   ;;  %v8478_v17 = vld [vmem:[#allocation5 + $0x460] ss:$28 sps:$4 sm:$0xff]  }
  0xbe   :  { %2036 = vmatpush1.bf16.msra.mxu0 %v8397_v21  ;;  %2116 = vmatpush1.bf16.msra.mxu1 %v8433_v28  ;;  %v8474_v11 = vld [vmem:[#allocation5 + $0x42c] ss:$28 sps:$4 sm:$0xff]   ;;  %v8508_v14 = vld [vmem:[#allocation5 + $0x3c4] ss:$28 sps:$4 sm:$0xff]   ;;  %v8514_v18 = vld [vmem:[#allocation5 + $0x3fc] ss:$28 sps:$4 sm:$0xff]  }
  0xbf   :  { %2037 = vmatprep.subr.bf16.mxu0 %v8398_v23  ;;  %2117 = vmatprep.subr.bf16.mxu1 %v8437_v30  ;;  %v8480_v15 = vld [vmem:[#allocation5 + $0x464] ss:$28 sps:$4 sm:$0xff]   ;;  %v8486_v19 = vld [vmem:[#allocation5 + $0x49c] ss:$28 sps:$4 sm:$0xff]   ;;  %v8520_v22 = vld [vmem:[#allocation5 + $0x434] ss:$28 sps:$4 sm:$0xff]  }
  0xc0   :  { %v8512_v20 = vld [vmem:[#allocation5 + $0x3f8] ss:$28 sps:$4 sm:$0xff]   ;;  %v8518_v24 = vld [vmem:[#allocation5 + $0x430] ss:$28 sps:$4 sm:$0xff]   ;;  %v8496_v28 = vld [vmem:[#allocation5 + $0x508] ss:$28 sps:$4 sm:$0xff]  }
  0xc1   :  { %v8484_v21 = vld [vmem:[#allocation5 + $0x498] ss:$28 sps:$4 sm:$0xff]   ;;  %v8526_v26 = vld [vmem:[#allocation5 + $0x46c] ss:$28 sps:$4 sm:$0xff]   ;;  %v8532_v30 = vld [vmem:[#allocation5 + $0x4a4] ss:$28 sps:$4 sm:$0xff]  }
  0xc2   :  { %2038 = vmatpush1.bf16.msra.mxu0 %v8400_v25  ;;  %2118 = vmatpush1.bf16.msra.mxu1 %v8439_v34  ;;  %v8492_v23 = vld [vmem:[#allocation5 + $0x4d4] ss:$28 sps:$4 sm:$0xff]   ;;  %v8530_v34 = vld [vmem:[#allocation5 + $0x4a0] ss:$28 sps:$4 sm:$0xff]   ;;  %s7238_s26 = sshll.u32 %s9289_s8, 4  ;;  %s7239_s26 = int_to_ptr.vmem [resolvable:$true] %s7238_s26 }
  0xc3   :  { %2039 = vmatprep.subr.bf16.mxu0 %v8404_v27  ;;  %2119 = vmatprep.subr.bf16.mxu1 %v8443_v36  ;;  %v8490_v25 = vld [vmem:[#allocation5 + $0x4d0] ss:$28 sps:$4 sm:$0xff]   ;;  %v8538_v36 = vld [vmem:[#allocation5 + $0x4dc] ss:$28 sps:$4 sm:$0xff]   ;;  %s9235_s27 = scalar_lea.vmem %s7239_s26, 128  ;;  %p9240_p3 = scmp.lt.s32.totalorder %s7239_s26, %s7239_s26 }
  0xc4   :  { %v8498_v27 = vld [vmem:[#allocation5 + $0x50c] ss:$28 sps:$4 sm:$0xff]   ;;  %v8505_v32 = vld [vmem:[#allocation5 + $0x14] ss:$28 sps:$4 sm:$0xff]   ;;  %p9236_p2 = scmp.ne.s32.totalorder %s7239_s26, %s9235_s27  ;;  %p9241_p4 = scmp.lt.s32.totalorder %s9235_s27, %s9235_s27 }
  0xc6   :  { %2040 = vmatpush1.bf16.msra.mxu0 %v8406_v29  ;;  %2120 = vmatpush1.bf16.msra.mxu1 %v8445_v39  ;;  %v8524_v29 = vld [vmem:[#allocation5 + $0x468] ss:$28 sps:$4 sm:$0xff]   ;;  %v8536_v39 = vld [vmem:[#allocation5 + $0x4d8] ss:$28 sps:$4 sm:$0xff]   ;;  %p9242_p5 = por %p9241_p4, %p9240_p3 }
  0xc7   :  { %2041 = vmatprep.subr.bf16.mxu0 %v8410_v31  ;;  %2121 = vmatprep.subr.bf16.mxu1 %v8449_v40  ;;  %v9458_v31 = vld [vmem:[#allocation2 + $0x8] ss:$0 sps:$4 sm:$0xff]   ;;  %v8544_v40 = vld [vmem:[#allocation5 + $0x514] ss:$28 sps:$4 sm:$0xff]  }
  0xc8   :  { %p9243_p6 = pnand %p9242_p5, %p9236_p2 }
  0xca   :  { %2042 = vmatpush1.bf16.msra.mxu0 %v8412_v33  ;;  %2122 = vmatpush1.bf16.msra.mxu1 %v8451_v43  ;;  %v8503_v33 = vld [vmem:[#allocation5 + $0x10] ss:$28 sps:$4 sm:$0xff]  }
  0xcb   :  { %2043 = vmatprep.subr.bf16.mxu0 %v8416_v37  ;;  %2123 = vmatprep.subr.bf16.mxu1 %v8457_v44  ;;  %v8511_v37 = vld [vmem:[#allocation5 + $0x4c] ss:$28 sps:$4 sm:$0xff]   ;;  %v8575_v44 = vld [vmem:[#allocation5 + $0x1d8] ss:$28 sps:$4 sm:$0xff]  }
  0xcc   :  { %v8542_v43 = vld [vmem:[#allocation5 + $0x510] ss:$28 sps:$4 sm:$0xff]  }
  0xce   :  { %2044 = vmatpush1.bf16.msra.mxu0 %v8418_v38  ;;  %2124 = vmatpush1.bf16.msra.mxu1 %v8459_v47  ;;  %v8509_v38 = vld [vmem:[#allocation5 + $0x48] ss:$28 sps:$4 sm:$0xff]   ;;  %v8521_v47 = vld [vmem:[#allocation5 + $0xb8] ss:$28 sps:$4 sm:$0xff]  }
  0xcf   :  { %2045 = vmatprep.subr.bf16.mxu0 %v8422_v41  ;;  %2125 = vmatprep.subr.bf16.mxu1 %v8463_v48  ;;  %v8517_v41 = vld [vmem:[#allocation5 + $0x84] ss:$28 sps:$4 sm:$0xff]   ;;  %v8580_v48 = vld [vmem:[#allocation5 + $0x210] ss:$28 sps:$4 sm:$0xff]  }
  0xd2   :  { %2046 = vmatpush1.bf16.msra.mxu0 %v8424_v42  ;;  %2126 = vmatpush1.bf16.msra.mxu1 %v8465_v51  ;;  %v8515_v42 = vld [vmem:[#allocation5 + $0x80] ss:$28 sps:$4 sm:$0xff]   ;;  %v8581_v51 = vld [vmem:[#allocation5 + $0x50] ss:$28 sps:$4 sm:$0xff]  }
  0xd3   :  { %2047 = vmatprep.subr.bf16.mxu0 %v8428_v45  ;;  %2127 = vmatprep.subr.bf16.mxu1 %v8469_v52  ;;  %v8523_v45 = vld [vmem:[#allocation5 + $0xbc] ss:$28 sps:$4 sm:$0xff]   ;;  %v8585_v52 = vld [vmem:[#allocation5 + $0x248] ss:$28 sps:$4 sm:$0xff]  }
  0xd6   :  { %2048 = vmatpush1.bf16.msra.mxu0 %v8430_v46  ;;  %2128 = vmatpush1.bf16.msra.mxu1 %v8471_v55  ;;  %v8576_v46 = vld [vmem:[#allocation5 + $0x18] ss:$28 sps:$4 sm:$0xff]   ;;  %v8586_v55 = vld [vmem:[#allocation5 + $0x88] ss:$28 sps:$4 sm:$0xff]  }
  0xd7   :  { %2049 = vmatprep.subr.bf16.mxu0 %v8434_v49  ;;  %2129 = vmatprep.subr.bf16.mxu1 %v8475_v56  ;;  %v8529_v49 = vld [vmem:[#allocation5 + $0xf4] ss:$28 sps:$4 sm:$0xff]   ;;  %v8590_v56 = vld [vmem:[#allocation5 + $0x280] ss:$28 sps:$4 sm:$0xff]  }
  0xda   :  { %2050 = vmatpush1.bf16.msra.mxu0 %v8436_v50  ;;  %2130 = vmatpush1.bf16.msra.mxu1 %v8477_v58  ;;  %v8527_v50 = vld [vmem:[#allocation5 + $0xf0] ss:$28 sps:$4 sm:$0xff]   ;;  %v8539_v58 = vld [vmem:[#allocation5 + $0x160] ss:$28 sps:$4 sm:$0xff]  }
  0xdb   :  { %2051 = vmatprep.subr.bf16.mxu0 %v8440_v53  ;;  %2131 = vmatprep.subr.bf16.mxu1 %v8481_v60  ;;  %v8535_v53 = vld [vmem:[#allocation5 + $0x12c] ss:$28 sps:$4 sm:$0xff]   ;;  %v8595_v60 = vld [vmem:[#allocation5 + $0x2b8] ss:$28 sps:$4 sm:$0xff]  }
  0xde   :  { %2052 = vmatpush1.bf16.msra.mxu0 %v8442_v54  ;;  %2132 = vmatpush1.bf16.msra.mxu1 %v8483_v63  ;;  %v8533_v54 = vld [vmem:[#allocation5 + $0x128] ss:$28 sps:$4 sm:$0xff]   ;;  %v8545_v63 = vld [vmem:[#allocation5 + $0x198] ss:$28 sps:$4 sm:$0xff]  }
  0xdf   :  { %2053 = vmatprep.subr.bf16.mxu0 %v8446_v57  ;;  %2133 = vmatprep.subr.bf16.mxu1 %v8487_v1  ;;  %v8541_v57 = vld [vmem:[#allocation5 + $0x164] ss:$28 sps:$4 sm:$0xff]   ;;  %v8550_v1 = vld [vmem:[#allocation5 + $0x1d4] ss:$28 sps:$4 sm:$0xff]  }
  0xe2   :  { %2054 = vmatpush1.bf16.msra.mxu0 %v8448_v59  ;;  %2134 = vmatpush1.bf16.msra.mxu1 %v8489_v3  ;;  %v8591_v59 = vld [vmem:[#allocation5 + $0xc0] ss:$28 sps:$4 sm:$0xff]   ;;  %v8548_v3 = vld [vmem:[#allocation5 + $0x1d0] ss:$28 sps:$4 sm:$0xff]  }
  0xe3   :  { %2064 = vmatprep.subr.bf16.mxu0 %v8455_v61  ;;  %2135 = vmatprep.subr.bf16.mxu1 %v8493_v5  ;;  %v8596_v61 = vld [vmem:[#allocation5 + $0xf8] ss:$28 sps:$4 sm:$0xff]   ;;  %v8553_v5 = vld [vmem:[#allocation5 + $0x20c] ss:$28 sps:$4 sm:$0xff]  }
  0xe5   :  { %2056 = vmatmul.mubr.bf16.vlgmr.msra.gmra.mrb[0].mxu0 %v9452_v62 }
  0xe6   :  { %2065 = vmatpush1.bf16.msra.mxu0 %v8453_v0  ;;  %2096 = vmatprep.mubr.bf16.mxu0 %v9286_v7  ;;  %v8600_v0 = vld [vmem:[#allocation5 + $0x2f0] ss:$28 sps:$4 sm:$0xff]  }
  0xe7   :  { %2066 = vmatprep.subr.bf16.mxu0 %v8462_v2  ;;  %2136 = vmatpush1.bf16.msra.mxu1 %v8495_v8  ;;  %v8601_v2 = vld [vmem:[#allocation5 + $0x130] ss:$28 sps:$4 sm:$0xff]   ;;  %v8551_v8 = vld [vmem:[#allocation5 + $0x208] ss:$28 sps:$4 sm:$0xff]  }
  0xe8   :  { %2146 = vmatprep.subr.bf16.mxu1 %v8501_v10  ;;  %v8556_v10 = vld [vmem:[#allocation5 + $0x244] ss:$28 sps:$4 sm:$0xff]  }
  0xea   :  { %2067 = vmatpush1.bf16.msra.mxu0 %v8460_v4  ;;  %2138 = vmatmul.mubr.bf16.vlgmr.msra.gmra.mrb[0].mxu1 %v9452_v62  ;;  %v8605_v4 = vld [vmem:[#allocation5 + $0x328] ss:$28 sps:$4 sm:$0xff]  }
  0xeb   :  { %2068 = vmatprep.subr.bf16.mxu0 %v8468_v6  ;;  %2147 = vmatpush1.bf16.msra.mxu1 %v8499_v12  ;;  %v8606_v6 = vld [vmem:[#allocation5 + $0x168] ss:$28 sps:$4 sm:$0xff]   ;;  %v8554_v12 = vld [vmem:[#allocation5 + $0x240] ss:$28 sps:$4 sm:$0xff]  }
  0xec   :  { %2178 = vmatprep.mubr.bf16.mxu1 %v9286_v7  ;;  %2148 = vmatprep.subr.bf16.mxu1 %v8508_v14  ;;  %v8612_v14 = vld [vmem:[#allocation5 + $0x398] ss:$28 sps:$4 sm:$0xff]  }
  0xee   :  { %2069 = vmatpush1.bf16.msra.mxu0 %v8466_v9  ;;  %v8610_v9 = vld [vmem:[#allocation5 + $0x360] ss:$28 sps:$4 sm:$0xff]  }
  0xef   :  { %2070 = vmatprep.subr.bf16.mxu0 %v8474_v11  ;;  %2149 = vmatpush1.bf16.msra.mxu1 %v8506_v16  ;;  %v8611_v11 = vld [vmem:[#allocation5 + $0x1a0] ss:$28 sps:$4 sm:$0xff]   ;;  %v8562_v16 = vld [vmem:[#allocation5 + $0x2b4] ss:$28 sps:$4 sm:$0xff]  }
  0xf0   :  { %2150 = vmatprep.subr.bf16.mxu1 %v8514_v18  ;;  %v8613_v18 = vld [vmem:[#allocation5 + $0x3d0] ss:$28 sps:$4 sm:$0xff]  }
  0xf2   :  { %2071 = vmatpush1.bf16.msra.mxu0 %v8472_v13  ;;  %v8559_v13 = vld [vmem:[#allocation5 + $0x27c] ss:$28 sps:$4 sm:$0xff]  }
  0xf3   :  { %2072 = vmatprep.subr.bf16.mxu0 %v8480_v15  ;;  %2151 = vmatpush1.bf16.msra.mxu1 %v8512_v20  ;;  %v8557_v15 = vld [vmem:[#allocation5 + $0x278] ss:$28 sps:$4 sm:$0xff]   ;;  %v8565_v20 = vld [vmem:[#allocation5 + $0x2ec] ss:$28 sps:$4 sm:$0xff]  }
  0xf4   :  { %2152 = vmatprep.subr.bf16.mxu1 %v8520_v22  ;;  %v8563_v22 = vld [vmem:[#allocation5 + $0x2e8] ss:$28 sps:$4 sm:$0xff]  }
  0xf6   :  { %2073 = vmatpush1.bf16.msra.mxu0 %v8478_v17  ;;  %v9287_v17 = vmov 0.0  }
  0xf7   :  { %2074 = vmatprep.subr.bf16.mxu0 %v8486_v19  ;;  %2153 = vmatpush1.bf16.msra.mxu1 %v8518_v24  ;;  %v8560_v19 = vld [vmem:[#allocation5 + $0x2b0] ss:$28 sps:$4 sm:$0xff]   ;;  %v8615_v24 = vld [vmem:[#allocation5 + $0x440] ss:$28 sps:$4 sm:$0xff]  }
  0xf8   :  { %2154 = vmatprep.subr.bf16.mxu1 %v8526_v26  ;;  %v8571_v26 = vld [vmem:[#allocation5 + $0x35c] ss:$28 sps:$4 sm:$0xff]  }
  0xfa   :  { %2075 = vmatpush1.bf16.msra.mxu0 %v8484_v21  ;;  %v8614_v21 = vld [vmem:[#allocation5 + $0x408] ss:$28 sps:$4 sm:$0xff]  }
  0xfb   :  { %2076 = vmatprep.subr.bf16.mxu0 %v8492_v23  ;;  %2155 = vmatpush1.bf16.msra.mxu1 %v8524_v29  ;;  %v8568_v23 = vld [vmem:[#allocation5 + $0x324] ss:$28 sps:$4 sm:$0xff]   ;;  %v8574_v29 = vld [vmem:[#allocation5 + $0x394] ss:$28 sps:$4 sm:$0xff]  }
  0xfc   :  { %2156 = vmatprep.subr.bf16.mxu1 %v8532_v30  ;;  %v8617_v30 = vld [vmem:[#allocation5 + $0x4b0] ss:$28 sps:$4 sm:$0xff]  }
  0xfe   :  { %2077 = vmatpush1.bf16.msra.mxu0 %v8490_v25  ;;  %v8566_v25 = vld [vmem:[#allocation5 + $0x320] ss:$28 sps:$4 sm:$0xff]  }
  0xff   :  { %2078 = vmatprep.subr.bf16.mxu0 %v8498_v27  ;;  %2157 = vmatpush1.bf16.msra.mxu1 %v8530_v34  ;;  %v8616_v27 = vld [vmem:[#allocation5 + $0x478] ss:$28 sps:$4 sm:$0xff]   ;;  %v8618_v34 = vld [vmem:[#allocation5 + $0x4e8] ss:$28 sps:$4 sm:$0xff]  }
 0x100   :  { %2158 = vmatprep.subr.bf16.mxu1 %v8538_v36  ;;  %v8577_v36 = vld [vmem:[#allocation5 + $0x3c8] ss:$28 sps:$4 sm:$0xff]  }
 0x102   :  { %2079 = vmatpush1.bf16.msra.mxu0 %v8496_v28  ;;  %v8569_v28 = vld [vmem:[#allocation5 + $0x358] ss:$28 sps:$4 sm:$0xff]  }
 0x103   :  { %2187 = vmatprep.subr.bf16.mxu0 %v8505_v32  ;;  %2159 = vmatpush1.bf16.msra.mxu1 %v8536_v39  ;;  %v8572_v32 = vld [vmem:[#allocation5 + $0x390] ss:$28 sps:$4 sm:$0xff]  }
 0x104   :  { %2160 = vmatprep.subr.bf16.mxu1 %v8544_v40  ;;  %v343_v39 = vld [vmem:[#allocation8 + $0x20] sm:$0xff]  ;;  %v8619_v40 = vld [vmem:[#allocation5 + $0x520] ss:$28 sps:$4 sm:$0xff]  }
 0x105   :  { %2097 = vmatmul.mubr.bf16.vlgmr.msra.gmra.mrb[0].mxu0 %v9458_v31 }
 0x106   :  { %2188 = vmatpush1.bf16.msra.mxu0 %v8503_v33  ;;  %2219 = vmatprep.mubr.bf16.mxu0 %v9448_v35  ;;  %v8579_v33 = vld [vmem:[#allocation5 + $0x3cc] ss:$28 sps:$4 sm:$0xff]  }
 0x107   :  { %2189 = vmatprep.subr.bf16.mxu0 %v8511_v37  ;;  %2161 = vmatpush1.bf16.msra.mxu1 %v8542_v43  ;;  %v8584_v37 = vld [vmem:[#allocation5 + $0x404] ss:$28 sps:$4 sm:$0xff]   ;;  %v347_v43 = vld [vmem:[#allocation8 + $0x40] sm:$0xff] }
 0x108   :  { %8159 = vmatprep.subr.bf16.mxu1 %v8575_v44  ;;  %v351_v44 = vld [vmem:[#allocation8 + $0x60] sm:$0xff] }
 0x10a   :  { %2190 = vmatpush1.bf16.msra.mxu0 %v8509_v38  ;;  %2179 = vmatmul.mubr.bf16.vlgmr.msra.gmra.mrb[0].mxu1 %v9458_v31  ;;  %v339_v38 = vld [vmem:[#allocation8] sm:$0xff] }
 0x10b   :  { %2191 = vmatprep.subr.bf16.mxu0 %v8517_v41  ;;  %8160 = vmatpush3.bf16.msra.mxu1 %v8576_v46  ;;  %v8582_v41 = vld [vmem:[#allocation5 + $0x400] ss:$28 sps:$4 sm:$0xff]   ;;  %v8594_v46 = vld [vmem:[#allocation5 + $0x474] ss:$28 sps:$4 sm:$0xff]  }
 0x10c   :  { %2301 = vmatprep.mubr.bf16.mxu1 %v9448_v35  ;;  %8161 = vmatprep.subr.bf16.mxu1 %v8580_v48  ;;  %v8547_v35 = vld [vmem:[#allocation5 + $0x19c] ss:$28 sps:$4 sm:$0xff]   ;;  %v355_v48 = vld [vmem:[#allocation8 + $0x80] sm:$0xff] }
 0x10e   :  { %2192 = vmatpush1.bf16.msra.mxu0 %v8515_v42  ;;  %v8589_v42 = vld [vmem:[#allocation5 + $0x43c] ss:$28 sps:$4 sm:$0xff]  }
 0x10f   :  { %2193 = vmatprep.subr.bf16.mxu0 %v8523_v45  ;;  %8162 = vmatpush3.bf16.msra.mxu1 %v8581_v51  ;;  %v7423_v45 = vcombine.high %v339_v38, %v343_v39  ;;  %v8592_v51 = vld [vmem:[#allocation5 + $0x470] ss:$28 sps:$4 sm:$0xff]  }
 0x110   :  { %8163 = vmatprep.subr.bf16.mxu1 %v8585_v52  ;;  %v8599_v52 = vld [vmem:[#allocation5 + $0x4ac] ss:$28 sps:$4 sm:$0xff]  }
 0x112   :  { %2194 = vmatpush1.bf16.msra.mxu0 %v8521_v47  ;;  %v7422_v47 = vcombine.low %v339_v38, %v343_v39  ;;  %v372_v39 = vld [vmem:[#allocation8 + $0x108] sm:$0xff] }
 0x113   :  { %2195 = vmatprep.subr.bf16.mxu0 %v8529_v49  ;;  %8164 = vmatpush3.bf16.msra.mxu1 %v8586_v55  ;;  %v359_v49 = vld [vmem:[#allocation8 + $0xa0] sm:$0xff] }
 0x114   :  { %8165 = vmatprep.subr.bf16.mxu1 %v8590_v56  ;;  %v367_v55 = vld [vmem:[#allocation8 + $0xe0] sm:$0xff]  ;;  %v7439_v56 = vcombine.high %v355_v48, %v359_v49 }
 0x116   :  { %2196 = vmatpush1.bf16.msra.mxu0 %v8527_v50  ;;  %v7431_v50 = vcombine.high %v347_v43, %v351_v44 }
 0x117   :  { %2197 = vmatprep.subr.bf16.mxu0 %v8535_v53  ;;  %8166 = vmatpush3.bf16.msra.mxu1 %v8591_v59  ;;  %v7430_v53 = vcombine.low %v347_v43, %v351_v44  ;;  %v7438_v59 = vcombine.low %v355_v48, %v359_v49  ;;  %v415_v43 = vld [vmem:[#allocation8 + $0x260] sm:$0xff] }
 0x118   :  { %8167 = vmatprep.subr.bf16.mxu1 %v8595_v60  ;;  %v371_v60 = vld [vmem:[#allocation8 + $0x100] sm:$0xff] }
 0x119   :  { %v419_v48 = vld [vmem:[#allocation8 + $0x280] sm:$0xff] }
 0x11a   :  { %2198 = vmatpush1.bf16.msra.mxu0 %v8533_v54  ;;  %v363_v54 = vld [vmem:[#allocation8 + $0xc0] sm:$0xff] }
 0x11b   :  { %2199 = vmatprep.subr.bf16.mxu0 %v8541_v57  ;;  %8168 = vmatpush3.bf16.msra.mxu1 %v8596_v61  ;;  %v8597_v57 = vld [vmem:[#allocation5 + $0x4a8] ss:$28 sps:$4 sm:$0xff]  }
 0x11c   :  { %8169 = vmatprep.subr.bf16.mxu1 %v8600_v0  ;;  %v375_v61 = vld [vmem:[#allocation8 + $0x120] sm:$0xff]  ;;  %v8609_v0 = vld [vmem:[#allocation5 + $0x51c] ss:$28 sps:$4 sm:$0xff]  }
 0x11e   :  { %2200 = vmatpush1.bf16.msra.mxu0 %v8539_v58  ;;  %v8604_v58 = vld [vmem:[#allocation5 + $0x4e4] ss:$28 sps:$4 sm:$0xff]  }
 0x11f   :  { %2201 = vmatprep.subr.bf16.mxu0 %v8547_v35  ;;  %8170 = vmatpush3.bf16.msra.mxu1 %v8601_v2  ;;  %v7447_v35 = vcombine.high %v363_v54, %v367_v55  ;;  %v379_v2 = vld [vmem:[#allocation8 + $0x140] sm:$0xff] }
 0x120   :  { %8171 = vmatprep.subr.bf16.mxu1 %v8605_v4  ;;  %v344_v4 = vld [vmem:[#allocation8 + $0x28] sm:$0xff] }
 0x122   :  { %2202 = vmatpush1.bf16.msra.mxu0 %v8545_v63  ;;  %v8602_v63 = vld [vmem:[#allocation5 + $0x4e0] ss:$28 sps:$4 sm:$0xff]  }
 0x123   :  { %2203 = vmatprep.subr.bf16.mxu0 %v8550_v1  ;;  %8172 = vmatpush3.bf16.msra.mxu1 %v8606_v6  ;;  %v7446_v1 = vcombine.low %v363_v54, %v367_v55  ;;  %v383_v6 = vld [vmem:[#allocation8 + $0x160] sm:$0xff]  ;;  %v392_v54 = vld [vmem:[#allocation8 + $0x1a8] sm:$0xff] }
 0x124   :  { %8173 = vmatprep.subr.bf16.mxu1 %v8610_v9  ;;  %v7454_v9 = vcombine.low %v371_v60, %v375_v61 }
 0x126   :  { %2204 = vmatpush1.bf16.msra.mxu0 %v8548_v3  ;;  %v340_v3 = vld [vmem:[#allocation8 + $0x8] sm:$0xff] }
 0x127   :  { %2205 = vmatprep.subr.bf16.mxu0 %v8553_v5  ;;  %8174 = vmatpush3.bf16.msra.mxu1 %v8611_v11  ;;  %v7455_v5 = vcombine.high %v371_v60, %v375_v61  ;;  %v9468_v11 = vld [vmem:[#allocation8 + $0x400] sm:$0xff]  ;;  %v400_v61 = vld [vmem:[#allocation8 + $0x1e8] sm:$0xff] }
 0x128   :  { %8234 = vmatprep.subr.bf16.mxu1 %v9287_v17 }
 0x12a   :  { %2206 = vmatpush1.bf16.msra.mxu0 %v8551_v8  ;;  %2302 = vmatmul.mubr.bf16.vlgmr.msra.gmra.mrb[4].mxu1 %v9452_v62  ;;  %v8607_v8 = vld [vmem:[#allocation5 + $0x518] ss:$28 sps:$4 sm:$0xff]  }
 0x12b   :  { %2207 = vmatprep.subr.bf16.mxu0 %v8556_v10  ;;  %8235 = vmatpush3.bf16.msra.mxu1 %v8612_v14  ;;  %v387_v10 = vld [vmem:[#allocation8 + $0x180] sm:$0xff]  ;;  %v352_v14 = vld [vmem:[#allocation8 + $0x68] sm:$0xff] }
 0x12c   :  { %8250 = vmatprep.mubr.msk.bf16.mxu1 %vm9288_vm0, %v9287_v17  ;;  %8236 = vmatprep.subr.bf16.mxu1 %v9287_v17 }
 0x12e   :  { %2208 = vmatpush1.bf16.msra.mxu0 %v8554_v12  ;;  %v9470_v12 = vld [vmem:[#allocation8 + $0x420] sm:$0xff] }
 0x12f   :  { %2209 = vmatprep.subr.bf16.mxu0 %v8559_v13  ;;  %8237 = vmatpush3.bf16.msra.mxu1 %v8613_v18  ;;  %v348_v13 = vld [vmem:[#allocation8 + $0x48] sm:$0xff]  ;;  %v7550_v18 = vcombine.low %v9468_v11, %v9470_v12 }
 0x130   :  { %8238 = vmatprep.subr.bf16.mxu1 %v9287_v17 }
 0x132   :  { %2210 = vmatpush1.bf16.msra.mxu0 %v8557_v15  ;;  %v7463_v15 = vcombine.high %v379_v2, %v383_v6 }
 0x133   :  { %2211 = vmatprep.subr.bf16.mxu0 %v8562_v16  ;;  %8239 = vmatpush3.bf16.msra.mxu1 %v8614_v21  ;;  %v391_v16 = vld [vmem:[#allocation8 + $0x1a0] sm:$0xff]  ;;  %v356_v21 = vld [vmem:[#allocation8 + $0x88] sm:$0xff] }
 0x134   :  { %8240 = vmatprep.subr.bf16.mxu1 %v9287_v17 }
 0x136   :  { %2212 = vmatpush1.bf16.msra.mxu0 %v8560_v19  ;;  %v7462_v19 = vcombine.low %v379_v2, %v383_v6  ;;  %v439_v2 = vld [vmem:[#allocation8 + $0x320] sm:$0xff]  ;;  %v408_v6 = vld [vmem:[#allocation8 + $0x228] sm:$0xff] }
 0x137   :  { %2213 = vmatprep.subr.bf16.mxu0 %v8565_v20  ;;  %8241 = vmatpush3.bf16.msra.mxu1 %v8615_v24  ;;  %v7424_v20 = vcombine.low %v340_v3, %v344_v4  ;;  %v395_v24 = vld [vmem:[#allocation8 + $0x1c0] sm:$0xff] }
 0x138   :  { %8242 = vmatprep.subr.bf16.mxu1 %v9287_v17 }
 0x13a   :  { %2214 = vmatpush1.bf16.msra.mxu0 %v8563_v22  ;;  %v360_v22 = vld [vmem:[#allocation8 + $0xa8] sm:$0xff] }
 0x13b   :  { %2215 = vmatprep.subr.bf16.mxu0 %v8568_v23  ;;  %8243 = vmatpush3.bf16.msra.mxu1 %v8616_v27  ;;  %v7471_v23 = vcombine.high %v387_v10, %v391_v16  ;;  %v7470_v27 = vcombine.low %v387_v10, %v391_v16  ;;  %v7440_v38 = vcombine.low %v356_v21, %v360_v22  ;;  %v412_v16 = vld [vmem:[#allocation8 + $0x248] sm:$0xff] }
 0x13c   :  { %8244 = vmatprep.subr.bf16.mxu1 %v9287_v17 }
 0x13e   :  { %2216 = vmatpush1.bf16.msra.mxu0 %v8566_v25  ;;  %v7433_v25 = vcombine.high %v348_v13, %v352_v14 }
 0x13f   :  { %2217 = vmatprep.subr.bf16.mxu0 %v8571_v26  ;;  %8245 = vmatpush3.bf16.msra.mxu1 %v8617_v30  ;;  %v399_v26 = vld [vmem:[#allocation8 + $0x1e0] sm:$0xff]  ;;  %v368_v30 = vld [vmem:[#allocation8 + $0xe8] sm:$0xff] }
 0x140   :  { %8246 = vmatprep.subr.bf16.mxu1 %v9287_v17 }
 0x142   :  { %2218 = vmatpush1.bf16.msra.mxu0 %v8569_v28  ;;  %v7432_v28 = vcombine.low %v348_v13, %v352_v14  ;;  %v447_v13 = vld [vmem:[#allocation8 + $0x360] sm:$0xff] }
 0x143   :  { %2228 = vmatprep.subr.bf16.mxu0 %v8574_v29  ;;  %8247 = vmatpush3.bf16.msra.mxu1 %v8618_v34  ;;  %v364_v29 = vld [vmem:[#allocation8 + $0xc8] sm:$0xff]  ;;  %v7441_v34 = vcombine.high %v356_v21, %v360_v22  ;;  %v455_v22 = vld [vmem:[#allocation8 + $0x3a0] sm:$0xff] }
 0x144   :  { %8248 = vmatprep.subr.bf16.mxu1 %v9287_v17  ;;  %v7425_v17 = vcombine.high %v340_v3, %v344_v4 }
 0x145   :  { %2220 = vmatmul.mubr.bf16.vlgmr.msra.gmra.mrb[4].mxu0 %v9452_v62  ;;  %v8587_v62 = vld [vmem:[#allocation5 + $0x438] ss:$28 sps:$4 sm:$0xff]  }
 0x146   :  { %2229 = vmatpush1.bf16.msra.mxu0 %v8572_v32  ;;  %2260 = vmatprep.mubr.bf16.mxu0 %v9286_v7  ;;  %v7479_v32 = vcombine.high %v395_v24, %v399_v26 }
 0x147   :  { %2230 = vmatprep.subr.bf16.mxu0 %v8579_v33  ;;  %8249 = vmatpush3.bf16.msra.mxu1 %v8619_v40  ;;  %v403_v33 = vld [vmem:[#allocation8 + $0x200] sm:$0xff]  ;;  %v376_v40 = vld [vmem:[#allocation8 + $0x128] sm:$0xff] }
 0x148   :  { %4644 = vmatprep.subr.bf16.mxu1 %v7423_v45  ;;  %v7448_v45 = vcombine.low %v364_v29, %v368_v30  ;;  %v7457_v49 = vcombine.high %v372_v39, %v376_v40 }
 0x14a   :  { %2231 = vmatpush1.bf16.msra.mxu0 %v8577_v36  ;;  %8251 = vmatmul.mubr.bf16.vlgmr.msra.gmra.mrb[8].mxu1 %v9458_v31  ;;  %v407_v36 = vld [vmem:[#allocation8 + $0x220] sm:$0xff] }
 0x14b   :  { %2232 = vmatprep.subr.bf16.mxu0 %v8584_v37  ;;  %4645 = vmatpush1.bf16.msra.mxu1 %v7422_v47  ;;  %v7478_v37 = vcombine.low %v395_v24, %v399_v26  ;;  %v7486_v44 = vcombine.low %v403_v33, %v407_v36  ;;  %v424_v26 = vld [vmem:[#allocation8 + $0x2a8] sm:$0xff] }
 0x14c   :  { %4646 = vmatprep.subr.bf16.mxu1 %v7431_v50  ;;  %v423_v50 = vld [vmem:[#allocation8 + $0x2a0] sm:$0xff] }
 0x14d   :  { %v7503_v55 = vcombine.high %v419_v48, %v423_v50 }
 0x14e   :  { %2233 = vmatpush1.bf16.msra.mxu0 %v8582_v41  ;;  %v411_v41 = vld [vmem:[#allocation8 + $0x240] sm:$0xff] }
 0x14f   :  { %2234 = vmatprep.subr.bf16.mxu0 %v8589_v42  ;;  %4647 = vmatpush1.bf16.msra.mxu1 %v7430_v53  ;;  %v7449_v42 = vcombine.high %v364_v29, %v368_v30  ;;  %v7495_v47 = vcombine.high %v411_v41, %v415_v43  ;;  %v388_v53 = vld [vmem:[#allocation8 + $0x188] sm:$0xff]  ;;  %v463_v30 = vld [vmem:[#allocation8 + $0x3e0] sm:$0xff] }
 0x150   :  { %4648 = vmatprep.subr.bf16.mxu1 %v7439_v56  ;;  %v427_v56 = vld [vmem:[#allocation8 + $0x2c0] sm:$0xff]  ;;  %v7472_v4 = vcombine.low %v388_v53, %v392_v54 }
 0x152   :  { %2235 = vmatpush1.bf16.msra.mxu0 %v8587_v62  ;;  %v380_v62 = vld [vmem:[#allocation8 + $0x148] sm:$0xff] }
 0x153   :  { %2236 = vmatprep.subr.bf16.mxu0 %v8594_v46  ;;  %4649 = vmatpush1.bf16.msra.mxu1 %v7438_v59  ;;  %v384_v46 = vld [vmem:[#allocation8 + $0x168] sm:$0xff]  ;;  %v7502_v59 = vcombine.low %v419_v48, %v423_v50 }
 0x154   :  { %4650 = vmatprep.subr.bf16.mxu1 %v7447_v35  ;;  %v7464_v60 = vcombine.low %v380_v62, %v384_v46  ;;  %v396_v35 = vld [vmem:[#allocation8 + $0x1c8] sm:$0xff] }
 0x155   :  { %v7481_v10 = vcombine.high %v396_v35, %v400_v61  ;;  %v452_v48 = vld [vmem:[#allocation8 + $0x388] sm:$0xff] }
 0x156   :  { %2237 = vmatpush1.bf16.msra.mxu0 %v8592_v51  ;;  %v7494_v51 = vcombine.low %v411_v41, %v415_v43  ;;  %v7551_v41 = vcombine.high %v9468_v11, %v9470_v12  ;;  %v440_v43 = vld [vmem:[#allocation8 + $0x328] sm:$0xff] }
 0x157   :  { %2238 = vmatprep.subr.bf16.mxu0 %v8599_v52  ;;  %4651 = vmatpush1.bf16.msra.mxu1 %v7446_v1  ;;  %v7456_v52 = vcombine.low %v372_v39, %v376_v40  ;;  %v7473_v1 = vcombine.high %v388_v53, %v392_v54  ;;  %v456_v50 = vld [vmem:[#allocation8 + $0x3a8] sm:$0xff] }
 0x158   :  { %4652 = vmatprep.subr.bf16.mxu1 %v7455_v5  ;;  %v404_v5 = vld [vmem:[#allocation8 + $0x208] sm:$0xff]  ;;  %v7537_v53 = vcombine.high %v452_v48, %v456_v50 }
 0x159   :  { %v7489_v21 = vcombine.high %v404_v5, %v408_v6  ;;  %v7488_v24 = vcombine.low %v404_v5, %v408_v6  ;;  %v464_v54 = vld [vmem:[#allocation8 + $0x3e8] sm:$0xff] }
 0x15a   :  { %2239 = vmatpush1.bf16.msra.mxu0 %v8597_v57  ;;  %v7465_v57 = vcombine.high %v380_v62, %v384_v46  ;;  %v448_v46 = vld [vmem:[#allocation8 + $0x368] sm:$0xff] }
 0x15b   :  { %2240 = vmatprep.subr.bf16.mxu0 %v8604_v58  ;;  %4653 = vmatpush1.bf16.msra.mxu1 %v7454_v9  ;;  %v431_v58 = vld [vmem:[#allocation8 + $0x2e0] sm:$0xff] }
 0x15c   :  { %4654 = vmatprep.subr.bf16.mxu1 %v7463_v15  ;;  %v7510_v3 = vcombine.low %v427_v56, %v431_v58  ;;  %v443_v9 = vld [vmem:[#allocation8 + $0x340] sm:$0xff]  ;;  %v7480_v15 = vcombine.low %v396_v35, %v400_v61  ;;  %v1113_v35 = vlaneseq }
 0x15e   :  { %2241 = vmatpush1.bf16.msra.mxu0 %v8602_v63  ;;  %v7511_v63 = vcombine.high %v427_v56, %v431_v58  ;;  %v468_v56 = vld [vmem:[#allocation8 + $0x408] sm:$0xff]  ;;  %v9477_v61 = vshrl.u32 %v1113_v35, 7 }
 0x15f   :  { %2242 = vmatprep.subr.bf16.mxu0 %v8609_v0  ;;  %4655 = vmatpush1.bf16.msra.mxu1 %v7462_v19  ;;  %v435_v0 = vld [vmem:[#allocation8 + $0x300] sm:$0xff]  ;;  %v7527_v19 = vcombine.high %v443_v9, %v447_v13  ;;  %v472_v58 = vld [vmem:[#allocation8 + $0x428] sm:$0xff] }
 0x160   :  { %4656 = vmatprep.subr.bf16.mxu1 %v7471_v23  ;;  %v7518_v14 = vcombine.low %v435_v0, %v439_v2  ;;  %v7526_v23 = vcombine.low %v443_v9, %v447_v13 }
 0x162   :  { %2243 = vmatpush1.bf16.msra.mxu0 %v8607_v8  ;;  %v7519_v8 = vcombine.high %v435_v0, %v439_v2  ;;  %v9482_v0 = vld [vmem:[#allocation7] sm:$0xff] }
 0x163   :  { %4808 = vmatprep.subr.bf16.mxu0 %v7425_v17  ;;  %4657 = vmatpush1.bf16.msra.mxu1 %v7470_v27  ;;  %v416_v17 = vld [vmem:[#allocation8 + $0x268] sm:$0xff] }
 0x164   :  { %4658 = vmatprep.subr.bf16.mxu1 %v7479_v32  ;;  %v7497_v29 = vcombine.high %v412_v16, %v416_v17 }
 0x165   :  { %2261 = vmatmul.mubr.bf16.vlgmr.msra.gmra.mrb[4].mxu0 %v9458_v31  ;;  %v7487_v31 = vcombine.high %v403_v33, %v407_v36  ;;  %v7496_v33 = vcombine.low %v412_v16, %v416_v17  ;;  %v479_v16 = vld [vmem:[#allocation8 + $0x460] sm:$0xff]  ;;  %v476_v17 = vld [vmem:[#allocation8 + $0x448] sm:$0xff] }
 0x166   :  { %4809 = vmatpush1.bf16.msra.mxu0 %v7424_v20  ;;  %v451_v20 = vld [vmem:[#allocation8 + $0x380] sm:$0xff] }
 0x167   :  { %4810 = vmatprep.subr.bf16.mxu0 %v7433_v25  ;;  %4659 = vmatpush1.bf16.msra.mxu1 %v7478_v37  ;;  %v420_v25 = vld [vmem:[#allocation8 + $0x288] sm:$0xff]  ;;  %v7535_v27 = vcombine.high %v451_v20, %v455_v22  ;;  %v7534_v32 = vcombine.low %v451_v20, %v455_v22  ;;  %v9492_v20 = vsub.s32 3, %v9477_v61  ;;  %v7552_v22 = vcombine.low %v468_v56, %v472_v58 }
 0x168   :  { %4660 = vmatprep.subr.bf16.mxu1 %v7487_v31  ;;  %v7505_v37 = vcombine.high %v420_v25, %v424_v26  ;;  %v7504_v40 = vcombine.low %v420_v25, %v424_v26  ;;  %v436_v31 = vld [vmem:[#allocation8 + $0x308] sm:$0xff]  ;;  %v483_v26 = vld [vmem:[#allocation8 + $0x480] sm:$0xff] }
 0x169   :  { %v7521_v62 = vcombine.high %v436_v31, %v440_v43 }
 0x16a   :  { %4811 = vmatpush1.bf16.msra.mxu0 %v7432_v28  ;;  %v459_v28 = vld [vmem:[#allocation8 + $0x3c0] sm:$0xff] }
 0x16b   :  { %4812 = vmatprep.subr.bf16.mxu0 %v7441_v34  ;;  %4661 = vmatpush1.bf16.msra.mxu1 %v7486_v44  ;;  %v428_v34 = vld [vmem:[#allocation8 + $0x2c8] sm:$0xff]  ;;  %v7543_v36 = vcombine.high %v459_v28, %v463_v30  ;;  %v7542_v39 = vcombine.low %v459_v28, %v463_v30  ;;  %v1128_v30 = vrot.slane %v9482_v0, %v9492_v20 }
 0x16c   :  { %4662 = vmatprep.subr.bf16.mxu1 %v7495_v47  ;;  %v7520_v47 = vcombine.low %v436_v31, %v440_v43  ;;  %v484_v28 = vld [vmem:[#allocation8 + $0x488] sm:$0xff] }
 0x16d   :  { %v496_v31 = vld [vmem:[#allocation8 + $0x4e8] sm:$0xff] }
 0x16e   :  { %4813 = vmatpush1.bf16.msra.mxu0 %v7440_v38  ;;  %v432_v38 = vld [vmem:[#allocation8 + $0x2e8] sm:$0xff] }
 0x16f   :  { %4814 = vmatprep.subr.bf16.mxu0 %v7449_v42  ;;  %4663 = vmatpush1.bf16.msra.mxu1 %v7494_v51  ;;  %v7513_v42 = vcombine.high %v428_v34, %v432_v38  ;;  %v7512_v44 = vcombine.low %v428_v34, %v432_v38 }
 0x170   :  { %4664 = vmatprep.subr.bf16.mxu1 %v7503_v55  ;;  %v7536_v55 = vcombine.low %v452_v48, %v456_v50  ;;  %v500_v48 = vld [vmem:[#allocation8 + $0x508] sm:$0xff] }
 0x172   :  { %4815 = vmatpush1.bf16.msra.mxu0 %v7448_v45  ;;  %v444_v45 = vld [vmem:[#allocation8 + $0x348] sm:$0xff] }
 0x173   :  { %4816 = vmatprep.subr.bf16.mxu0 %v7457_v49  ;;  %4665 = vmatpush1.bf16.msra.mxu1 %v7502_v59  ;;  %v7529_v49 = vcombine.high %v444_v45, %v448_v46  ;;  %v7528_v51 = vcombine.low %v444_v45, %v448_v46 }
 0x174   :  { %4666 = vmatprep.subr.bf16.mxu1 %v7511_v63  ;;  %v9480_v63 = vsub.s32 0, %v9477_v61 }
 0x176   :  { %4817 = vmatpush1.bf16.msra.mxu0 %v7456_v52  ;;  %v460_v52 = vld [vmem:[#allocation8 + $0x3c8] sm:$0xff]  ;;  %v1116_v2 = vrot.slane %v9482_v0, %v9480_v63 }
 0x177   :  { %4818 = vmatprep.subr.bf16.mxu0 %v7465_v57  ;;  %4667 = vmatpush1.bf16.msra.mxu1 %v7510_v3  ;;  %v7545_v57 = vcombine.high %v460_v52, %v464_v54  ;;  %v7544_v59 = vcombine.low %v460_v52, %v464_v54 }
 0x178   :  { %4668 = vmatprep.subr.bf16.mxu1 %v7519_v8 }
 0x17a   :  { %4819 = vmatpush1.bf16.msra.mxu0 %v7464_v60  ;;  %v7553_v60 = vcombine.high %v468_v56, %v472_v58  ;;  %v511_v56 = vld [vmem:[#allocation8 + $0x560] sm:$0xff]  ;;  %v512_v58 = vld [vmem:[#allocation8 + $0x568] sm:$0xff] }
 0x17b   :  { %4820 = vmatprep.subr.bf16.mxu0 %v7473_v1  ;;  %4669 = vmatpush1.bf16.msra.mxu1 %v7518_v14  ;;  %v9485_v1 = vsub.s32 1, %v9477_v61  ;;  %v475_v14 = vld [vmem:[#allocation8 + $0x440] sm:$0xff] }
 0x17c   :  { %4670 = vmatprep.subr.bf16.mxu1 %v7527_v19  ;;  %v480_v19 = vld [vmem:[#allocation8 + $0x468] sm:$0xff] }
 0x17d   :  { %v1120_v3 = vrot.slane %v9482_v0, %v9485_v1  ;;  %v7561_v25 = vcombine.high %v476_v17, %v480_v19 }
 0x17e   :  { %4821 = vmatpush1.bf16.msra.mxu0 %v7472_v4 }
 0x17f   :  { %4822 = vmatprep.subr.bf16.mxu0 %v7481_v10  ;;  %4671 = vmatpush1.bf16.msra.mxu1 %v7526_v23 }
 0x180   :  { %4672 = vmatprep.subr.bf16.mxu1 %v7535_v27  ;;  %v487_v27 = vld [vmem:[#allocation8 + $0x4a0] sm:$0xff] }
 0x181   :  { %v7567_v34 = vcombine.high %v483_v26, %v487_v27  ;;  %v7566_v11 = vcombine.low %v483_v26, %v487_v27  ;;  %v531_v26 = vld [vmem:[#allocation8 + $0x600] sm:$0xff] }
 0x182   :  { %4823 = vmatpush1.bf16.msra.mxu0 %v7480_v15  ;;  %v535_v27 = vld [vmem:[#allocation8 + $0x620] sm:$0xff] }
 0x183   :  { %4824 = vmatprep.subr.bf16.mxu0 %v7489_v21  ;;  %4673 = vmatpush1.bf16.msra.mxu1 %v7534_v32  ;;  %v7558_v32 = vcombine.low %v475_v14, %v479_v16 }
 0x184   :  { %4674 = vmatprep.subr.bf16.mxu1 %v7543_v36 }
 0x186   :  { %4825 = vmatpush1.bf16.msra.mxu0 %v7488_v24  ;;  %v7559_v24 = vcombine.high %v475_v14, %v479_v16  ;;  %v523_v14 = vld [vmem:[#allocation8 + $0x5c0] sm:$0xff]  ;;  %v524_v16 = vld [vmem:[#allocation8 + $0x5c8] sm:$0xff] }
 0x187   :  { %4826 = vmatprep.subr.bf16.mxu0 %v7497_v29  ;;  %4675 = vmatpush1.bf16.msra.mxu1 %v7542_v39  ;;  %v488_v29 = vld [vmem:[#allocation8 + $0x4a8] sm:$0xff]  ;;  %v495_v39 = vld [vmem:[#allocation8 + $0x4e0] sm:$0xff] }
 0x188   :  { %4685 = vmatprep.subr.bf16.mxu1 %v7551_v41  ;;  %v7569_v36 = vcombine.high %v484_v28, %v488_v29  ;;  %v7568_v12 = vcombine.low %v484_v28, %v488_v29  ;;  %v532_v28 = vld [vmem:[#allocation8 + $0x608] sm:$0xff] }
 0x189   :  { %v536_v29 = vld [vmem:[#allocation8 + $0x628] sm:$0xff] }
 0x18a   :  { %4827 = vmatpush1.bf16.msra.mxu0 %v7496_v33  ;;  %v7560_v33 = vcombine.low %v476_v17, %v480_v19  ;;  %v528_v17 = vld [vmem:[#allocation8 + $0x5e8] sm:$0xff] }
 0x18b   :  { %4828 = vmatprep.subr.bf16.mxu0 %v7505_v37  ;;  %v491_v37 = vld [vmem:[#allocation8 + $0x4c0] sm:$0xff] }
 0x18e   :  { %4829 = vmatpush1.bf16.msra.mxu0 %v7504_v40  ;;  %v492_v40 = vld [vmem:[#allocation8 + $0x4c8] sm:$0xff] }
 0x18f   :  { %4830 = vmatprep.subr.bf16.mxu0 %v7513_v42  ;;  %v7577_v45 = vcombine.high %v492_v40, %v496_v31  ;;  %v7576_v52 = vcombine.low %v492_v40, %v496_v31  ;;  %v544_v40 = vld [vmem:[#allocation8 + $0x668] sm:$0xff]  ;;  %v7614_v31 = vcombine.low %v531_v26, %v535_v27 }
 0x192   :  { %4831 = vmatpush1.bf16.msra.mxu0 %v7512_v44  ;;  %v7575_v44 = vcombine.high %v491_v37, %v495_v39 }
 0x193   :  { %4832 = vmatprep.subr.bf16.mxu0 %v7521_v62  ;;  %v499_v62 = vld [vmem:[#allocation8 + $0x500] sm:$0xff] }
 0x196   :  { %4833 = vmatpush1.bf16.msra.mxu0 %v7520_v47  ;;  %v503_v47 = vld [vmem:[#allocation8 + $0x520] sm:$0xff] }
 0x197   :  { %4834 = vmatprep.subr.bf16.mxu0 %v7529_v49  ;;  %v504_v49 = vld [vmem:[#allocation8 + $0x528] sm:$0xff] }
 0x198   :  { %v7585_v54 = vcombine.high %v500_v48, %v504_v49 }
 0x19a   :  { %4835 = vmatpush1.bf16.msra.mxu0 %v7528_v51  ;;  %v7574_v51 = vcombine.low %v491_v37, %v495_v39  ;;  %v543_v37 = vld [vmem:[#allocation8 + $0x660] sm:$0xff]  ;;  %v540_v39 = vld [vmem:[#allocation8 + $0x648] sm:$0xff] }
 0x19b   :  { %4836 = vmatprep.subr.bf16.mxu0 %v7537_v53  ;;  %v7583_v53 = vcombine.high %v499_v62, %v503_v47 }
 0x19e   :  { %4837 = vmatpush1.bf16.msra.mxu0 %v7536_v55  ;;  %v507_v55 = vld [vmem:[#allocation8 + $0x540] sm:$0xff] }
 0x19f   :  { %4838 = vmatprep.subr.bf16.mxu0 %v7545_v57  ;;  %v508_v57 = vld [vmem:[#allocation8 + $0x548] sm:$0xff]  ;;  %v7591_v35 = vcombine.high %v507_v55, %v511_v56 }
 0x1a2   :  { %4839 = vmatpush1.bf16.msra.mxu0 %v7544_v59  ;;  %v7582_v59 = vcombine.low %v499_v62, %v503_v47  ;;  %v7624_v62 = vcombine.low %v540_v39, %v544_v40 }
 0x1a3   :  { %4849 = vmatprep.subr.bf16.mxu0 %v7553_v60  ;;  %v7584_v60 = vcombine.low %v500_v48, %v504_v49  ;;  %v555_v48 = vld [vmem:[#allocation8 + $0x6c0] sm:$0xff] }
 0x1d8   :  { %v2098_v4 = vpop.f32.mrb[0].mxu0 }
 0x1d9   :  { %v8254_v5 = vadd.f32 %v2098_v4, %v1116_v2  ;;  %v2100_v6 = vpop.f32.mrb[1].mxu0  ;;  %v7593_v2 = vcombine.high %v508_v57, %v512_v58  ;;  %v519_v4 = vld [vmem:[#allocation8 + $0x5a0] sm:$0xff] }
 0x1da   :  { %v8255_v8 = vadd.f32 %v2100_v6, %v1120_v3  ;;  %v2102_v9 = vpop.f32.mrb[2].mxu0  ;;  %v515_v3 = vld [vmem:[#allocation8 + $0x580] sm:$0xff]  ;;  %v520_v6 = vld [vmem:[#allocation8 + $0x5a8] sm:$0xff] }
 0x1db   :  { %v2349_v10 = vmax.f32 %v8254_v5, 0.0  ;;  %v2103_v13 = vpop.f32.mrb[3].mxu0  ;;  %v516_v5 = vld [vmem:[#allocation8 + $0x588] sm:$0xff]  ;;  %v7592_v9 = vcombine.low %v508_v57, %v512_v58  ;;  %v7598_v19 = vcombine.low %v515_v3, %v519_v4 }
 0x1dc   :  { %v2350_v15 = vmax.f32 %v8255_v8, 0.0  ;;  %v7590_v8 = vcombine.low %v507_v55, %v511_v56  ;;  %v7601_v13 = vcombine.high %v516_v5, %v520_v6 }
 0x1dd   :  { %v9496_v23 = vpack.c.bf16 %v2349_v10, %v2349_v10  ;;  %v9507_v38 = vpop.f32.mrb[0].mxu1  ;;  %v7599_v10 = vcombine.high %v515_v3, %v519_v4  ;;  %v567_v3 = vld [vmem:[#allocation8 + $0x720] sm:$0xff]  ;;  %v564_v4 = vld [vmem:[#allocation8 + $0x708] sm:$0xff] }
 0x1de   :  { %v9494_v21 = vpack.c.bf16 %v2350_v15, %v2350_v15  ;;  %v2182_v41 = vpop.f32.mrb[1].mxu1  ;;  %v527_v15 = vld [vmem:[#allocation8 + $0x5e0] sm:$0xff] }
 0x1df   :  { %v8257_v42 = vadd.f32 %v2182_v41, %v1128_v30  ;;  %v2184_v43 = vpop.f32.mrb[2].mxu1  ;;  %v7606_v30 = vcombine.low %v523_v14, %v527_v15  ;;  %v7616_v41 = vcombine.low %v532_v28, %v536_v29 }
 0x1e0   :  { %4676 = vmatprep.mubr.bf16.mxu1 %v9494_v21  ;;  %4840 = vmatprep.mubr.bf16.mxu0 %v9494_v21  ;;  %v7625_v43 = vcombine.high %v540_v39, %v544_v40  ;;  %v591_v39 = vld [vmem:[#allocation8 + $0x7e0] sm:$0xff]  ;;  %v588_v40 = vld [vmem:[#allocation8 + $0x7c8] sm:$0xff] }
 0x1e1   :  { %4677 = vmatmul.mubr.bf16.vlgmr.msra.gmra.mrb[12].mxu1 %v9496_v23  ;;  %4841 = vmatmul.mubr.bf16.vlgmr.msra.gmra.mrb[8].mxu0 %v9496_v23  ;;  %v2352_v46 = vmax.f32 %v8257_v42, 0.0 }
 0x1e2   :  { %4686 = vmatpush1.bf16.msra.mxu1 %v7550_v18  ;;  %4850 = vmatpush1.bf16.msra.mxu0 %v7552_v22  ;;  %v2185_v18 = vpop.f32.mrb[3].mxu1  ;;  %v7600_v22 = vcombine.low %v516_v5, %v520_v6  ;;  %v568_v5 = vld [vmem:[#allocation8 + $0x728] sm:$0xff] }
 0x1e3   :  { %4687 = vmatprep.subr.bf16.mxu1 %v7559_v24  ;;  %4851 = vmatprep.subr.bf16.mxu0 %v7561_v25  ;;  %v9509_v50 = vpack.c.bf16 %v2352_v46, %v2352_v46  ;;  %v7607_v24 = vcombine.high %v523_v14, %v527_v15  ;;  %v7609_v25 = vcombine.high %v524_v16, %v528_v17  ;;  %v548_v18 = vld [vmem:[#allocation8 + $0x688] sm:$0xff]  ;;  %v575_v14 = vld [vmem:[#allocation8 + $0x760] sm:$0xff] }
 0x1e4   :  { %v572_v15 = vld [vmem:[#allocation8 + $0x748] sm:$0xff] }
 0x1e5   :  { %4717 = vmatprep.mubr.bf16.mxu1 %v9509_v50  ;;  %4881 = vmatprep.mubr.bf16.mxu0 %v9509_v50 }
 0x1e6   :  { %4688 = vmatpush1.bf16.msra.mxu1 %v7558_v32  ;;  %4852 = vmatpush1.bf16.msra.mxu0 %v7560_v33  ;;  %v7608_v32 = vcombine.low %v524_v16, %v528_v17  ;;  %v7615_v33 = vcombine.high %v531_v26, %v535_v27  ;;  %v576_v16 = vld [vmem:[#allocation8 + $0x768] sm:$0xff]  ;;  %v579_v26 = vld [vmem:[#allocation8 + $0x780] sm:$0xff] }
 0x1e7   :  { %4689 = vmatprep.subr.bf16.mxu1 %v7567_v34  ;;  %4853 = vmatprep.subr.bf16.mxu0 %v7569_v36  ;;  %v7617_v34 = vcombine.high %v532_v28, %v536_v29  ;;  %v539_v36 = vld [vmem:[#allocation8 + $0x640] sm:$0xff]  ;;  %v580_v28 = vld [vmem:[#allocation8 + $0x788] sm:$0xff] }
 0x1e8   :  { %v7623_v42 = vcombine.high %v539_v36, %v543_v37  ;;  %v583_v27 = vld [vmem:[#allocation8 + $0x7a0] sm:$0xff]  ;;  %v584_v29 = vld [vmem:[#allocation8 + $0x7a8] sm:$0xff] }
 0x1ea   :  { %4690 = vmatpush1.bf16.msra.mxu1 %v7566_v11  ;;  %4854 = vmatpush1.bf16.msra.mxu0 %v7568_v12  ;;  %v547_v11 = vld [vmem:[#allocation8 + $0x680] sm:$0xff] }
 0x1eb   :  { %4691 = vmatprep.subr.bf16.mxu1 %v7575_v44  ;;  %4855 = vmatprep.subr.bf16.mxu0 %v7577_v45  ;;  %v551_v12 = vld [vmem:[#allocation8 + $0x6a0] sm:$0xff]  ;;  %v552_v44 = vld [vmem:[#allocation8 + $0x6a8] sm:$0xff]  ;;  %v7622_v45 = vcombine.low %v539_v36, %v543_v37  ;;  %v7665_v36 = vcombine.high %v580_v28, %v584_v29 }
 0x1ec   :  { %v7631_v46 = vcombine.high %v547_v11, %v551_v12  ;;  %v7633_v47 = vcombine.high %v548_v18, %v552_v44  ;;  %v7630_v57 = vcombine.low %v547_v11, %v551_v12  ;;  %v7632_v58 = vcombine.low %v548_v18, %v552_v44  ;;  %v587_v37 = vld [vmem:[#allocation8 + $0x7c0] sm:$0xff] }
 0x1ed   :  { %v7671_v11 = vcombine.high %v587_v37, %v591_v39  ;;  %v595_v18 = vld [vmem:[#allocation8 + $0x800] sm:$0xff] }
 0x1ee   :  { %4692 = vmatpush1.bf16.msra.mxu1 %v7574_v51  ;;  %4856 = vmatpush1.bf16.msra.mxu0 %v7576_v52  ;;  %v559_v51 = vld [vmem:[#allocation8 + $0x6e0] sm:$0xff]  ;;  %v556_v52 = vld [vmem:[#allocation8 + $0x6c8] sm:$0xff] }
 0x1ef   :  { %4693 = vmatprep.subr.bf16.mxu1 %v7583_v53  ;;  %4857 = vmatprep.subr.bf16.mxu0 %v7585_v54  ;;  %v560_v53 = vld [vmem:[#allocation8 + $0x6e8] sm:$0xff]  ;;  %v7638_v6 = vcombine.low %v555_v48, %v559_v51  ;;  %v599_v44 = vld [vmem:[#allocation8 + $0x820] sm:$0xff] }
 0x1f2   :  { %4694 = vmatpush1.bf16.msra.mxu1 %v7582_v59  ;;  %4858 = vmatpush1.bf16.msra.mxu0 %v7584_v60  ;;  %v7639_v60 = vcombine.high %v555_v48, %v559_v51  ;;  %v7679_v51 = vcombine.high %v595_v18, %v599_v44 }
 0x1f3   :  { %4695 = vmatprep.subr.bf16.mxu1 %v7591_v35  ;;  %4859 = vmatprep.subr.bf16.mxu0 %v7593_v2  ;;  %v7641_v35 = vcombine.high %v556_v52, %v560_v53  ;;  %v563_v2 = vld [vmem:[#allocation8 + $0x700] sm:$0xff] }
 0x1f4   :  { %v7646_v17 = vcombine.low %v563_v2, %v567_v3 }
 0x1f6   :  { %4696 = vmatpush1.bf16.msra.mxu1 %v7590_v8  ;;  %4860 = vmatpush1.bf16.msra.mxu0 %v7592_v9  ;;  %v7640_v8 = vcombine.low %v556_v52, %v560_v53  ;;  %v7647_v9 = vcombine.high %v563_v2, %v567_v3  ;;  %v607_v53 = vld [vmem:[#allocation8 + $0x860] sm:$0xff] }
 0x1f7   :  { %4697 = vmatprep.subr.bf16.mxu1 %v7599_v10  ;;  %4861 = vmatprep.subr.bf16.mxu0 %v7601_v13  ;;  %v7649_v10 = vcombine.high %v564_v4, %v568_v5  ;;  %v571_v13 = vld [vmem:[#allocation8 + $0x740] sm:$0xff] }
 0x1f8   :  { %v611_v3 = vld [vmem:[#allocation8 + $0x880] sm:$0xff] }
 0x1fa   :  { %4698 = vmatpush1.bf16.msra.mxu1 %v7598_v19  ;;  %4862 = vmatpush1.bf16.msra.mxu0 %v7600_v22  ;;  %v7648_v19 = vcombine.low %v564_v4, %v568_v5  ;;  %v9516_v22 = vsub.s32 2, %v9477_v61  ;;  %v615_v4 = vld [vmem:[#allocation8 + $0x8a0] sm:$0xff]  ;;  %v612_v5 = vld [vmem:[#allocation8 + $0x888] sm:$0xff] }
 0x1fb   :  { %4699 = vmatprep.subr.bf16.mxu1 %v7607_v24  ;;  %4863 = vmatprep.subr.bf16.mxu0 %v7609_v25  ;;  %v7655_v24 = vcombine.high %v571_v13, %v575_v14  ;;  %v7657_v25 = vcombine.high %v572_v15, %v576_v16 }
 0x1fd   :  { %v8175_v49 = vpop.f32.mrb[4].mxu1 }
 0x1fe   :  { %4700 = vmatpush1.bf16.msra.mxu1 %v7606_v30  ;;  %4864 = vmatpush1.bf16.msra.mxu0 %v7608_v32  ;;  %v8176_v54 = vpop.f32.mrb[5].mxu1  ;;  %v7654_v30 = vcombine.low %v571_v13, %v575_v14  ;;  %v7656_v32 = vcombine.low %v572_v15, %v576_v16  ;;  %v7695_v13 = vcombine.high %v611_v3, %v615_v4  ;;  %v619_v15 = vld [vmem:[#allocation8 + $0x8c0] sm:$0xff] }
 0x1ff   :  { %4701 = vmatprep.subr.bf16.mxu1 %v7615_v33  ;;  %4865 = vmatprep.subr.bf16.mxu0 %v7617_v34  ;;  %v9513_v55 = vadd.f32 %v8176_v54, %v8175_v49  ;;  %v8178_v56 = vpop.f32.mrb[6].mxu1  ;;  %v1124_v33 = vrot.slane %v9482_v0, %v9516_v22  ;;  %v7663_v34 = vcombine.high %v579_v26, %v583_v27  ;;  %v604_v54 = vld [vmem:[#allocation8 + $0x848] sm:$0xff] }
 0x200   :  { %v8179_v59 = vpop.f32.mrb[7].mxu1  ;;  %v608_v56 = vld [vmem:[#allocation8 + $0x868] sm:$0xff] }
 0x201   :  { %v7689_v2 = vcombine.high %v604_v54, %v608_v56 }
 0x202   :  { %4702 = vmatpush1.bf16.msra.mxu1 %v7614_v31  ;;  %4866 = vmatpush1.bf16.msra.mxu0 %v7616_v41  ;;  %v592_v31 = vld [vmem:[#allocation8 + $0x7e8] sm:$0xff]  ;;  %v7662_v41 = vcombine.low %v579_v26, %v583_v27  ;;  %v7694_v27 = vcombine.low %v611_v3, %v615_v4 }
 0x203   :  { %4703 = vmatprep.subr.bf16.mxu1 %v7623_v42  ;;  %4867 = vmatprep.subr.bf16.mxu0 %v7625_v43  ;;  %v7664_v42 = vcombine.low %v580_v28, %v584_v29  ;;  %v8256_v43 = vadd.f32 %v9507_v38, %v1124_v33  ;;  %v7673_v12 = vcombine.high %v588_v40, %v592_v31  ;;  %v603_v38 = vld [vmem:[#allocation8 + $0x840] sm:$0xff] }
 0x204   :  { %v7672_v48 = vcombine.low %v588_v40, %v592_v31  ;;  %v627_v33 = vld [vmem:[#allocation8 + $0x900] sm:$0xff] }
 0x205   :  { %v2351_v49 = vmax.f32 %v8256_v43, 0.0  ;;  %v639_v43 = vld [vmem:[#allocation8 + $0x960] sm:$0xff] }
 0x206   :  { %4704 = vmatpush1.bf16.msra.mxu1 %v7622_v45  ;;  %4868 = vmatpush1.bf16.msra.mxu0 %v7624_v62  ;;  %v596_v45 = vld [vmem:[#allocation8 + $0x808] sm:$0xff] }
 0x207   :  { %4705 = vmatprep.subr.bf16.mxu1 %v7631_v46  ;;  %4869 = vmatprep.subr.bf16.mxu0 %v7633_v47  ;;  %v600_v62 = vld [vmem:[#allocation8 + $0x828] sm:$0xff]  ;;  %v1139_v46 = vsub.s32 6, %v9477_v61  ;;  %v7670_v47 = vcombine.low %v587_v37, %v591_v39 }
 0x208   :  { %v7681_v52 = vcombine.high %v596_v45, %v600_v62  ;;  %v7680_v59 = vcombine.low %v596_v45, %v600_v62  ;;  %v632_v37 = vld [vmem:[#allocation8 + $0x928] sm:$0xff] }
 0x20a   :  { %4706 = vmatpush1.bf16.msra.mxu1 %v7630_v57  ;;  %4870 = vmatpush1.bf16.msra.mxu0 %v7632_v58  ;;  %v1140_v57 = vrot.slane %v9482_v0, %v1139_v46  ;;  %v7678_v58 = vcombine.low %v595_v18, %v599_v44 }
 0x20b   :  { %4707 = vmatprep.subr.bf16.mxu1 %v7639_v60  ;;  %4871 = vmatprep.subr.bf16.mxu0 %v7641_v35  ;;  %v9525_v60 = vpack.c.bf16 %v2351_v49, %v2351_v49  ;;  %v7687_v35 = vcombine.high %v603_v38, %v607_v53  ;;  %v644_v49 = vld [vmem:[#allocation8 + $0x988] sm:$0xff] }
 0x20e   :  { %4708 = vmatpush1.bf16.msra.mxu1 %v7638_v6  ;;  %4872 = vmatpush1.bf16.msra.mxu0 %v7640_v8  ;;  %v616_v6 = vld [vmem:[#allocation8 + $0x8a8] sm:$0xff]  ;;  %v2304_v8 = vadd.f32 %v9513_v55, %v1140_v57  ;;  %v651_v57 = vld [vmem:[#allocation8 + $0x9c0] sm:$0xff] }
 0x20f   :  { %4709 = vmatprep.subr.bf16.mxu1 %v7647_v9  ;;  %4873 = vmatprep.subr.bf16.mxu0 %v7649_v10  ;;  %v7686_v9 = vcombine.low %v603_v38, %v607_v53  ;;  %v7688_v10 = vcombine.low %v604_v54, %v608_v56  ;;  %v7697_v14 = vcombine.high %v612_v5, %v616_v6  ;;  %v1135_v53 = vsub.s32 5, %v9477_v61 }
 0x210   :  { %v7696_v28 = vcombine.low %v612_v5, %v616_v6 }
 0x211   :  { %v1136_v4 = vrot.slane %v9482_v0, %v1135_v53 }
 0x212   :  { %4710 = vmatpush1.bf16.msra.mxu1 %v7646_v17  ;;  %4874 = vmatpush1.bf16.msra.mxu0 %v7648_v19  ;;  %v623_v17 = vld [vmem:[#allocation8 + $0x8e0] sm:$0xff]  ;;  %v620_v19 = vld [vmem:[#allocation8 + $0x8c8] sm:$0xff] }
 0x213   :  { %4711 = vmatprep.subr.bf16.mxu1 %v7655_v24  ;;  %4875 = vmatprep.subr.bf16.mxu0 %v7657_v25  ;;  %v624_v24 = vld [vmem:[#allocation8 + $0x8e8] sm:$0xff]  ;;  %v7702_v39 = vcombine.low %v619_v15, %v623_v17 }
 0x214   :  { %v7704_v40 = vcombine.low %v620_v19, %v624_v24 }
 0x216   :  { %4712 = vmatpush1.bf16.msra.mxu1 %v7654_v30  ;;  %4876 = vmatpush1.bf16.msra.mxu0 %v7656_v32  ;;  %v7703_v30 = vcombine.high %v619_v15, %v623_v17  ;;  %v7705_v32 = vcombine.high %v620_v19, %v624_v24 }
 0x217   :  { %4713 = vmatprep.subr.bf16.mxu1 %v7663_v34  ;;  %4877 = vmatprep.subr.bf16.mxu0 %v7665_v36  ;;  %v631_v34 = vld [vmem:[#allocation8 + $0x920] sm:$0xff]  ;;  %v628_v36 = vld [vmem:[#allocation8 + $0x908] sm:$0xff] }
 0x218   :  { %v7711_v31 = vcombine.high %v627_v33, %v631_v34  ;;  %v7710_v18 = vcombine.low %v627_v33, %v631_v34  ;;  %v7712_v44 = vcombine.low %v628_v36, %v632_v37  ;;  %v672_v33 = vld [vmem:[#allocation8 + $0xa68] sm:$0xff] }
 0x21a   :  { %4714 = vmatpush1.bf16.msra.mxu1 %v7662_v41  ;;  %4878 = vmatpush1.bf16.msra.mxu0 %v7664_v42  ;;  %v7713_v41 = vcombine.high %v628_v36, %v632_v37  ;;  %v635_v42 = vld [vmem:[#allocation8 + $0x940] sm:$0xff] }
 0x21b   :  { %4715 = vmatprep.subr.bf16.mxu1 %v7671_v11  ;;  %4879 = vmatprep.subr.bf16.mxu0 %v7673_v12  ;;  %v636_v11 = vld [vmem:[#allocation8 + $0x948] sm:$0xff]  ;;  %v7719_v45 = vcombine.high %v635_v42, %v639_v43 }
 0x21c   :  { %v640_v12 = vld [vmem:[#allocation8 + $0x968] sm:$0xff] }
 0x21d   :  { %v2343_v16 = vpop.f32.mrb[8].mxu1  ;;  %v7721_v62 = vcombine.high %v636_v11, %v640_v12  ;;  %v7720_v38 = vcombine.low %v636_v11, %v640_v12 }
 0x21e   :  { %4716 = vmatpush1.bf16.msra.mxu1 %v7670_v47  ;;  %4880 = vmatpush1.bf16.msra.mxu0 %v7672_v48  ;;  %v9530_v25 = vadd.f32 %v2343_v16, %v2304_v8  ;;  %v8252_v55 = vpop.f32.mrb[9].mxu1  ;;  %v643_v47 = vld [vmem:[#allocation8 + $0x980] sm:$0xff] }
 0x21f   :  { %4726 = vmatprep.subr.bf16.mxu1 %v7679_v51  ;;  %4890 = vmatprep.subr.bf16.mxu0 %v7681_v52  ;;  %v2346_v26 = vpop.f32.mrb[10].mxu1  ;;  %v647_v48 = vld [vmem:[#allocation8 + $0x9a0] sm:$0xff]  ;;  %v648_v51 = vld [vmem:[#allocation8 + $0x9a8] sm:$0xff]  ;;  %v7718_v52 = vcombine.low %v635_v42, %v639_v43 }
 0x220   :  { %v8253_v29 = vpop.f32.mrb[11].mxu1  ;;  %v7727_v54 = vcombine.high %v643_v47, %v647_v48  ;;  %v7729_v56 = vcombine.high %v644_v49, %v648_v51  ;;  %v7728_v3 = vcombine.low %v644_v49, %v648_v51  ;;  %v659_v8 = vld [vmem:[#allocation8 + $0xa00] sm:$0xff]  ;;  %v676_v42 = vld [vmem:[#allocation8 + $0xa88] sm:$0xff] }
 0x221   :  { %4718 = vmatmul.mubr.bf16.vlgmr.msra.gmra.mrb[12].mxu1 %v9525_v60  ;;  %4882 = vmatmul.mubr.bf16.vlgmr.msra.gmra.mrb[8].mxu0 %v9525_v60  ;;  %v680_v43 = vld [vmem:[#allocation8 + $0xaa8] sm:$0xff] }
 0x222   :  { %4727 = vmatpush1.bf16.msra.mxu1 %v7678_v58  ;;  %4891 = vmatpush1.bf16.msra.mxu0 %v7680_v59  ;;  %v655_v58 = vld [vmem:[#allocation8 + $0x9e0] sm:$0xff]  ;;  %v652_v59 = vld [vmem:[#allocation8 + $0x9c8] sm:$0xff]  ;;  %v7760_v51 = vcombine.low %v676_v42, %v680_v43 }
 0x223   :  { %4728 = vmatprep.subr.bf16.mxu1 %v7687_v35  ;;  %4892 = vmatprep.subr.bf16.mxu0 %v7689_v2  ;;  %v656_v35 = vld [vmem:[#allocation8 + $0x9e8] sm:$0xff]  ;;  %v7726_v2 = vcombine.low %v643_v47, %v647_v48  ;;  %v7735_v5 = vcombine.high %v651_v57, %v655_v58  ;;  %v7734_v19 = vcombine.low %v651_v57, %v655_v58 }
 0x224   :  { %v7737_v6 = vcombine.high %v652_v59, %v656_v35  ;;  %v7736_v24 = vcombine.low %v652_v59, %v656_v35  ;;  %v684_v47 = vld [vmem:[#allocation8 + $0xac8] sm:$0xff] }
 0x225   :  { %v688_v48 = vld [vmem:[#allocation8 + $0xae8] sm:$0xff] }
 0x226   :  { %4729 = vmatpush1.bf16.msra.mxu1 %v7686_v9  ;;  %4893 = vmatpush1.bf16.msra.mxu0 %v7688_v10  ;;  %v663_v10 = vld [vmem:[#allocation8 + $0xa20] sm:$0xff]  ;;  %v692_v57 = vld [vmem:[#allocation8 + $0xb08] sm:$0xff]  ;;  %v7768_v35 = vcombine.low %v684_v47, %v688_v48 }
 0x227   :  { %4730 = vmatprep.subr.bf16.mxu1 %v7695_v13  ;;  %4894 = vmatprep.subr.bf16.mxu0 %v7697_v14  ;;  %v660_v13 = vld [vmem:[#allocation8 + $0xa08] sm:$0xff]  ;;  %v7743_v26 = vcombine.high %v659_v8, %v663_v10  ;;  %v7742_v36 = vcombine.low %v659_v8, %v663_v10 }
 0x228   :  { %v664_v14 = vld [vmem:[#allocation8 + $0xa28] sm:$0xff] }
 0x229   :  { %v7744_v37 = vcombine.low %v660_v13, %v664_v14  ;;  %v696_v58 = vld [vmem:[#allocation8 + $0xb28] sm:$0xff] }
 0x22a   :  { %4731 = vmatpush1.bf16.msra.mxu1 %v7694_v27  ;;  %4895 = vmatpush1.bf16.msra.mxu0 %v7696_v28  ;;  %v7745_v27 = vcombine.high %v660_v13, %v664_v14  ;;  %v667_v28 = vld [vmem:[#allocation8 + $0xa40] sm:$0xff]  ;;  %v704_v8 = vld [vmem:[#allocation8 + $0xb68] sm:$0xff]  ;;  %v7776_v13 = vcombine.low %v692_v57, %v696_v58  ;;  %v1131_v14 = vsub.s32 4, %v9477_v61 }
 0x22b   :  { %4732 = vmatprep.subr.bf16.mxu1 %v7703_v30  ;;  %4896 = vmatprep.subr.bf16.mxu0 %v7705_v32  ;;  %v671_v30 = vld [vmem:[#allocation8 + $0xa60] sm:$0xff]  ;;  %v668_v32 = vld [vmem:[#allocation8 + $0xa48] sm:$0xff] }
 0x22c   :  { %v7750_v11 = vcombine.low %v667_v28, %v671_v30  ;;  %v7752_v12 = vcombine.low %v668_v32, %v672_v33 }
 0x22e   :  { %4733 = vmatpush1.bf16.msra.mxu1 %v7702_v39  ;;  %4897 = vmatpush1.bf16.msra.mxu0 %v7704_v40  ;;  %v7751_v39 = vcombine.high %v667_v28, %v671_v30  ;;  %v7753_v40 = vcombine.high %v668_v32, %v672_v33  ;;  %v1132_v28 = vrot.slane %v9482_v0, %v1131_v14  ;;  %v715_v32 = vld [vmem:[#allocation8 + $0xbc0] sm:$0xff] }
 0x22f   :  { %4734 = vmatprep.subr.bf16.mxu1 %v7711_v31  ;;  %4898 = vmatprep.subr.bf16.mxu0 %v7713_v41  ;;  %v675_v31 = vld [vmem:[#allocation8 + $0xa80] sm:$0xff] }
 0x230   :  { %v679_v41 = vld [vmem:[#allocation8 + $0xaa0] sm:$0xff] }
 0x231   :  { %v7758_v49 = vcombine.low %v675_v31, %v679_v41  ;;  %v719_v33 = vld [vmem:[#allocation8 + $0xbe0] sm:$0xff] }
 0x232   :  { %4735 = vmatpush1.bf16.msra.mxu1 %v7710_v18  ;;  %4899 = vmatpush1.bf16.msra.mxu0 %v7712_v44  ;;  %v7759_v18 = vcombine.high %v675_v31, %v679_v41  ;;  %v7761_v44 = vcombine.high %v676_v42, %v680_v43  ;;  %v7799_v41 = vcombine.high %v715_v32, %v719_v33  ;;  %v723_v43 = vld [vmem:[#allocation8 + $0xc00] sm:$0xff] }
 0x233   :  { %4736 = vmatprep.subr.bf16.mxu1 %v7719_v45  ;;  %4900 = vmatprep.subr.bf16.mxu0 %v7721_v62  ;;  %v683_v45 = vld [vmem:[#allocation8 + $0xac0] sm:$0xff] }
 0x234   :  { %v687_v62 = vld [vmem:[#allocation8 + $0xae0] sm:$0xff] }
 0x235   :  { %v7766_v59 = vcombine.low %v683_v45, %v687_v62  ;;  %v727_v0 = vld [vmem:[#allocation8 + $0xc20] sm:$0xff] }
 0x236   :  { %4737 = vmatpush1.bf16.msra.mxu1 %v7718_v52  ;;  %4901 = vmatpush1.bf16.msra.mxu0 %v7720_v38  ;;  %v7767_v52 = vcombine.high %v683_v45, %v687_v62  ;;  %v7769_v38 = vcombine.high %v684_v47, %v688_v48  ;;  %v7807_v62 = vcombine.high %v723_v43, %v727_v0  ;;  %v731_v48 = vld [vmem:[#allocation8 + $0xc40] sm:$0xff] }
 0x237   :  { %4738 = vmatprep.subr.bf16.mxu1 %v7727_v54  ;;  %4902 = vmatprep.subr.bf16.mxu0 %v7729_v56  ;;  %v691_v54 = vld [vmem:[#allocation8 + $0xb00] sm:$0xff] }
 0x238   :  { %v9536_v9 = vpop.f32.mrb[4].mxu0  ;;  %v695_v56 = vld [vmem:[#allocation8 + $0xb20] sm:$0xff] }
 0x239   :  { %v2264_v15 = vpop.f32.mrb[5].mxu0  ;;  %v7774_v10 = vcombine.low %v691_v54, %v695_v56  ;;  %v8258_v31 = vadd.f32 %v9536_v9, %v1132_v28  ;;  %v732_v9 = vld [vmem:[#allocation8 + $0xc48] sm:$0xff] }
 0x23a   :  { %v8259_v16 = vadd.f32 %v2264_v15, %v1136_v4  ;;  %4739 = vmatpush1.bf16.msra.mxu1 %v7726_v2  ;;  %4903 = vmatpush1.bf16.msra.mxu0 %v7728_v3  ;;  %v2266_v17 = vpop.f32.mrb[6].mxu0  ;;  %v7775_v2 = vcombine.high %v691_v54, %v695_v56  ;;  %v7777_v3 = vcombine.high %v692_v57, %v696_v58  ;;  %v699_v4 = vld [vmem:[#allocation8 + $0xb40] sm:$0xff]  ;;  %v760_v28 = vld [vmem:[#allocation8 + $0xd28] sm:$0xff] }
 0x23b   :  { %v2267_v55 = vpop.f32.mrb[7].mxu0  ;;  %4740 = vmatprep.subr.bf16.mxu1 %v7735_v5  ;;  %4904 = vmatprep.subr.bf16.mxu0 %v7737_v6  ;;  %v703_v5 = vld [vmem:[#allocation8 + $0xb60] sm:$0xff]  ;;  %v700_v6 = vld [vmem:[#allocation8 + $0xb48] sm:$0xff]  ;;  %v2353_v45 = vmax.f32 %v8258_v31, 0.0 }
 0x23c   :  { %v2354_v29 = vmax.f32 %v8259_v16, 0.0  ;;  %v7783_v15 = vcombine.high %v699_v4, %v703_v5  ;;  %v7785_v16 = vcombine.high %v700_v6, %v704_v8  ;;  %v707_v17 = vld [vmem:[#allocation8 + $0xb80] sm:$0xff]  ;;  %v712_v55 = vld [vmem:[#allocation8 + $0xba8] sm:$0xff] }
 0x23d   :  { %v9547_v54 = vpack.c.bf16 %v2353_v45, %v2353_v45  ;;  %v739_v58 = vld [vmem:[#allocation8 + $0xc80] sm:$0xff] }
 0x23e   :  { %v9538_v34 = vpack.c.bf16 %v2354_v29, %v2354_v29  ;;  %4741 = vmatpush1.bf16.msra.mxu1 %v7734_v19  ;;  %4905 = vmatpush1.bf16.msra.mxu0 %v7736_v24  ;;  %v711_v19 = vld [vmem:[#allocation8 + $0xba0] sm:$0xff]  ;;  %v708_v24 = vld [vmem:[#allocation8 + $0xb88] sm:$0xff] }
 0x23f   :  { %4742 = vmatprep.subr.bf16.mxu1 %v7743_v26  ;;  %4906 = vmatprep.subr.bf16.mxu0 %v7745_v27  ;;  %v7782_v26 = vcombine.low %v699_v4, %v703_v5  ;;  %v7784_v27 = vcombine.low %v700_v6, %v704_v8  ;;  %v7791_v29 = vcombine.high %v707_v17, %v711_v19  ;;  %v747_v8 = vld [vmem:[#allocation8 + $0xcc0] sm:$0xff] }
 0x240   :  { %4758 = vmatprep.mubr.bf16.mxu1 %v9538_v34  ;;  %4922 = vmatprep.mubr.bf16.mxu0 %v9538_v34  ;;  %v7793_v30 = vcombine.high %v708_v24, %v712_v55 }
 0x242   :  { %4743 = vmatpush1.bf16.msra.mxu1 %v7742_v36  ;;  %4907 = vmatpush1.bf16.msra.mxu0 %v7744_v37  ;;  %v716_v36 = vld [vmem:[#allocation8 + $0xbc8] sm:$0xff] }
 0x243   :  { %4744 = vmatprep.subr.bf16.mxu1 %v7751_v39  ;;  %4908 = vmatprep.subr.bf16.mxu0 %v7753_v40  ;;  %v720_v37 = vld [vmem:[#allocation8 + $0xbe8] sm:$0xff]  ;;  %v7790_v39 = vcombine.low %v707_v17, %v711_v19  ;;  %v7792_v40 = vcombine.low %v708_v24, %v712_v55  ;;  %v755_v55 = vld [vmem:[#allocation8 + $0xd00] sm:$0xff] }
 0x244   :  { %v7801_v42 = vcombine.high %v716_v36, %v720_v37 }
 0x246   :  { %4745 = vmatpush1.bf16.msra.mxu1 %v7750_v11  ;;  %4909 = vmatpush1.bf16.msra.mxu0 %v7752_v12  ;;  %v724_v11 = vld [vmem:[#allocation8 + $0xc08] sm:$0xff] }
 0x247   :  { %4746 = vmatprep.subr.bf16.mxu1 %v7759_v18  ;;  %4910 = vmatprep.subr.bf16.mxu0 %v7761_v44  ;;  %v728_v12 = vld [vmem:[#allocation8 + $0xc28] sm:$0xff]  ;;  %v7798_v18 = vcombine.low %v715_v32, %v719_v33  ;;  %v7800_v44 = vcombine.low %v716_v36, %v720_v37  ;;  %v763_v36 = vld [vmem:[#allocation8 + $0xd40] sm:$0xff] }
 0x248   :  { %v7809_v47 = vcombine.high %v724_v11, %v728_v12  ;;  %v767_v37 = vld [vmem:[#allocation8 + $0xd60] sm:$0xff] }
 0x24a   :  { %4747 = vmatpush1.bf16.msra.mxu1 %v7758_v49  ;;  %4911 = vmatpush1.bf16.msra.mxu0 %v7760_v51  ;;  %v735_v49 = vld [vmem:[#allocation8 + $0xc60] sm:$0xff]  ;;  %v736_v51 = vld [vmem:[#allocation8 + $0xc68] sm:$0xff] }
 0x24b   :  { %4748 = vmatprep.subr.bf16.mxu1 %v7767_v52  ;;  %4912 = vmatprep.subr.bf16.mxu0 %v7769_v38  ;;  %v7806_v52 = vcombine.low %v723_v43, %v727_v0  ;;  %v7808_v38 = vcombine.low %v724_v11, %v728_v12  ;;  %v7815_v56 = vcombine.high %v731_v48, %v735_v49  ;;  %v771_v0 = vld [vmem:[#allocation8 + $0xd80] sm:$0xff]  ;;  %v772_v12 = vld [vmem:[#allocation8 + $0xd88] sm:$0xff] }
 0x24c   :  { %v7817_v57 = vcombine.high %v732_v9, %v736_v51  ;;  %v7816_v4 = vcombine.low %v732_v9, %v736_v51  ;;  %v775_v11 = vld [vmem:[#allocation8 + $0xda0] sm:$0xff]  ;;  %v780_v9 = vld [vmem:[#allocation8 + $0xdc8] sm:$0xff] }
 0x24d   :  { %v784_v51 = vld [vmem:[#allocation8 + $0xde8] sm:$0xff] }
 0x24e   :  { %4749 = vmatpush1.bf16.msra.mxu1 %v7766_v59  ;;  %4913 = vmatpush1.bf16.msra.mxu0 %v7768_v35  ;;  %v743_v59 = vld [vmem:[#allocation8 + $0xca0] sm:$0xff]  ;;  %v740_v35 = vld [vmem:[#allocation8 + $0xc88] sm:$0xff] }
 0x24f   :  { %4750 = vmatprep.subr.bf16.mxu1 %v7775_v2  ;;  %4914 = vmatprep.subr.bf16.mxu0 %v7777_v3  ;;  %v744_v2 = vld [vmem:[#allocation8 + $0xca8] sm:$0xff]  ;;  %v7814_v3 = vcombine.low %v731_v48, %v735_v49  ;;  %v7823_v5 = vcombine.high %v739_v58, %v743_v59  ;;  %v779_v48 = vld [vmem:[#allocation8 + $0xdc0] sm:$0xff] }
 0x250   :  { %v7825_v6 = vcombine.high %v740_v35, %v744_v2  ;;  %v7824_v17 = vcombine.low %v740_v35, %v744_v2  ;;  %v783_v49 = vld [vmem:[#allocation8 + $0xde0] sm:$0xff]  ;;  %v342_v35 = vld [vmem:[#allocation8 + $0x18] sm:$0xff] }
 0x251   :  { %v346_v2 = vld [vmem:[#allocation8 + $0x38] sm:$0xff] }
 0x252   :  { %4751 = vmatpush1.bf16.msra.mxu1 %v7774_v10  ;;  %4915 = vmatpush1.bf16.msra.mxu0 %v7776_v13  ;;  %v751_v10 = vld [vmem:[#allocation8 + $0xce0] sm:$0xff]  ;;  %v748_v13 = vld [vmem:[#allocation8 + $0xcc8] sm:$0xff] }
 0x253   :  { %4752 = vmatprep.subr.bf16.mxu1 %v7783_v15  ;;  %4916 = vmatprep.subr.bf16.mxu0 %v7785_v16  ;;  %v752_v15 = vld [vmem:[#allocation8 + $0xce8] sm:$0xff]  ;;  %v7822_v16 = vcombine.low %v739_v58, %v743_v59  ;;  %v7831_v19 = vcombine.high %v747_v8, %v751_v10  ;;  %v341_v58 = vld [vmem:[#allocation8 + $0x10] sm:$0xff] }
 0x254   :  { %v7833_v24 = vcombine.high %v748_v13, %v752_v15  ;;  %v345_v59 = vld [vmem:[#allocation8 + $0x30] sm:$0xff] }
 0x256   :  { %4753 = vmatpush1.bf16.msra.mxu1 %v7782_v26  ;;  %4917 = vmatpush1.bf16.msra.mxu0 %v7784_v27  ;;  %v759_v26 = vld [vmem:[#allocation8 + $0xd20] sm:$0xff]  ;;  %v756_v27 = vld [vmem:[#allocation8 + $0xd08] sm:$0xff] }
 0x257   :  { %4754 = vmatprep.subr.bf16.mxu1 %v7791_v29  ;;  %4918 = vmatprep.subr.bf16.mxu0 %v7793_v30  ;;  %v7830_v29 = vcombine.low %v747_v8, %v751_v10  ;;  %v7832_v30 = vcombine.low %v748_v13, %v752_v15  ;;  %v7839_v32 = vcombine.high %v755_v55, %v759_v26  ;;  %v349_v10 = vld [vmem:[#allocation8 + $0x50] sm:$0xff]  ;;  %v350_v15 = vld [vmem:[#allocation8 + $0x58] sm:$0xff] }
 0x258   :  { %v7841_v33 = vcombine.high %v756_v27, %v760_v28  ;;  %v7838_v31 = vcombine.low %v755_v55, %v759_v26  ;;  %v7429_v8 = vcombine.high %v342_v35, %v346_v2  ;;  %v353_v13 = vld [vmem:[#allocation8 + $0x70] sm:$0xff] }
 0x259   :  { %v7435_v55 = vcombine.high %v349_v10, %v353_v13 }
 0x25a   :  { %4755 = vmatpush1.bf16.msra.mxu1 %v7790_v39  ;;  %4919 = vmatpush1.bf16.msra.mxu0 %v7792_v40  ;;  %v764_v39 = vld [vmem:[#allocation8 + $0xd48] sm:$0xff] }
 0x25b   :  { %4756 = vmatprep.subr.bf16.mxu1 %v7799_v41  ;;  %4920 = vmatprep.subr.bf16.mxu0 %v7801_v42  ;;  %v768_v40 = vld [vmem:[#allocation8 + $0xd68] sm:$0xff]  ;;  %v7840_v41 = vcombine.low %v756_v27, %v760_v28  ;;  %v7847_v42 = vcombine.high %v763_v36, %v767_v37  ;;  %v357_v27 = vld [vmem:[#allocation8 + $0x90] sm:$0xff]  ;;  %v358_v28 = vld [vmem:[#allocation8 + $0x98] sm:$0xff] }
 0x25c   :  { %v7849_v43 = vcombine.high %v764_v39, %v768_v40  ;;  %v7848_v45 = vcombine.low %v764_v39, %v768_v40  ;;  %v369_v39 = vld [vmem:[#allocation8 + $0xf0] sm:$0xff]  ;;  %v366_v40 = vld [vmem:[#allocation8 + $0xd8] sm:$0xff] }
 0x25e   :  { %4757 = vmatpush1.bf16.msra.mxu1 %v7798_v18  ;;  %4921 = vmatpush1.bf16.msra.mxu0 %v7800_v44  ;;  %v776_v18 = vld [vmem:[#allocation8 + $0xda8] sm:$0xff]  ;;  %v7846_v44 = vcombine.low %v763_v36, %v767_v37  ;;  %v365_v37 = vld [vmem:[#allocation8 + $0xd0] sm:$0xff] }
 0x25f   :  { %4767 = vmatprep.subr.bf16.mxu1 %v7807_v62  ;;  %4931 = vmatprep.subr.bf16.mxu0 %v7809_v47  ;;  %v7855_v62 = vcombine.high %v771_v0, %v775_v11  ;;  %v7857_v47 = vcombine.high %v772_v12, %v776_v18 }
 0x261   :  { %4759 = vmatmul.mubr.bf16.vlgmr.msra.gmra.mrb[12].mxu1 %v9547_v54  ;;  %4923 = vmatmul.mubr.bf16.vlgmr.msra.gmra.mrb[8].mxu0 %v9547_v54 }
 0x262   :  { %4768 = vmatpush1.bf16.msra.mxu1 %v7806_v52  ;;  %4932 = vmatpush1.bf16.msra.mxu0 %v7808_v38  ;;  %v7854_v52 = vcombine.low %v771_v0, %v775_v11  ;;  %v7856_v38 = vcombine.low %v772_v12, %v776_v18  ;;  %v373_v11 = vld [vmem:[#allocation8 + $0x110] sm:$0xff]  ;;  %v378_v18 = vld [vmem:[#allocation8 + $0x138] sm:$0xff] }
 0x263   :  { %4769 = vmatprep.subr.bf16.mxu1 %v7815_v56  ;;  %4933 = vmatprep.subr.bf16.mxu0 %v7817_v57  ;;  %v7863_v56 = vcombine.high %v779_v48, %v783_v49  ;;  %v7865_v57 = vcombine.high %v780_v9, %v784_v51  ;;  %v377_v12 = vld [vmem:[#allocation8 + $0x130] sm:$0xff] }
 0x264   :  { %4799 = vmatprep.mubr.bf16.mxu1 %v9286_v7  ;;  %4963 = vmatprep.mubr.bf16.mxu0 %v9286_v7 }
 0x266   :  { %4770 = vmatpush1.bf16.msra.mxu1 %v7814_v3  ;;  %4934 = vmatpush1.bf16.msra.mxu0 %v7816_v4  ;;  %v7862_v3 = vcombine.low %v779_v48, %v783_v49  ;;  %v7864_v4 = vcombine.low %v780_v9, %v784_v51  ;;  %v381_v48 = vld [vmem:[#allocation8 + $0x150] sm:$0xff]  ;;  %v382_v9 = vld [vmem:[#allocation8 + $0x158] sm:$0xff] }
 0x267   :  { %4771 = vmatprep.subr.bf16.mxu1 %v7823_v5  ;;  %4935 = vmatprep.subr.bf16.mxu0 %v7825_v6  ;;  %v2355_v5 = vmax.f32 %v9530_v25, 0.0  ;;  %v7427_v6 = vcombine.high %v341_v58, %v345_v59  ;;  %v361_v25 = vld [vmem:[#allocation8 + $0xb0] sm:$0xff]  ;;  %v386_v51 = vld [vmem:[#allocation8 + $0x178] sm:$0xff] }
 0x268   :  { %v385_v49 = vld [vmem:[#allocation8 + $0x170] sm:$0xff] }
 0x26a   :  { %4772 = vmatpush1.bf16.msra.mxu1 %v7822_v16  ;;  %4936 = vmatpush1.bf16.msra.mxu0 %v7824_v17  ;;  %v354_v16 = vld [vmem:[#allocation8 + $0x78] sm:$0xff]  ;;  %v7426_v17 = vcombine.low %v341_v58, %v345_v59  ;;  %v389_v58 = vld [vmem:[#allocation8 + $0x190] sm:$0xff] }
 0x26b   :  { %4773 = vmatprep.subr.bf16.mxu1 %v7831_v19  ;;  %4937 = vmatprep.subr.bf16.mxu0 %v7833_v24  ;;  %v9554_v19 = vpack.c.bf16 %v2355_v5, %v2355_v5  ;;  %v7428_v24 = vcombine.low %v342_v35, %v346_v2  ;;  %v7437_v26 = vcombine.high %v350_v15, %v354_v16  ;;  %v393_v59 = vld [vmem:[#allocation8 + $0x1b0] sm:$0xff]  ;;  %v390_v35 = vld [vmem:[#allocation8 + $0x198] sm:$0xff] }
 0x26c   :  { %v394_v2 = vld [vmem:[#allocation8 + $0x1b8] sm:$0xff]  ;;  %v7475_v5 = vcombine.high %v389_v58, %v393_v59 }
 0x26e   :  { %4774 = vmatpush1.bf16.msra.mxu1 %v7830_v29  ;;  %4938 = vmatpush1.bf16.msra.mxu0 %v7832_v30  ;;  %v362_v29 = vld [vmem:[#allocation8 + $0xb8] sm:$0xff]  ;;  %v7434_v30 = vcombine.low %v349_v10, %v353_v13  ;;  %v401_v10 = vld [vmem:[#allocation8 + $0x1f0] sm:$0xff] }
 0x26f   :  { %4775 = vmatprep.subr.bf16.mxu1 %v7839_v32  ;;  %4939 = vmatprep.subr.bf16.mxu0 %v7841_v33  ;;  %v7436_v32 = vcombine.low %v350_v15, %v354_v16  ;;  %v7443_v33 = vcombine.high %v357_v27, %v361_v25  ;;  %v7445_v36 = vcombine.high %v358_v28, %v362_v29  ;;  %v398_v13 = vld [vmem:[#allocation8 + $0x1d8] sm:$0xff] }
 0x270   :  { %v402_v15 = vld [vmem:[#allocation8 + $0x1f8] sm:$0xff]  ;;  %v7474_v16 = vcombine.low %v389_v58, %v393_v59  ;;  %v441_v58 = vld [vmem:[#allocation8 + $0x330] sm:$0xff] }
 0x271   :  { %v438_v59 = vld [vmem:[#allocation8 + $0x318] sm:$0xff] }
 0x272   :  { %4776 = vmatpush1.bf16.msra.mxu1 %v7838_v31  ;;  %4940 = vmatpush1.bf16.msra.mxu0 %v7840_v41  ;;  %v370_v31 = vld [vmem:[#allocation8 + $0xf8] sm:$0xff]  ;;  %v7442_v41 = vcombine.low %v357_v27, %v361_v25  ;;  %v409_v27 = vld [vmem:[#allocation8 + $0x230] sm:$0xff] }
 0x273   :  { %4777 = vmatprep.subr.bf16.mxu1 %v7847_v42  ;;  %4941 = vmatprep.subr.bf16.mxu0 %v7849_v43  ;;  %v7444_v42 = vcombine.low %v358_v28, %v362_v29  ;;  %v7451_v43 = vcombine.high %v365_v37, %v369_v39  ;;  %v7453_v0 = vcombine.high %v366_v40, %v370_v31  ;;  %v406_v25 = vld [vmem:[#allocation8 + $0x218] sm:$0xff] }
 0x274   :  { %v410_v28 = vld [vmem:[#allocation8 + $0x238] sm:$0xff] }
 0x276   :  { %4778 = vmatpush1.bf16.msra.mxu1 %v7846_v44  ;;  %4942 = vmatpush1.bf16.msra.mxu0 %v7848_v45  ;;  %v7450_v44 = vcombine.low %v365_v37, %v369_v39  ;;  %v7452_v45 = vcombine.low %v366_v40, %v370_v31  ;;  %v417_v37 = vld [vmem:[#allocation8 + $0x270] sm:$0xff]  ;;  %v414_v39 = vld [vmem:[#allocation8 + $0x258] sm:$0xff] }
 0x277   :  { %4779 = vmatprep.subr.bf16.mxu1 %v7855_v62  ;;  %4943 = vmatprep.subr.bf16.mxu0 %v7857_v47  ;;  %v7459_v62 = vcombine.high %v373_v11, %v377_v12  ;;  %v418_v40 = vld [vmem:[#allocation8 + $0x278] sm:$0xff] }
 0x27a   :  { %4780 = vmatpush1.bf16.msra.mxu1 %v7854_v52  ;;  %4944 = vmatpush1.bf16.msra.mxu0 %v7856_v38  ;;  %v7458_v52 = vcombine.low %v373_v11, %v377_v12  ;;  %v425_v11 = vld [vmem:[#allocation8 + $0x2b0] sm:$0xff]  ;;  %v422_v12 = vld [vmem:[#allocation8 + $0x298] sm:$0xff] }
 0x27b   :  { %4781 = vmatprep.subr.bf16.mxu1 %v7863_v56  ;;  %4945 = vmatprep.subr.bf16.mxu0 %v7865_v57  ;;  %v7467_v56 = vcombine.high %v381_v48, %v385_v49  ;;  %v7469_v57 = vcombine.high %v382_v9, %v386_v51 }
 0x27e   :  { %4782 = vmatpush1.bf16.msra.mxu1 %v7862_v3  ;;  %4946 = vmatpush1.bf16.msra.mxu0 %v7864_v4  ;;  %v7466_v3 = vcombine.low %v381_v48, %v385_v49  ;;  %v7468_v4 = vcombine.low %v382_v9, %v386_v51  ;;  %v433_v48 = vld [vmem:[#allocation8 + $0x2f0] sm:$0xff]  ;;  %v430_v49 = vld [vmem:[#allocation8 + $0x2d8] sm:$0xff] }
 0x27f   :  { %4972 = vmatprep.subr.bf16.mxu1 %v7427_v6  ;;  %5136 = vmatprep.subr.bf16.mxu0 %v7429_v8  ;;  %v7477_v6 = vcombine.high %v390_v35, %v394_v2  ;;  %v397_v8 = vld [vmem:[#allocation8 + $0x1d0] sm:$0xff]  ;;  %v434_v9 = vld [vmem:[#allocation8 + $0x2f8] sm:$0xff] }
 0x280   :  { %v7482_v29 = vcombine.low %v397_v8, %v401_v10 }
 0x281   :  { %4800 = vmatmul.mubr.bf16.vlgmr.msra.gmra.mrb[12].mxu1 %v9554_v19  ;;  %4964 = vmatmul.mubr.bf16.vlgmr.msra.gmra.mrb[8].mxu0 %v9554_v19 }
 0x282   :  { %4973 = vmatpush1.bf16.msra.mxu1 %v7426_v17  ;;  %5004 = vmatprep.mubr.bf16.mxu1 %v9494_v21  ;;  %v7476_v17 = vcombine.low %v390_v35, %v394_v2  ;;  %v442_v35 = vld [vmem:[#allocation8 + $0x338] sm:$0xff] }
 0x283   :  { %5137 = vmatpush1.bf16.msra.mxu0 %v7428_v24  ;;  %5168 = vmatprep.mubr.bf16.mxu0 %v9494_v21  ;;  %v374_v21 = vld [vmem:[#allocation8 + $0x118] sm:$0xff]  ;;  %v7483_v24 = vcombine.high %v397_v8, %v401_v10  ;;  %v449_v8 = vld [vmem:[#allocation8 + $0x370] sm:$0xff] }
 0x284   :  { %4974 = vmatprep.subr.bf16.mxu1 %v7435_v55  ;;  %5138 = vmatprep.subr.bf16.mxu0 %v7437_v26  ;;  %v7461_v47 = vcombine.high %v374_v21, %v378_v18  ;;  %v7460_v38 = vcombine.low %v374_v21, %v378_v18  ;;  %v7485_v55 = vcombine.high %v398_v13, %v402_v15  ;;  %v405_v26 = vld [vmem:[#allocation8 + $0x210] sm:$0xff]  ;;  %v426_v21 = vld [vmem:[#allocation8 + $0x2b8] sm:$0xff] }
 0x285   :  { %v7490_v31 = vcombine.low %v405_v26, %v409_v27  ;;  %v446_v10 = vld [vmem:[#allocation8 + $0x358] sm:$0xff] }
 0x286   :  { %4975 = vmatpush1.bf16.msra.mxu1 %v7434_v30  ;;  %v7484_v30 = vcombine.low %v398_v13, %v402_v15  ;;  %v450_v13 = vld [vmem:[#allocation8 + $0x378] sm:$0xff] }
 0x287   :  { %5139 = vmatpush1.bf16.msra.mxu0 %v7436_v32  ;;  %4976 = vmatprep.subr.bf16.mxu1 %v7443_v33  ;;  %v7491_v32 = vcombine.high %v405_v26, %v409_v27  ;;  %v7493_v33 = vcombine.high %v406_v25, %v410_v28  ;;  %v457_v26 = vld [vmem:[#allocation8 + $0x3b0] sm:$0xff]  ;;  %v454_v27 = vld [vmem:[#allocation8 + $0x398] sm:$0xff] }
 0x288   :  { %5140 = vmatprep.subr.bf16.mxu0 %v7445_v36  ;;  %v413_v36 = vld [vmem:[#allocation8 + $0x250] sm:$0xff] }
 0x289   :  { %v7498_v18 = vcombine.low %v413_v36, %v417_v37 }
 0x28a   :  { %4977 = vmatpush1.bf16.msra.mxu1 %v7442_v41  ;;  %v7492_v41 = vcombine.low %v406_v25, %v410_v28  ;;  %v458_v25 = vld [vmem:[#allocation8 + $0x3b8] sm:$0xff] }
 0x28b   :  { %5141 = vmatpush1.bf16.msra.mxu0 %v7444_v42  ;;  %4978 = vmatprep.subr.bf16.mxu1 %v7451_v43  ;;  %v7499_v42 = vcombine.high %v413_v36, %v417_v37  ;;  %v7501_v43 = vcombine.high %v414_v39, %v418_v40  ;;  %v465_v36 = vld [vmem:[#allocation8 + $0x3f0] sm:$0xff]  ;;  %v462_v37 = vld [vmem:[#allocation8 + $0x3d8] sm:$0xff] }
 0x28c   :  { %5142 = vmatprep.subr.bf16.mxu0 %v7453_v0  ;;  %v421_v0 = vld [vmem:[#allocation8 + $0x290] sm:$0xff] }
 0x28d   :  { %v7506_v51 = vcombine.low %v421_v0, %v425_v11 }
 0x28e   :  { %4979 = vmatpush1.bf16.msra.mxu1 %v7450_v44  ;;  %v7500_v44 = vcombine.low %v414_v39, %v418_v40  ;;  %v466_v39 = vld [vmem:[#allocation8 + $0x3f8] sm:$0xff] }
 0x28f   :  { %5143 = vmatpush1.bf16.msra.mxu0 %v7452_v45  ;;  %4980 = vmatprep.subr.bf16.mxu1 %v7459_v62  ;;  %v7507_v45 = vcombine.high %v421_v0, %v425_v11  ;;  %v7509_v62 = vcombine.high %v422_v12, %v426_v21  ;;  %v473_v0 = vld [vmem:[#allocation8 + $0x430] sm:$0xff]  ;;  %v470_v11 = vld [vmem:[#allocation8 + $0x418] sm:$0xff] }
 0x290   :  { %5144 = vmatprep.subr.bf16.mxu0 %v7461_v47  ;;  %v429_v47 = vld [vmem:[#allocation8 + $0x2d0] sm:$0xff] }
 0x291   :  { %v7514_v2 = vcombine.low %v429_v47, %v433_v48 }
 0x292   :  { %4981 = vmatpush1.bf16.msra.mxu1 %v7458_v52  ;;  %v7508_v52 = vcombine.low %v422_v12, %v426_v21  ;;  %v474_v12 = vld [vmem:[#allocation8 + $0x438] sm:$0xff] }
 0x293   :  { %5145 = vmatpush1.bf16.msra.mxu0 %v7460_v38  ;;  %4982 = vmatprep.subr.bf16.mxu1 %v7467_v56  ;;  %v7515_v38 = vcombine.high %v429_v47, %v433_v48  ;;  %v7517_v56 = vcombine.high %v430_v49, %v434_v9  ;;  %v481_v47 = vld [vmem:[#allocation8 + $0x470] sm:$0xff] }
 0x294   :  { %5146 = vmatprep.subr.bf16.mxu0 %v7469_v57  ;;  %v437_v57 = vld [vmem:[#allocation8 + $0x310] sm:$0xff] }
 0x295   :  { %v7522_v15 = vcombine.low %v437_v57, %v441_v58 }
 0x296   :  { %4983 = vmatpush1.bf16.msra.mxu1 %v7466_v3  ;;  %v7516_v3 = vcombine.low %v430_v49, %v434_v9  ;;  %v478_v49 = vld [vmem:[#allocation8 + $0x458] sm:$0xff] }
 0x297   :  { %5147 = vmatpush1.bf16.msra.mxu0 %v7468_v4  ;;  %4984 = vmatprep.subr.bf16.mxu1 %v7475_v5  ;;  %v7523_v4 = vcombine.high %v437_v57, %v441_v58  ;;  %v7525_v5 = vcombine.high %v438_v59, %v442_v35  ;;  %v482_v9 = vld [vmem:[#allocation8 + $0x478] sm:$0xff] }
 0x298   :  { %5148 = vmatprep.subr.bf16.mxu0 %v7477_v6  ;;  %v445_v6 = vld [vmem:[#allocation8 + $0x350] sm:$0xff]  ;;  %v7565_v57 = vcombine.high %v478_v49, %v482_v9  ;;  %v486_v58 = vld [vmem:[#allocation8 + $0x498] sm:$0xff] }
 0x299   :  { %v7530_v28 = vcombine.low %v445_v6, %v449_v8 }
 0x29a   :  { %4985 = vmatpush1.bf16.msra.mxu1 %v7474_v16  ;;  %v7524_v16 = vcombine.low %v438_v59, %v442_v35  ;;  %v490_v59 = vld [vmem:[#allocation8 + $0x4b8] sm:$0xff] }
 0x29b   :  { %5149 = vmatpush1.bf16.msra.mxu0 %v7476_v17  ;;  %4986 = vmatprep.subr.bf16.mxu1 %v7483_v24  ;;  %v7531_v17 = vcombine.high %v445_v6, %v449_v8  ;;  %v7533_v24 = vcombine.high %v446_v10, %v450_v13  ;;  %v497_v6 = vld [vmem:[#allocation8 + $0x4f0] sm:$0xff]  ;;  %v494_v8 = vld [vmem:[#allocation8 + $0x4d8] sm:$0xff] }
 0x29c   :  { %5150 = vmatprep.subr.bf16.mxu0 %v7485_v55  ;;  %v453_v55 = vld [vmem:[#allocation8 + $0x390] sm:$0xff] }
 0x29d   :  { %v7538_v40 = vcombine.low %v453_v55, %v457_v26 }
 0x29e   :  { %4987 = vmatpush1.bf16.msra.mxu1 %v7482_v29  ;;  %v7532_v29 = vcombine.low %v446_v10, %v450_v13  ;;  %v498_v10 = vld [vmem:[#allocation8 + $0x4f8] sm:$0xff] }
 0x29f   :  { %5151 = vmatpush1.bf16.msra.mxu0 %v7484_v30  ;;  %4988 = vmatprep.subr.bf16.mxu1 %v7491_v32  ;;  %v7539_v30 = vcombine.high %v453_v55, %v457_v26  ;;  %v7541_v32 = vcombine.high %v454_v27, %v458_v25  ;;  %v502_v55 = vld [vmem:[#allocation8 + $0x518] sm:$0xff] }
 0x2a0   :  { %5152 = vmatprep.subr.bf16.mxu0 %v7493_v33  ;;  %v461_v33 = vld [vmem:[#allocation8 + $0x3d0] sm:$0xff]  ;;  %v506_v26 = vld [vmem:[#allocation8 + $0x538] sm:$0xff] }
 0x2a1   :  { %v7546_v21 = vcombine.low %v461_v33, %v465_v36 }
 0x2a2   :  { %4989 = vmatpush1.bf16.msra.mxu1 %v7490_v31  ;;  %v7540_v31 = vcombine.low %v454_v27, %v458_v25  ;;  %v7580_v27 = vcombine.low %v494_v8, %v498_v10 }
 0x2a3   :  { %5153 = vmatpush1.bf16.msra.mxu0 %v7492_v41  ;;  %4990 = vmatprep.subr.bf16.mxu1 %v7499_v42  ;;  %v7547_v41 = vcombine.high %v461_v33, %v465_v36  ;;  %v7549_v42 = vcombine.high %v462_v37, %v466_v39  ;;  %v514_v33 = vld [vmem:[#allocation8 + $0x578] sm:$0xff] }
 0x2a4   :  { %5154 = vmatprep.subr.bf16.mxu0 %v7501_v43  ;;  %v469_v43 = vld [vmem:[#allocation8 + $0x410] sm:$0xff] }
 0x2a5   :  { %v7554_v48 = vcombine.low %v469_v43, %v473_v0 }
 0x2a6   :  { %4991 = vmatpush1.bf16.msra.mxu1 %v7498_v18  ;;  %v7548_v18 = vcombine.low %v462_v37, %v466_v39  ;;  %v7588_v37 = vcombine.low %v502_v55, %v506_v26 }
 0x2a7   :  { %5155 = vmatpush1.bf16.msra.mxu0 %v7500_v44  ;;  %4992 = vmatprep.subr.bf16.mxu1 %v7507_v45  ;;  %v7555_v44 = vcombine.high %v469_v43, %v473_v0  ;;  %v7557_v45 = vcombine.high %v470_v11, %v474_v12  ;;  %v522_v43 = vld [vmem:[#allocation8 + $0x5b8] sm:$0xff] }
 0x2a8   :  { %5156 = vmatprep.subr.bf16.mxu0 %v7509_v62  ;;  %v477_v62 = vld [vmem:[#allocation8 + $0x450] sm:$0xff] }
 0x2a9   :  { %v7562_v35 = vcombine.low %v477_v62, %v481_v47 }
 0x2aa   :  { %4993 = vmatpush1.bf16.msra.mxu1 %v7506_v51  ;;  %v7556_v51 = vcombine.low %v470_v11, %v474_v12 }
 0x2ab   :  { %5157 = vmatpush1.bf16.msra.mxu0 %v7508_v52  ;;  %4994 = vmatprep.subr.bf16.mxu1 %v7515_v38  ;;  %v7563_v52 = vcombine.high %v477_v62, %v481_v47  ;;  %v485_v38 = vld [vmem:[#allocation8 + $0x490] sm:$0xff]  ;;  %v530_v62 = vld [vmem:[#allocation8 + $0x5f8] sm:$0xff] }
 0x2ac   :  { %5158 = vmatprep.subr.bf16.mxu0 %v7517_v56  ;;  %v489_v56 = vld [vmem:[#allocation8 + $0x4b0] sm:$0xff] }
 0x2ad   :  { %v7570_v13 = vcombine.low %v485_v38, %v489_v56 }
 0x2ae   :  { %4995 = vmatpush1.bf16.msra.mxu1 %v7514_v2  ;;  %v7564_v2 = vcombine.low %v478_v49, %v482_v9 }
 0x2af   :  { %5159 = vmatpush1.bf16.msra.mxu0 %v7516_v3  ;;  %4996 = vmatprep.subr.bf16.mxu1 %v7523_v4  ;;  %v7571_v3 = vcombine.high %v485_v38, %v489_v56  ;;  %v7573_v4 = vcombine.high %v486_v58, %v490_v59  ;;  %v534_v38 = vld [vmem:[#allocation8 + $0x618] sm:$0xff] }
 0x2b0   :  { %5160 = vmatprep.subr.bf16.mxu0 %v7525_v5  ;;  %v493_v5 = vld [vmem:[#allocation8 + $0x4d0] sm:$0xff]  ;;  %v538_v56 = vld [vmem:[#allocation8 + $0x638] sm:$0xff] }
 0x2b2   :  { %4997 = vmatpush1.bf16.msra.mxu1 %v7522_v15  ;;  %v7579_v15 = vcombine.high %v493_v5, %v497_v6 }
 0x2b3   :  { %5161 = vmatpush1.bf16.msra.mxu0 %v7524_v16  ;;  %4998 = vmatprep.subr.bf16.mxu1 %v7531_v17  ;;  %v7581_v16 = vcombine.high %v494_v8, %v498_v10  ;;  %v501_v17 = vld [vmem:[#allocation8 + $0x510] sm:$0xff]  ;;  %v7620_v8 = vcombine.low %v534_v38, %v538_v56 }
 0x2b4   :  { %5162 = vmatprep.subr.bf16.mxu0 %v7533_v24  ;;  %v505_v24 = vld [vmem:[#allocation8 + $0x530] sm:$0xff] }
 0x2b5   :  { %v7587_v25 = vcombine.high %v501_v17, %v505_v24  ;;  %v7586_v36 = vcombine.low %v501_v17, %v505_v24  ;;  %v554_v17 = vld [vmem:[#allocation8 + $0x6b8] sm:$0xff] }
 0x2b6   :  { %4999 = vmatpush1.bf16.msra.mxu1 %v7530_v28  ;;  %v7589_v28 = vcombine.high %v502_v55, %v506_v26 }
 0x2b7   :  { %5163 = vmatpush1.bf16.msra.mxu0 %v7532_v29  ;;  %5000 = vmatprep.subr.bf16.mxu1 %v7539_v30  ;;  %v509_v29 = vld [vmem:[#allocation8 + $0x550] sm:$0xff] }
 0x2b8   :  { %5164 = vmatprep.subr.bf16.mxu0 %v7541_v32  ;;  %v513_v30 = vld [vmem:[#allocation8 + $0x570] sm:$0xff]  ;;  %v510_v32 = vld [vmem:[#allocation8 + $0x558] sm:$0xff] }
 0x2b9   :  { %v7595_v39 = vcombine.high %v509_v29, %v513_v30  ;;  %v7594_v0 = vcombine.low %v509_v29, %v513_v30  ;;  %v7596_v11 = vcombine.low %v510_v32, %v514_v33  ;;  %v562_v29 = vld [vmem:[#allocation8 + $0x6f8] sm:$0xff] }
 0x2ba   :  { %5001 = vmatpush1.bf16.msra.mxu1 %v7538_v40  ;;  %v7597_v40 = vcombine.high %v510_v32, %v514_v33 }
 0x2bb   :  { %5165 = vmatpush1.bf16.msra.mxu0 %v7540_v31  ;;  %5002 = vmatprep.subr.bf16.mxu1 %v7547_v41  ;;  %v517_v31 = vld [vmem:[#allocation8 + $0x590] sm:$0xff] }
 0x2bc   :  { %5166 = vmatprep.subr.bf16.mxu0 %v7549_v42  ;;  %v521_v41 = vld [vmem:[#allocation8 + $0x5b0] sm:$0xff]  ;;  %v518_v42 = vld [vmem:[#allocation8 + $0x598] sm:$0xff] }
 0x2bd   :  { %v7603_v12 = vcombine.high %v517_v31, %v521_v41  ;;  %v7602_v47 = vcombine.low %v517_v31, %v521_v41  ;;  %v570_v31 = vld [vmem:[#allocation8 + $0x738] sm:$0xff] }
 0x2be   :  { %5003 = vmatpush1.bf16.msra.mxu1 %v7546_v21  ;;  %v7605_v21 = vcombine.high %v518_v42, %v522_v43 }
 0x2bf   :  { %5167 = vmatpush1.bf16.msra.mxu0 %v7548_v18  ;;  %5013 = vmatprep.subr.bf16.mxu1 %v7555_v44  ;;  %v525_v18 = vld [vmem:[#allocation8 + $0x5d0] sm:$0xff] }
 0x2c0   :  { %5177 = vmatprep.subr.bf16.mxu0 %v7557_v45  ;;  %v529_v44 = vld [vmem:[#allocation8 + $0x5f0] sm:$0xff]  ;;  %v526_v45 = vld [vmem:[#allocation8 + $0x5d8] sm:$0xff] }
 0x2c1   :  { %5005 = vmatmul.mubr.bf16.vlgmr.msra.gmra.mrb[16].mxu1 %v9496_v23  ;;  %v7611_v49 = vcombine.high %v525_v18, %v529_v44  ;;  %v7613_v9 = vcombine.high %v526_v45, %v530_v62 }
 0x2c2   :  { %5169 = vmatmul.mubr.bf16.vlgmr.msra.gmra.mrb[12].mxu0 %v9496_v23  ;;  %5014 = vmatpush1.bf16.msra.mxu1 %v7554_v48  ;;  %v7572_v23 = vcombine.low %v486_v58, %v490_v59  ;;  %v7604_v48 = vcombine.low %v518_v42, %v522_v43  ;;  %v7612_v58 = vcombine.low %v526_v45, %v530_v62 }
 0x2c3   :  { %5045 = vmatprep.mubr.bf16.mxu1 %v9509_v50  ;;  %5178 = vmatpush1.bf16.msra.mxu0 %v7556_v51  ;;  %v533_v51 = vld [vmem:[#allocation8 + $0x610] sm:$0xff] }
 0x2c4   :  { %5209 = vmatprep.mubr.bf16.mxu0 %v9509_v50  ;;  %5015 = vmatprep.subr.bf16.mxu1 %v7563_v52  ;;  %v7578_v50 = vcombine.low %v493_v5, %v497_v6  ;;  %v537_v52 = vld [vmem:[#allocation8 + $0x630] sm:$0xff]  ;;  %v546_v5 = vld [vmem:[#allocation8 + $0x678] sm:$0xff] }
 0x2c5   :  { %5179 = vmatprep.subr.bf16.mxu0 %v7565_v57  ;;  %v7610_v57 = vcombine.low %v525_v18, %v529_v44  ;;  %v7619_v59 = vcombine.high %v533_v51, %v537_v52  ;;  %v7618_v6 = vcombine.low %v533_v51, %v537_v52  ;;  %v578_v18 = vld [vmem:[#allocation8 + $0x778] sm:$0xff] }
 0x2c6   :  { %5016 = vmatpush1.bf16.msra.mxu1 %v7562_v35  ;;  %v7621_v35 = vcombine.high %v534_v38, %v538_v56  ;;  %v586_v51 = vld [vmem:[#allocation8 + $0x7b8] sm:$0xff] }
 0x2c7   :  { %5180 = vmatpush1.bf16.msra.mxu0 %v7564_v2  ;;  %5017 = vmatprep.subr.bf16.mxu1 %v7571_v3  ;;  %v541_v2 = vld [vmem:[#allocation8 + $0x650] sm:$0xff] }
 0x2c8   :  { %5181 = vmatprep.subr.bf16.mxu0 %v7573_v4  ;;  %v545_v3 = vld [vmem:[#allocation8 + $0x670] sm:$0xff]  ;;  %v542_v4 = vld [vmem:[#allocation8 + $0x658] sm:$0xff] }
 0x2c9   :  { %v7627_v10 = vcombine.high %v541_v2, %v545_v3  ;;  %v7626_v24 = vcombine.low %v541_v2, %v545_v3  ;;  %v7628_v55 = vcombine.low %v542_v4, %v546_v5  ;;  %v594_v2 = vld [vmem:[#allocation8 + $0x7f8] sm:$0xff] }
 0x2ca   :  { %5018 = vmatpush1.bf16.msra.mxu1 %v7570_v13  ;;  %v7629_v13 = vcombine.high %v542_v4, %v546_v5 }
 0x2cb   :  { %5182 = vmatpush1.bf16.msra.mxu0 %v7572_v23  ;;  %5019 = vmatprep.subr.bf16.mxu1 %v7579_v15  ;;  %v549_v23 = vld [vmem:[#allocation8 + $0x690] sm:$0xff] }
 0x2cc   :  { %5183 = vmatprep.subr.bf16.mxu0 %v7581_v16  ;;  %v553_v15 = vld [vmem:[#allocation8 + $0x6b0] sm:$0xff]  ;;  %v550_v16 = vld [vmem:[#allocation8 + $0x698] sm:$0xff] }
 0x2cd   :  { %v7635_v26 = vcombine.high %v549_v23, %v553_v15  ;;  %v7634_v30 = vcombine.low %v549_v23, %v553_v15  ;;  %v7636_v32 = vcombine.low %v550_v16, %v554_v17  ;;  %v602_v23 = vld [vmem:[#allocation8 + $0x838] sm:$0xff] }
 0x2ce   :  { %5020 = vmatpush1.bf16.msra.mxu1 %v7578_v50  ;;  %v7637_v50 = vcombine.high %v550_v16, %v554_v17 }
 0x2cf   :  { %5184 = vmatpush1.bf16.msra.mxu0 %v7580_v27  ;;  %5021 = vmatprep.subr.bf16.mxu1 %v7587_v25  ;;  %v557_v27 = vld [vmem:[#allocation8 + $0x6d0] sm:$0xff] }
 0x2d0   :  { %5185 = vmatprep.subr.bf16.mxu0 %v7589_v28  ;;  %v561_v25 = vld [vmem:[#allocation8 + $0x6f0] sm:$0xff]  ;;  %v558_v28 = vld [vmem:[#allocation8 + $0x6d8] sm:$0xff] }
 0x2d1   :  { %v7643_v33 = vcombine.high %v557_v27, %v561_v25  ;;  %v7642_v41 = vcombine.low %v557_v27, %v561_v25  ;;  %v7644_v42 = vcombine.low %v558_v28, %v562_v29  ;;  %v606_v27 = vld [vmem:[#allocation8 + $0x858] sm:$0xff] }
 0x2d2   :  { %5022 = vmatpush1.bf16.msra.mxu1 %v7586_v36  ;;  %v7645_v36 = vcombine.high %v558_v28, %v562_v29  ;;  %v610_v25 = vld [vmem:[#allocation8 + $0x878] sm:$0xff] }
 0x2d3   :  { %5186 = vmatpush1.bf16.msra.mxu0 %v7588_v37  ;;  %5023 = vmatprep.subr.bf16.mxu1 %v7595_v39  ;;  %v565_v37 = vld [vmem:[#allocation8 + $0x710] sm:$0xff] }
 0x2d4   :  { %5187 = vmatprep.subr.bf16.mxu0 %v7597_v40  ;;  %v569_v39 = vld [vmem:[#allocation8 + $0x730] sm:$0xff]  ;;  %v566_v40 = vld [vmem:[#allocation8 + $0x718] sm:$0xff] }
 0x2d5   :  { %v7651_v43 = vcombine.high %v565_v37, %v569_v39  ;;  %v7650_v44 = vcombine.low %v565_v37, %v569_v39  ;;  %v7652_v45 = vcombine.low %v566_v40, %v570_v31  ;;  %v618_v37 = vld [vmem:[#allocation8 + $0x8b8] sm:$0xff] }
 0x2d6   :  { %5024 = vmatpush1.bf16.msra.mxu1 %v7594_v0  ;;  %v7653_v0 = vcombine.high %v566_v40, %v570_v31  ;;  %v7692_v40 = vcombine.low %v606_v27, %v610_v25 }
 0x2d7   :  { %5188 = vmatpush1.bf16.msra.mxu0 %v7596_v11  ;;  %5025 = vmatprep.subr.bf16.mxu1 %v7603_v12  ;;  %v573_v11 = vld [vmem:[#allocation8 + $0x750] sm:$0xff] }
 0x2d8   :  { %5189 = vmatprep.subr.bf16.mxu0 %v7605_v21  ;;  %v577_v12 = vld [vmem:[#allocation8 + $0x770] sm:$0xff]  ;;  %v574_v21 = vld [vmem:[#allocation8 + $0x758] sm:$0xff] }
 0x2d9   :  { %v7659_v62 = vcombine.high %v573_v11, %v577_v12  ;;  %v7658_v52 = vcombine.low %v573_v11, %v577_v12  ;;  %v7660_v38 = vcombine.low %v574_v21, %v578_v18  ;;  %v626_v11 = vld [vmem:[#allocation8 + $0x8f8] sm:$0xff] }
 0x2da   :  { %5026 = vmatpush1.bf16.msra.mxu1 %v7602_v47  ;;  %v7661_v47 = vcombine.high %v574_v21, %v578_v18 }
 0x2db   :  { %5190 = vmatpush1.bf16.msra.mxu0 %v7604_v48  ;;  %5027 = vmatprep.subr.bf16.mxu1 %v7611_v49  ;;  %v581_v48 = vld [vmem:[#allocation8 + $0x790] sm:$0xff] }
 0x2dc   :  { %5191 = vmatprep.subr.bf16.mxu0 %v7613_v9  ;;  %v585_v49 = vld [vmem:[#allocation8 + $0x7b0] sm:$0xff]  ;;  %v582_v9 = vld [vmem:[#allocation8 + $0x798] sm:$0xff] }
 0x2dd   :  { %v7667_v56 = vcombine.high %v581_v48, %v585_v49  ;;  %v7666_v3 = vcombine.low %v581_v48, %v585_v49  ;;  %v7668_v4 = vcombine.low %v582_v9, %v586_v51 }
 0x2de   :  { %5028 = vmatpush1.bf16.msra.mxu1 %v7610_v57  ;;  %v7669_v57 = vcombine.high %v582_v9, %v586_v51  ;;  %v637_v51 = vld [vmem:[#allocation8 + $0x950] sm:$0xff] }
 0x2df   :  { %5192 = vmatpush1.bf16.msra.mxu0 %v7612_v58  ;;  %5029 = vmatprep.subr.bf16.mxu1 %v7619_v59  ;;  %v589_v58 = vld [vmem:[#allocation8 + $0x7d0] sm:$0xff] }
 0x2e0   :  { %5193 = vmatprep.subr.bf16.mxu0 %v7621_v35  ;;  %v593_v59 = vld [vmem:[#allocation8 + $0x7f0] sm:$0xff]  ;;  %v590_v35 = vld [vmem:[#allocation8 + $0x7d8] sm:$0xff] }
 0x2e1   :  { %v7675_v5 = vcombine.high %v589_v58, %v593_v59  ;;  %v7674_v15 = vcombine.low %v589_v58, %v593_v59  ;;  %v7676_v16 = vcombine.low %v590_v35, %v594_v2 }
 0x2e2   :  { %5030 = vmatpush1.bf16.msra.mxu1 %v7618_v6  ;;  %v7677_v6 = vcombine.high %v590_v35, %v594_v2  ;;  %v645_v2 = vld [vmem:[#allocation8 + $0x990] sm:$0xff] }
 0x2e3   :  { %5194 = vmatpush1.bf16.msra.mxu0 %v7620_v8  ;;  %5031 = vmatprep.subr.bf16.mxu1 %v7627_v10  ;;  %v597_v8 = vld [vmem:[#allocation8 + $0x810] sm:$0xff] }
 0x2e4   :  { %5195 = vmatprep.subr.bf16.mxu0 %v7629_v13  ;;  %v601_v10 = vld [vmem:[#allocation8 + $0x830] sm:$0xff]  ;;  %v598_v13 = vld [vmem:[#allocation8 + $0x818] sm:$0xff] }
 0x2e5   :  { %v7683_v17 = vcombine.high %v597_v8, %v601_v10  ;;  %v7684_v28 = vcombine.low %v598_v13, %v602_v23 }
 0x2e6   :  { %5032 = vmatpush1.bf16.msra.mxu1 %v7626_v24  ;;  %v7685_v24 = vcombine.high %v598_v13, %v602_v23  ;;  %v653_v23 = vld [vmem:[#allocation8 + $0x9d0] sm:$0xff] }
 0x2e7   :  { %5196 = vmatpush1.bf16.msra.mxu0 %v7628_v55  ;;  %5033 = vmatprep.subr.bf16.mxu1 %v7635_v26  ;;  %v605_v55 = vld [vmem:[#allocation8 + $0x850] sm:$0xff] }
 0x2e8   :  { %5197 = vmatprep.subr.bf16.mxu0 %v7637_v50  ;;  %v609_v26 = vld [vmem:[#allocation8 + $0x870] sm:$0xff]  ;;  %v7682_v50 = vcombine.low %v597_v8, %v601_v10 }
 0x2e9   :  { %v7691_v29 = vcombine.high %v605_v55, %v609_v26  ;;  %v7690_v39 = vcombine.low %v605_v55, %v609_v26 }
 0x2ea   :  { %5034 = vmatpush1.bf16.msra.mxu1 %v7634_v30  ;;  %v613_v30 = vld [vmem:[#allocation8 + $0x890] sm:$0xff] }
 0x2eb   :  { %5198 = vmatpush1.bf16.msra.mxu0 %v7636_v32  ;;  %5035 = vmatprep.subr.bf16.mxu1 %v7643_v33  ;;  %v617_v32 = vld [vmem:[#allocation8 + $0x8b0] sm:$0xff]  ;;  %v7693_v33 = vcombine.high %v606_v27, %v610_v25 }
 0x2ec   :  { %5199 = vmatprep.subr.bf16.mxu0 %v7645_v36  ;;  %v614_v36 = vld [vmem:[#allocation8 + $0x898] sm:$0xff]  ;;  %v7699_v31 = vcombine.high %v613_v30, %v617_v32  ;;  %v7698_v12 = vcombine.low %v613_v30, %v617_v32  ;;  %v661_v27 = vld [vmem:[#allocation8 + $0xa10] sm:$0xff] }
 0x2ed   :  { %v665_v25 = vld [vmem:[#allocation8 + $0xa30] sm:$0xff] }
 0x2ee   :  { %5036 = vmatpush1.bf16.msra.mxu1 %v7642_v41  ;;  %v7701_v41 = vcombine.high %v614_v36, %v618_v37 }
 0x2ef   :  { %5200 = vmatpush1.bf16.msra.mxu0 %v7644_v42  ;;  %5037 = vmatprep.subr.bf16.mxu1 %v7651_v43  ;;  %v621_v42 = vld [vmem:[#allocation8 + $0x8d0] sm:$0xff] }
 0x2f0   :  { %5201 = vmatprep.subr.bf16.mxu0 %v7653_v0  ;;  %v625_v43 = vld [vmem:[#allocation8 + $0x8f0] sm:$0xff]  ;;  %v622_v0 = vld [vmem:[#allocation8 + $0x8d8] sm:$0xff] }
 0x2f1   :  { %v7707_v21 = vcombine.high %v621_v42, %v625_v43  ;;  %v7709_v18 = vcombine.high %v622_v0, %v626_v11  ;;  %v7708_v48 = vcombine.low %v622_v0, %v626_v11  ;;  %v677_v11 = vld [vmem:[#allocation8 + $0xa90] sm:$0xff] }
 0x2f2   :  { %5038 = vmatpush1.bf16.msra.mxu1 %v7650_v44  ;;  %v629_v44 = vld [vmem:[#allocation8 + $0x910] sm:$0xff] }
 0x2f3   :  { %5202 = vmatpush1.bf16.msra.mxu0 %v7652_v45  ;;  %5039 = vmatprep.subr.bf16.mxu1 %v7659_v62  ;;  %v633_v45 = vld [vmem:[#allocation8 + $0x930] sm:$0xff]  ;;  %v630_v62 = vld [vmem:[#allocation8 + $0x918] sm:$0xff] }
 0x2f4   :  { %5203 = vmatprep.subr.bf16.mxu0 %v7661_v47  ;;  %v634_v47 = vld [vmem:[#allocation8 + $0x938] sm:$0xff]  ;;  %v7715_v49 = vcombine.high %v629_v44, %v633_v45 }
 0x2f5   :  { %v7717_v9 = vcombine.high %v630_v62, %v634_v47  ;;  %v7716_v58 = vcombine.low %v630_v62, %v634_v47  ;;  %v685_v47 = vld [vmem:[#allocation8 + $0xad0] sm:$0xff] }
 0x2f6   :  { %5040 = vmatpush1.bf16.msra.mxu1 %v7658_v52  ;;  %v641_v52 = vld [vmem:[#allocation8 + $0x970] sm:$0xff] }
 0x2f7   :  { %5204 = vmatpush1.bf16.msra.mxu0 %v7660_v38  ;;  %5041 = vmatprep.subr.bf16.mxu1 %v7667_v56  ;;  %v638_v38 = vld [vmem:[#allocation8 + $0x958] sm:$0xff]  ;;  %v7723_v59 = vcombine.high %v637_v51, %v641_v52 }
 0x2f8   :  { %5205 = vmatprep.subr.bf16.mxu0 %v7669_v57  ;;  %v642_v56 = vld [vmem:[#allocation8 + $0x978] sm:$0xff]  ;;  %v7714_v57 = vcombine.low %v629_v44, %v633_v45 }
 0x2f9   :  { %v7725_v35 = vcombine.high %v638_v38, %v642_v56  ;;  %v7724_v8 = vcombine.low %v638_v38, %v642_v56  ;;  %v693_v56 = vld [vmem:[#allocation8 + $0xb10] sm:$0xff] }
 0x2fa   :  { %5042 = vmatpush1.bf16.msra.mxu1 %v7666_v3  ;;  %v649_v3 = vld [vmem:[#allocation8 + $0x9b0] sm:$0xff] }
 0x2fb   :  { %5206 = vmatpush1.bf16.msra.mxu0 %v7668_v4  ;;  %5043 = vmatprep.subr.bf16.mxu1 %v7675_v5  ;;  %v646_v4 = vld [vmem:[#allocation8 + $0x998] sm:$0xff]  ;;  %v7731_v10 = vcombine.high %v645_v2, %v649_v3 }
 0x2fc   :  { %5207 = vmatprep.subr.bf16.mxu0 %v7677_v6  ;;  %v650_v5 = vld [vmem:[#allocation8 + $0x9b8] sm:$0xff]  ;;  %v7722_v6 = vcombine.low %v637_v51, %v641_v52 }
 0x2fd   :  { %v7733_v13 = vcombine.high %v646_v4, %v650_v5  ;;  %v7732_v55 = vcombine.low %v646_v4, %v650_v5  ;;  %v701_v5 = vld [vmem:[#allocation8 + $0xb50] sm:$0xff] }
 0x2fe   :  { %5044 = vmatpush1.bf16.msra.mxu1 %v7674_v15  ;;  %v657_v15 = vld [vmem:[#allocation8 + $0x9f0] sm:$0xff] }
 0x2ff   :  { %5208 = vmatpush1.bf16.msra.mxu0 %v7676_v16  ;;  %5054 = vmatprep.subr.bf16.mxu1 %v7683_v17  ;;  %v654_v16 = vld [vmem:[#allocation8 + $0x9d8] sm:$0xff]  ;;  %v7739_v26 = vcombine.high %v653_v23, %v657_v15  ;;  %v7738_v30 = vcombine.low %v653_v23, %v657_v15 }
 0x300   :  { %5218 = vmatprep.subr.bf16.mxu0 %v7685_v24  ;;  %v658_v17 = vld [vmem:[#allocation8 + $0x9f8] sm:$0xff]  ;;  %v7730_v24 = vcombine.low %v645_v2, %v649_v3 }
 0x301   :  { %5046 = vmatmul.mubr.bf16.vlgmr.msra.gmra.mrb[16].mxu1 %v9525_v60  ;;  %v7740_v32 = vcombine.low %v654_v16, %v658_v17 }
 0x302   :  { %5210 = vmatmul.mubr.bf16.vlgmr.msra.gmra.mrb[12].mxu0 %v9525_v60  ;;  %5055 = vmatpush1.bf16.msra.mxu1 %v7682_v50  ;;  %v7700_v60 = vcombine.low %v614_v36, %v618_v37  ;;  %v7741_v50 = vcombine.high %v654_v16, %v658_v17  ;;  %v669_v37 = vld [vmem:[#allocation8 + $0xa50] sm:$0xff] }
 0x303   :  { %5086 = vmatprep.mubr.bf16.mxu1 %v9538_v34  ;;  %5219 = vmatpush1.bf16.msra.mxu0 %v7684_v28  ;;  %v662_v28 = vld [vmem:[#allocation8 + $0xa18] sm:$0xff]  ;;  %v709_v17 = vld [vmem:[#allocation8 + $0xb90] sm:$0xff] }
 0x304   :  { %5250 = vmatprep.mubr.bf16.mxu0 %v9538_v34  ;;  %5056 = vmatprep.subr.bf16.mxu1 %v7691_v29  ;;  %v7706_v34 = vcombine.low %v621_v42, %v625_v43  ;;  %v666_v29 = vld [vmem:[#allocation8 + $0xa38] sm:$0xff] }
 0x305   :  { %5220 = vmatprep.subr.bf16.mxu0 %v7693_v33  ;;  %v7747_v33 = vcombine.high %v661_v27, %v665_v25  ;;  %v7749_v36 = vcombine.high %v662_v28, %v666_v29  ;;  %v7748_v42 = vcombine.low %v662_v28, %v666_v29  ;;  %v717_v29 = vld [vmem:[#allocation8 + $0xbd0] sm:$0xff] }
 0x306   :  { %5057 = vmatpush1.bf16.msra.mxu1 %v7690_v39  ;;  %v673_v39 = vld [vmem:[#allocation8 + $0xa70] sm:$0xff] }
 0x307   :  { %5221 = vmatpush1.bf16.msra.mxu0 %v7692_v40  ;;  %5058 = vmatprep.subr.bf16.mxu1 %v7699_v31  ;;  %v670_v40 = vld [vmem:[#allocation8 + $0xa58] sm:$0xff]  ;;  %v7755_v43 = vcombine.high %v669_v37, %v673_v39 }
 0x308   :  { %5222 = vmatprep.subr.bf16.mxu0 %v7701_v41  ;;  %v674_v31 = vld [vmem:[#allocation8 + $0xa78] sm:$0xff]  ;;  %v7746_v41 = vcombine.low %v661_v27, %v665_v25 }
 0x309   :  { %v7757_v0 = vcombine.high %v670_v40, %v674_v31  ;;  %v7756_v44 = vcombine.low %v670_v40, %v674_v31  ;;  %v725_v31 = vld [vmem:[#allocation8 + $0xc10] sm:$0xff] }
 0x30a   :  { %5059 = vmatpush1.bf16.msra.mxu1 %v7698_v12  ;;  %v681_v12 = vld [vmem:[#allocation8 + $0xab0] sm:$0xff] }
 0x30b   :  { %5223 = vmatpush1.bf16.msra.mxu0 %v7700_v60  ;;  %5060 = vmatprep.subr.bf16.mxu1 %v7707_v21  ;;  %v678_v60 = vld [vmem:[#allocation8 + $0xa98] sm:$0xff]  ;;  %v7763_v45 = vcombine.high %v677_v11, %v681_v12 }
 0x30c   :  { %5224 = vmatprep.subr.bf16.mxu0 %v7709_v18  ;;  %v682_v21 = vld [vmem:[#allocation8 + $0xab8] sm:$0xff]  ;;  %v7754_v18 = vcombine.low %v669_v37, %v673_v39 }
 0x30d   :  { %v7765_v62 = vcombine.high %v678_v60, %v682_v21  ;;  %v7764_v51 = vcombine.low %v678_v60, %v682_v21  ;;  %v733_v21 = vld [vmem:[#allocation8 + $0xc50] sm:$0xff] }
 0x30e   :  { %5061 = vmatpush1.bf16.msra.mxu1 %v7706_v34  ;;  %v689_v34 = vld [vmem:[#allocation8 + $0xaf0] sm:$0xff] }
 0x30f   :  { %5225 = vmatpush1.bf16.msra.mxu0 %v7708_v48  ;;  %5062 = vmatprep.subr.bf16.mxu1 %v7715_v49  ;;  %v686_v48 = vld [vmem:[#allocation8 + $0xad8] sm:$0xff]  ;;  %v7771_v52 = vcombine.high %v685_v47, %v689_v34 }
 0x310   :  { %5226 = vmatprep.subr.bf16.mxu0 %v7717_v9  ;;  %v690_v49 = vld [vmem:[#allocation8 + $0xaf8] sm:$0xff]  ;;  %v7762_v9 = vcombine.low %v677_v11, %v681_v12 }
 0x311   :  { %v7773_v38 = vcombine.high %v686_v48, %v690_v49  ;;  %v7772_v2 = vcombine.low %v686_v48, %v690_v49  ;;  %v741_v49 = vld [vmem:[#allocation8 + $0xc90] sm:$0xff] }
 0x312   :  { %5063 = vmatpush1.bf16.msra.mxu1 %v7714_v57  ;;  %v697_v57 = vld [vmem:[#allocation8 + $0xb30] sm:$0xff] }
 0x313   :  { %5227 = vmatpush1.bf16.msra.mxu0 %v7716_v58  ;;  %5064 = vmatprep.subr.bf16.mxu1 %v7723_v59  ;;  %v694_v58 = vld [vmem:[#allocation8 + $0xb18] sm:$0xff]  ;;  %v7779_v3 = vcombine.high %v693_v56, %v697_v57 }
 0x314   :  { %5228 = vmatprep.subr.bf16.mxu0 %v7725_v35  ;;  %v698_v59 = vld [vmem:[#allocation8 + $0xb38] sm:$0xff]  ;;  %v7770_v35 = vcombine.low %v685_v47, %v689_v34 }
 0x315   :  { %v7781_v4 = vcombine.high %v694_v58, %v698_v59  ;;  %v7780_v23 = vcombine.low %v694_v58, %v698_v59  ;;  %v749_v59 = vld [vmem:[#allocation8 + $0xcd0] sm:$0xff] }
 0x316   :  { %5065 = vmatpush1.bf16.msra.mxu1 %v7722_v6  ;;  %v705_v6 = vld [vmem:[#allocation8 + $0xb70] sm:$0xff] }
 0x317   :  { %5229 = vmatpush1.bf16.msra.mxu0 %v7724_v8  ;;  %5066 = vmatprep.subr.bf16.mxu1 %v7731_v10  ;;  %v702_v8 = vld [vmem:[#allocation8 + $0xb58] sm:$0xff]  ;;  %v7787_v15 = vcombine.high %v701_v5, %v705_v6 }
 0x318   :  { %5230 = vmatprep.subr.bf16.mxu0 %v7733_v13  ;;  %v706_v10 = vld [vmem:[#allocation8 + $0xb78] sm:$0xff]  ;;  %v7778_v13 = vcombine.low %v693_v56, %v697_v57 }
 0x319   :  { %v7789_v16 = vcombine.high %v702_v8, %v706_v10  ;;  %v7788_v27 = vcombine.low %v702_v8, %v706_v10  ;;  %v757_v8 = vld [vmem:[#allocation8 + $0xd10] sm:$0xff] }
 0x31a   :  { %5067 = vmatpush1.bf16.msra.mxu1 %v7730_v24  ;;  %v713_v24 = vld [vmem:[#allocation8 + $0xbb0] sm:$0xff] }
 0x31b   :  { %5231 = vmatpush1.bf16.msra.mxu0 %v7732_v55  ;;  %5068 = vmatprep.subr.bf16.mxu1 %v7739_v26  ;;  %v710_v55 = vld [vmem:[#allocation8 + $0xb98] sm:$0xff]  ;;  %v7795_v25 = vcombine.high %v709_v17, %v713_v24  ;;  %v761_v10 = vld [vmem:[#allocation8 + $0xd30] sm:$0xff] }
 0x31c   :  { %5232 = vmatprep.subr.bf16.mxu0 %v7741_v50  ;;  %v714_v26 = vld [vmem:[#allocation8 + $0xbb8] sm:$0xff]  ;;  %v7786_v50 = vcombine.low %v701_v5, %v705_v6 }
 0x31d   :  { %v7797_v28 = vcombine.high %v710_v55, %v714_v26  ;;  %v7796_v37 = vcombine.low %v710_v55, %v714_v26  ;;  %v769_v55 = vld [vmem:[#allocation8 + $0xd70] sm:$0xff]  ;;  %v766_v26 = vld [vmem:[#allocation8 + $0xd58] sm:$0xff] }
 0x31e   :  { %5069 = vmatpush1.bf16.msra.mxu1 %v7738_v30  ;;  %v721_v30 = vld [vmem:[#allocation8 + $0xbf0] sm:$0xff] }
 0x31f   :  { %5233 = vmatpush1.bf16.msra.mxu0 %v7740_v32  ;;  %5070 = vmatprep.subr.bf16.mxu1 %v7747_v33  ;;  %v718_v32 = vld [vmem:[#allocation8 + $0xbd8] sm:$0xff]  ;;  %v7803_v39 = vcombine.high %v717_v29, %v721_v30 }
 0x320   :  { %5234 = vmatprep.subr.bf16.mxu0 %v7749_v36  ;;  %v722_v33 = vld [vmem:[#allocation8 + $0xbf8] sm:$0xff]  ;;  %v7794_v36 = vcombine.low %v709_v17, %v713_v24  ;;  %v7843_v17 = vcombine.high %v757_v8, %v761_v10  ;;  %v765_v24 = vld [vmem:[#allocation8 + $0xd50] sm:$0xff] }
 0x321   :  { %v7805_v40 = vcombine.high %v718_v32, %v722_v33  ;;  %v7804_v11 = vcombine.low %v718_v32, %v722_v33  ;;  %v777_v32 = vld [vmem:[#allocation8 + $0xdb0] sm:$0xff]  ;;  %v774_v33 = vld [vmem:[#allocation8 + $0xd98] sm:$0xff] }
 0x322   :  { %5071 = vmatpush1.bf16.msra.mxu1 %v7746_v41  ;;  %v729_v41 = vld [vmem:[#allocation8 + $0xc30] sm:$0xff] }
 0x323   :  { %5235 = vmatpush1.bf16.msra.mxu0 %v7748_v42  ;;  %5072 = vmatprep.subr.bf16.mxu1 %v7755_v43  ;;  %v726_v42 = vld [vmem:[#allocation8 + $0xc18] sm:$0xff]  ;;  %v7811_v12 = vcombine.high %v725_v31, %v729_v41 }
 0x324   :  { %5236 = vmatprep.subr.bf16.mxu0 %v7757_v0  ;;  %v730_v43 = vld [vmem:[#allocation8 + $0xc38] sm:$0xff]  ;;  %v7802_v0 = vcombine.low %v717_v29, %v721_v30  ;;  %v773_v30 = vld [vmem:[#allocation8 + $0xd90] sm:$0xff] }
 0x325   :  { %v7813_v60 = vcombine.high %v726_v42, %v730_v43  ;;  %v7812_v47 = vcombine.low %v726_v42, %v730_v43 }
 0x326   :  { %5073 = vmatpush1.bf16.msra.mxu1 %v7754_v18  ;;  %v737_v18 = vld [vmem:[#allocation8 + $0xc70] sm:$0xff] }
 0x327   :  { %5237 = vmatpush1.bf16.msra.mxu0 %v7756_v44  ;;  %5074 = vmatprep.subr.bf16.mxu1 %v7763_v45  ;;  %v734_v44 = vld [vmem:[#allocation8 + $0xc58] sm:$0xff]  ;;  %v7819_v34 = vcombine.high %v733_v21, %v737_v18 }
 0x328   :  { %5238 = vmatprep.subr.bf16.mxu0 %v7765_v62  ;;  %v738_v45 = vld [vmem:[#allocation8 + $0xc78] sm:$0xff]  ;;  %v7810_v62 = vcombine.low %v725_v31, %v729_v41  ;;  %v7859_v31 = vcombine.high %v773_v30, %v777_v32 }
 0x329   :  { %v7821_v48 = vcombine.high %v734_v44, %v738_v45  ;;  %v7820_v56 = vcombine.low %v734_v44, %v738_v45  ;;  %v786_v44 = vld [vmem:[#allocation8 + $0xdf8] sm:$0xff] }
 0x32a   :  { %5075 = vmatpush1.bf16.msra.mxu1 %v7762_v9  ;;  %v745_v9 = vld [vmem:[#allocation8 + $0xcb0] sm:$0xff] }
 0x32b   :  { %5239 = vmatpush1.bf16.msra.mxu0 %v7764_v51  ;;  %5076 = vmatprep.subr.bf16.mxu1 %v7771_v52  ;;  %v742_v51 = vld [vmem:[#allocation8 + $0xc98] sm:$0xff]  ;;  %v7827_v57 = vcombine.high %v741_v49, %v745_v9 }
 0x32c   :  { %5240 = vmatprep.subr.bf16.mxu0 %v7773_v38  ;;  %v746_v52 = vld [vmem:[#allocation8 + $0xcb8] sm:$0xff]  ;;  %v7818_v38 = vcombine.low %v733_v21, %v737_v18 }
 0x32d   :  { %v7829_v58 = vcombine.high %v742_v51, %v746_v52  ;;  %v782_v18 = vld [vmem:[#allocation8 + $0xdd8] sm:$0xff] }
 0x32e   :  { %5077 = vmatpush1.bf16.msra.mxu1 %v7770_v35  ;;  %v753_v35 = vld [vmem:[#allocation8 + $0xcf0] sm:$0xff] }
 0x32f   :  { %5241 = vmatpush1.bf16.msra.mxu0 %v7772_v2  ;;  %5078 = vmatprep.subr.bf16.mxu1 %v7779_v3  ;;  %v750_v2 = vld [vmem:[#allocation8 + $0xcd8] sm:$0xff]  ;;  %v7835_v5 = vcombine.high %v749_v59, %v753_v35 }
 0x330   :  { %5242 = vmatprep.subr.bf16.mxu0 %v7781_v4  ;;  %v754_v3 = vld [vmem:[#allocation8 + $0xcf8] sm:$0xff]  ;;  %v7826_v4 = vcombine.low %v741_v49, %v745_v9 }
 0x331   :  { %v7837_v6 = vcombine.high %v750_v2, %v754_v3 }
 0x332   :  { %5079 = vmatpush1.bf16.msra.mxu1 %v7778_v13  ;;  %v758_v13 = vld [vmem:[#allocation8 + $0xd18] sm:$0xff] }
 0x333   :  { %5243 = vmatpush1.bf16.msra.mxu0 %v7780_v23  ;;  %5080 = vmatprep.subr.bf16.mxu1 %v7787_v15  ;;  %v762_v23 = vld [vmem:[#allocation8 + $0xd38] sm:$0xff]  ;;  %v7834_v15 = vcombine.low %v749_v59, %v753_v35 }
 0x334   :  { %5244 = vmatprep.subr.bf16.mxu0 %v7789_v16  ;;  %v7836_v16 = vcombine.low %v750_v2, %v754_v3  ;;  %v8620_v35 = vld [vmem:[#allocation11] ss:$16 sps:$4 sm:$0xff]   ;;  %v8623_v2 = vld [vmem:[#allocation11 + $0x8] ss:$16 sps:$4 sm:$0xff]   ;;  %v8628_v3 = vld [vmem:[#allocation11 + $0x24] ss:$16 sps:$4 sm:$0xff]  }
 0x336   :  { %5081 = vmatpush1.bf16.msra.mxu1 %v7786_v50  ;;  %v770_v50 = vld [vmem:[#allocation8 + $0xd78] sm:$0xff] }
 0x337   :  { %5245 = vmatpush1.bf16.msra.mxu0 %v7788_v27  ;;  %5082 = vmatprep.subr.bf16.mxu1 %v7795_v25  ;;  %v7842_v27 = vcombine.low %v757_v8, %v761_v10  ;;  %v7844_v25 = vcombine.low %v758_v13, %v762_v23  ;;  %v7853_v29 = vcombine.high %v766_v26, %v770_v50  ;;  %v8634_v8 = vld [vmem:[#allocation11 + $0x44] ss:$16 sps:$4 sm:$0xff]   ;;  %v8637_v10 = vld [vmem:[#allocation11 + $0x4c] ss:$16 sps:$4 sm:$0xff]  }
 0x338   :  { %5246 = vmatprep.subr.bf16.mxu0 %v7797_v28  ;;  %v7851_v28 = vcombine.high %v765_v24, %v769_v55 }
 0x33a   :  { %5083 = vmatpush1.bf16.msra.mxu1 %v7794_v36  ;;  %v778_v36 = vld [vmem:[#allocation8 + $0xdb8] sm:$0xff] }
 0x33b   :  { %5247 = vmatpush1.bf16.msra.mxu0 %v7796_v37  ;;  %5084 = vmatprep.subr.bf16.mxu1 %v7803_v39  ;;  %v9572_v37 = vld [vmem:[#allocation10] sm:$0xff]  ;;  %v7850_v39 = vcombine.low %v765_v24, %v769_v55  ;;  %v7861_v43 = vcombine.high %v774_v33, %v778_v36  ;;  %v7860_v49 = vcombine.low %v774_v33, %v778_v36  ;;  %v8644_v55 = vld [vmem:[#allocation11 + $0x80] ss:$16 sps:$4 sm:$0xff]   ;;  %v8664_v36 = vld [vmem:[#allocation11 + $0xe4] ss:$16 sps:$4 sm:$0xff]  }
 0x33c   :  { %5248 = vmatprep.subr.bf16.mxu0 %v7805_v40  ;;  %v7852_v40 = vcombine.low %v766_v26, %v770_v50  ;;  %v8649_v24 = vld [vmem:[#allocation11 + $0x8c] ss:$16 sps:$4 sm:$0xff]   ;;  %v8647_v26 = vld [vmem:[#allocation11 + $0x88] ss:$16 sps:$4 sm:$0xff]   ;;  %v8652_v50 = vld [vmem:[#allocation11 + $0xa4] ss:$16 sps:$4 sm:$0xff]  }
 0x33d   :  { %v8659_v33 = vld [vmem:[#allocation11 + $0xc8] ss:$16 sps:$4 sm:$0xff]  }
 0x33e   :  { %5085 = vmatpush1.bf16.msra.mxu1 %v7802_v0  ;;  %v781_v0 = vld [vmem:[#allocation8 + $0xdd0] sm:$0xff] }
 0x33f   :  { %5249 = vmatpush1.bf16.msra.mxu0 %v7804_v11  ;;  %5095 = vmatprep.subr.bf16.mxu1 %v7811_v12  ;;  %v785_v11 = vld [vmem:[#allocation8 + $0xdf0] sm:$0xff]  ;;  %v2371_v12 = vrot.slane %v9572_v37, %v9485_v1 }
 0x340   :  { %5259 = vmatprep.subr.bf16.mxu0 %v7813_v60  ;;  %v7867_v9 = vcombine.high %v781_v0, %v785_v11 }
 0x341   :  { %5087 = vmatmul.mubr.bf16.vlgmr.msra.gmra.mrb[16].mxu1 %v9547_v54 }
 0x342   :  { %5251 = vmatmul.mubr.bf16.vlgmr.msra.gmra.mrb[12].mxu0 %v9547_v54  ;;  %5096 = vmatpush1.bf16.msra.mxu1 %v7810_v62  ;;  %v7828_v54 = vcombine.low %v742_v51, %v746_v52  ;;  %v7869_v51 = vcombine.high %v782_v18, %v786_v44 }
 0x343   :  { %5260 = vmatpush1.bf16.msra.mxu0 %v7812_v47  ;;  %5097 = vmatprep.subr.bf16.mxu1 %v7819_v34  ;;  %v7858_v47 = vcombine.low %v773_v30, %v777_v32  ;;  %v8661_v30 = vld [vmem:[#allocation11 + $0xcc] ss:$16 sps:$4 sm:$0xff]   ;;  %v8656_v32 = vld [vmem:[#allocation11 + $0xc0] ss:$16 sps:$4 sm:$0xff]  }
 0x344   :  { %5261 = vmatprep.subr.bf16.mxu0 %v7821_v48  ;;  %5127 = vmatprep.mubr.bf16.mxu1 %v9286_v7 }
 0x345   :  { %5291 = vmatprep.mubr.bf16.mxu0 %v9286_v7  ;;  %v7845_v7 = vcombine.high %v758_v13, %v762_v23  ;;  %v8632_v13 = vld [vmem:[#allocation11 + $0x40] ss:$16 sps:$4 sm:$0xff]   ;;  %v8635_v23 = vld [vmem:[#allocation11 + $0x48] ss:$16 sps:$4 sm:$0xff]  }
 0x346   :  { %5098 = vmatpush1.bf16.msra.mxu1 %v7818_v38  ;;  %v7866_v38 = vcombine.low %v781_v0, %v785_v11  ;;  %v8673_v0 = vld [vmem:[#allocation11 + $0x10c] ss:$16 sps:$4 sm:$0xff]   ;;  %v8668_v11 = vld [vmem:[#allocation11 + $0x100] ss:$16 sps:$4 sm:$0xff]  }
 0x347   :  { %5262 = vmatpush1.bf16.msra.mxu0 %v7820_v56  ;;  %5099 = vmatprep.subr.bf16.mxu1 %v7827_v57  ;;  %v7868_v56 = vcombine.low %v782_v18, %v786_v44  ;;  %v8622_v57 = vld [vmem:[#allocation11 + $0x4] ss:$16 sps:$4 sm:$0xff]   ;;  %v8679_v18 = vld [vmem:[#allocation11 + $0x12c] ss:$16 sps:$4 sm:$0xff]   ;;  %v8674_v44 = vld [vmem:[#allocation11 + $0x120] ss:$16 sps:$4 sm:$0xff]  }
 0x348   :  { %5263 = vmatprep.subr.bf16.mxu0 %v7829_v58  ;;  %v8625_v58 = vld [vmem:[#allocation11 + $0xc] ss:$16 sps:$4 sm:$0xff]  }
 0x34a   :  { %5100 = vmatpush1.bf16.msra.mxu1 %v7826_v4 }
 0x34b   :  { %5264 = vmatpush1.bf16.msra.mxu0 %v7828_v54  ;;  %5101 = vmatprep.subr.bf16.mxu1 %v7835_v5  ;;  %v8631_v54 = vld [vmem:[#allocation11 + $0x2c] ss:$16 sps:$4 sm:$0xff]   ;;  %v8626_v5 = vld [vmem:[#allocation11 + $0x20] ss:$16 sps:$4 sm:$0xff]  }
 0x34c   :  { %5265 = vmatprep.subr.bf16.mxu0 %v7837_v6  ;;  %v8629_v6 = vld [vmem:[#allocation11 + $0x28] ss:$16 sps:$4 sm:$0xff]  }
 0x34e   :  { %5102 = vmatpush1.bf16.msra.mxu1 %v7834_v15  ;;  %v8640_v15 = vld [vmem:[#allocation11 + $0x64] ss:$16 sps:$4 sm:$0xff]  }
 0x34f   :  { %5266 = vmatpush1.bf16.msra.mxu0 %v7836_v16  ;;  %5103 = vmatprep.subr.bf16.mxu1 %v7843_v17  ;;  %v8643_v16 = vld [vmem:[#allocation11 + $0x6c] ss:$16 sps:$4 sm:$0xff]   ;;  %v8641_v17 = vld [vmem:[#allocation11 + $0x68] ss:$16 sps:$4 sm:$0xff]  }
 0x350   :  { %5267 = vmatprep.subr.bf16.mxu0 %v7845_v7  ;;  %v8646_v7 = vld [vmem:[#allocation11 + $0x84] ss:$16 sps:$4 sm:$0xff]  }
 0x352   :  { %5104 = vmatpush1.bf16.msra.mxu1 %v7842_v27  ;;  %v8655_v27 = vld [vmem:[#allocation11 + $0xac] ss:$16 sps:$4 sm:$0xff]  }
 0x353   :  { %5268 = vmatpush1.bf16.msra.mxu0 %v7844_v25  ;;  %5105 = vmatprep.subr.bf16.mxu1 %v7851_v28  ;;  %v8650_v25 = vld [vmem:[#allocation11 + $0xa0] ss:$16 sps:$4 sm:$0xff]   ;;  %v8653_v28 = vld [vmem:[#allocation11 + $0xa8] ss:$16 sps:$4 sm:$0xff]  }
 0x354   :  { %v9574_v41 = vpop.f32.mrb[12].mxu1  ;;  %v9576_v42 = vpop.f32.mrb[8].mxu0  ;;  %5269 = vmatprep.subr.bf16.mxu0 %v7853_v29  ;;  %v8658_v29 = vld [vmem:[#allocation11 + $0xc4] ss:$16 sps:$4 sm:$0xff]  }
 0x355   :  { %v4803_v60 = vpop.f32.mrb[13].mxu1  ;;  %v9580_v21 = vpop.f32.mrb[9].mxu0 }
 0x356   :  { %v4805_v45 = vpop.f32.mrb[14].mxu1  ;;  %v4969_v62 = vpop.f32.mrb[10].mxu0  ;;  %5106 = vmatpush1.bf16.msra.mxu1 %v7850_v39  ;;  %v8261_v52 = vadd.f32 %v4803_v60, %v2371_v12  ;;  %v8667_v39 = vld [vmem:[#allocation11 + $0xec] ss:$16 sps:$4 sm:$0xff]   ;;  %v8671_v12 = vld [vmem:[#allocation11 + $0x108] ss:$16 sps:$4 sm:$0xff]  }
 0x357   :  { %5270 = vmatpush1.bf16.msra.mxu0 %v7852_v40  ;;  %v4806_v34 = vpop.f32.mrb[15].mxu1  ;;  %v4970_v48 = vpop.f32.mrb[11].mxu0  ;;  %5107 = vmatprep.subr.bf16.mxu1 %v7859_v31  ;;  %v8662_v40 = vld [vmem:[#allocation11 + $0xe0] ss:$16 sps:$4 sm:$0xff]   ;;  %v8665_v31 = vld [vmem:[#allocation11 + $0xe8] ss:$16 sps:$4 sm:$0xff]  }
 0x358   :  { %5271 = vmatprep.subr.bf16.mxu0 %v7861_v43  ;;  %v5301_v59 = vmax.f32 %v8261_v52, 0.0  ;;  %v8670_v43 = vld [vmem:[#allocation11 + $0x104] ss:$16 sps:$4 sm:$0xff]   ;;  %v8677_v45 = vld [vmem:[#allocation11 + $0x128] ss:$16 sps:$4 sm:$0xff]  }
 0x359   :  { %v8676_v60 = vld [vmem:[#allocation11 + $0x124] ss:$16 sps:$4 sm:$0xff]   ;;  %v8680_v34 = vld [vmem:[#allocation11 + $0x140] ss:$16 sps:$4 sm:$0xff]   ;;  %v8683_v48 = vld [vmem:[#allocation11 + $0x148] ss:$16 sps:$4 sm:$0xff]  }
 0x35a   :  { %5108 = vmatpush1.bf16.msra.mxu1 %v7858_v47  ;;  %v5309_v4 = vpack.c.bf16 %v5301_v59, %v5301_v59  ;;  %v8682_v62 = vld [vmem:[#allocation11 + $0x144] ss:$16 sps:$4 sm:$0xff]   ;;  %v8685_v47 = vld [vmem:[#allocation11 + $0x14c] ss:$16 sps:$4 sm:$0xff]   ;;  %v8689_v52 = vld [vmem:[#allocation11 + $0x168] ss:$16 sps:$4 sm:$0xff]  }
 0x35b   :  { %5272 = vmatpush1.bf16.msra.mxu0 %v7860_v49  ;;  %5109 = vmatprep.subr.bf16.mxu1 %v7867_v9  ;;  %v8688_v49 = vld [vmem:[#allocation11 + $0x164] ss:$16 sps:$4 sm:$0xff]   ;;  %v8691_v9 = vld [vmem:[#allocation11 + $0x16c] ss:$16 sps:$4 sm:$0xff]  }
 0x35c   :  { %5273 = vmatprep.subr.bf16.mxu0 %v7869_v51  ;;  %v8686_v51 = vld [vmem:[#allocation11 + $0x160] ss:$16 sps:$4 sm:$0xff]   ;;  %v8700_v59 = vld [vmem:[#allocation11 + $0x1a4] ss:$16 sps:$4 sm:$0xff]  }
 0x35e   :  { %5110 = vmatpush1.bf16.msra.mxu1 %v7866_v38  ;;  %v8694_v38 = vld [vmem:[#allocation11 + $0x184] ss:$16 sps:$4 sm:$0xff]  }
 0x35f   :  { %5274 = vmatpush1.bf16.msra.mxu0 %v7868_v56  ;;  %6617 = vmatprep.subr.bf16.mxu1 %v8622_v57  ;;  %v8697_v56 = vld [vmem:[#allocation11 + $0x18c] ss:$16 sps:$4 sm:$0xff]   ;;  %v8692_v57 = vld [vmem:[#allocation11 + $0x180] ss:$16 sps:$4 sm:$0xff]  }
 0x360   :  { %6781 = vmatprep.subr.bf16.mxu0 %v8625_v58  ;;  %v8695_v58 = vld [vmem:[#allocation11 + $0x188] ss:$16 sps:$4 sm:$0xff]  }
 0x361   :  { %5128 = vmatmul.mubr.bf16.vlgmr.msra.gmra.mrb[16].mxu1 %v9554_v19 }
 0x362   :  { %5292 = vmatmul.mubr.bf16.vlgmr.msra.gmra.mrb[12].mxu0 %v9554_v19  ;;  %6618 = vmatpush1.bf16.msra.mxu1 %v8620_v35  ;;  %v8638_v19 = vld [vmem:[#allocation11 + $0x60] ss:$16 sps:$4 sm:$0xff]   ;;  %v8703_v35 = vld [vmem:[#allocation11 + $0x1ac] ss:$16 sps:$4 sm:$0xff]  }
 0x363   :  { %6649 = vmatprep.mubr.bf16.mxu1 %v5309_v4  ;;  %6782 = vmatpush1.bf16.msra.mxu0 %v8623_v2  ;;  %v8698_v2 = vld [vmem:[#allocation11 + $0x1a0] ss:$16 sps:$4 sm:$0xff]  }
 0x364   :  { %6813 = vmatprep.mubr.bf16.mxu0 %v5309_v4  ;;  %6619 = vmatprep.subr.bf16.mxu1 %v8628_v3  ;;  %v2367_v3 = vrot.slane %v9572_v37, %v9480_v63  ;;  %v8701_v4 = vld [vmem:[#allocation11 + $0x1a8] ss:$16 sps:$4 sm:$0xff]  }
 0x365   :  { %6783 = vmatprep.subr.bf16.mxu0 %v8631_v54  ;;  %v8706_v54 = vld [vmem:[#allocation11 + $0x1c4] ss:$16 sps:$4 sm:$0xff]  }
 0x366   :  { %6620 = vmatpush1.bf16.msra.mxu1 %v8626_v5  ;;  %v8709_v5 = vld [vmem:[#allocation11 + $0x1cc] ss:$16 sps:$4 sm:$0xff]  }
 0x367   :  { %6784 = vmatpush1.bf16.msra.mxu0 %v8629_v6  ;;  %6621 = vmatprep.subr.bf16.mxu1 %v8634_v8  ;;  %v2379_v6 = vrot.slane %v9572_v37, %v9492_v20  ;;  %v8704_v8 = vld [vmem:[#allocation11 + $0x1c0] ss:$16 sps:$4 sm:$0xff]  }
 0x368   :  { %6785 = vmatprep.subr.bf16.mxu0 %v8637_v10  ;;  %v8260_v10 = vadd.f32 %v9574_v41, %v2367_v3  ;;  %v8716_v41 = vld [vmem:[#allocation11 + $0x200] ss:$16 sps:$4 sm:$0xff]   ;;  %v8775_v3 = vld [vmem:[#allocation11 + $0x32c] ss:$16 sps:$4 sm:$0xff]  }
 0x36a   :  { %6622 = vmatpush1.bf16.msra.mxu1 %v8632_v13  ;;  %v8707_v13 = vld [vmem:[#allocation11 + $0x1c8] ss:$16 sps:$4 sm:$0xff]  }
 0x36b   :  { %6786 = vmatpush1.bf16.msra.mxu0 %v8635_v23  ;;  %6623 = vmatprep.subr.bf16.mxu1 %v8640_v15  ;;  %v8712_v23 = vld [vmem:[#allocation11 + $0x1e4] ss:$16 sps:$4 sm:$0xff]   ;;  %v8715_v15 = vld [vmem:[#allocation11 + $0x1ec] ss:$16 sps:$4 sm:$0xff]  }
 0x36c   :  { %6787 = vmatprep.subr.bf16.mxu0 %v8643_v16  ;;  %v8263_v16 = vadd.f32 %v9580_v21, %v2379_v6  ;;  %v8727_v21 = vld [vmem:[#allocation11 + $0x22c] ss:$16 sps:$4 sm:$0xff]  }
 0x36d   :  { %v8781_v6 = vld [vmem:[#allocation11 + $0x34c] ss:$16 sps:$4 sm:$0xff]  }
 0x36e   :  { %6624 = vmatpush1.bf16.msra.mxu1 %v8638_v19  ;;  %v8710_v19 = vld [vmem:[#allocation11 + $0x1e0] ss:$16 sps:$4 sm:$0xff]  }
 0x36f   :  { %6788 = vmatpush1.bf16.msra.mxu0 %v8641_v17  ;;  %6625 = vmatprep.subr.bf16.mxu1 %v8646_v7  ;;  %v5300_v17 = vmax.f32 %v8260_v10, 0.0  ;;  %v8713_v7 = vld [vmem:[#allocation11 + $0x1e8] ss:$16 sps:$4 sm:$0xff]  }
 0x370   :  { %6789 = vmatprep.subr.bf16.mxu0 %v8649_v24  ;;  %v8718_v24 = vld [vmem:[#allocation11 + $0x204] ss:$16 sps:$4 sm:$0xff]   ;;  %v8779_v10 = vld [vmem:[#allocation11 + $0x348] ss:$16 sps:$4 sm:$0xff]  }
 0x372   :  { %6626 = vmatpush1.bf16.msra.mxu1 %v8644_v55  ;;  %v8721_v55 = vld [vmem:[#allocation11 + $0x20c] ss:$16 sps:$4 sm:$0xff]  }
 0x373   :  { %6790 = vmatpush1.bf16.msra.mxu0 %v8647_v26  ;;  %6627 = vmatprep.subr.bf16.mxu1 %v8652_v50  ;;  %v5303_v26 = vmax.f32 %v8263_v16, 0.0  ;;  %v5308_v50 = vpack.c.bf16 %v5300_v17, %v5300_v17  ;;  %v8785_v16 = vld [vmem:[#allocation11 + $0x368] ss:$16 sps:$4 sm:$0xff]   ;;  %v8793_v17 = vld [vmem:[#allocation11 + $0x38c] ss:$16 sps:$4 sm:$0xff]  }
 0x374   :  { %6791 = vmatprep.subr.bf16.mxu0 %v8655_v27  ;;  %v8719_v27 = vld [vmem:[#allocation11 + $0x208] ss:$16 sps:$4 sm:$0xff]  }
 0x376   :  { %6628 = vmatpush1.bf16.msra.mxu1 %v8650_v25  ;;  %v8724_v25 = vld [vmem:[#allocation11 + $0x224] ss:$16 sps:$4 sm:$0xff]  }
 0x377   :  { %6792 = vmatpush1.bf16.msra.mxu0 %v8653_v28  ;;  %6629 = vmatprep.subr.bf16.mxu1 %v8658_v29  ;;  %v5311_v28 = vpack.c.bf16 %v5303_v26, %v5303_v26  ;;  %v8722_v29 = vld [vmem:[#allocation11 + $0x220] ss:$16 sps:$4 sm:$0xff]   ;;  %v8799_v26 = vld [vmem:[#allocation11 + $0x3ac] ss:$16 sps:$4 sm:$0xff]  }
 0x378   :  { %6793 = vmatprep.subr.bf16.mxu0 %v8661_v30  ;;  %v8725_v30 = vld [vmem:[#allocation11 + $0x228] ss:$16 sps:$4 sm:$0xff]  }
 0x37a   :  { %6630 = vmatpush1.bf16.msra.mxu1 %v8656_v32  ;;  %v8730_v32 = vld [vmem:[#allocation11 + $0x244] ss:$16 sps:$4 sm:$0xff]  }
 0x37b   :  { %6794 = vmatpush1.bf16.msra.mxu0 %v8659_v33  ;;  %6631 = vmatprep.subr.bf16.mxu1 %v8664_v36  ;;  %v8733_v33 = vld [vmem:[#allocation11 + $0x24c] ss:$16 sps:$4 sm:$0xff]   ;;  %v8728_v36 = vld [vmem:[#allocation11 + $0x240] ss:$16 sps:$4 sm:$0xff]  }
 0x37c   :  { %6795 = vmatprep.subr.bf16.mxu0 %v8667_v39  ;;  %v8731_v39 = vld [vmem:[#allocation11 + $0x248] ss:$16 sps:$4 sm:$0xff]  }
 0x37e   :  { %6632 = vmatpush1.bf16.msra.mxu1 %v8662_v40  ;;  %v8736_v40 = vld [vmem:[#allocation11 + $0x264] ss:$16 sps:$4 sm:$0xff]  }
 0x37f   :  { %6796 = vmatpush1.bf16.msra.mxu0 %v8665_v31  ;;  %6633 = vmatprep.subr.bf16.mxu1 %v8670_v43  ;;  %v8739_v31 = vld [vmem:[#allocation11 + $0x26c] ss:$16 sps:$4 sm:$0xff]   ;;  %v8734_v43 = vld [vmem:[#allocation11 + $0x260] ss:$16 sps:$4 sm:$0xff]  }
 0x380   :  { %6797 = vmatprep.subr.bf16.mxu0 %v8673_v0  ;;  %v8737_v0 = vld [vmem:[#allocation11 + $0x268] ss:$16 sps:$4 sm:$0xff]  }
 0x382   :  { %6634 = vmatpush1.bf16.msra.mxu1 %v8668_v11  ;;  %v8742_v11 = vld [vmem:[#allocation11 + $0x284] ss:$16 sps:$4 sm:$0xff]  }
 0x383   :  { %6798 = vmatpush1.bf16.msra.mxu0 %v8671_v12  ;;  %6635 = vmatprep.subr.bf16.mxu1 %v8676_v60  ;;  %v8745_v12 = vld [vmem:[#allocation11 + $0x28c] ss:$16 sps:$4 sm:$0xff]   ;;  %v8740_v60 = vld [vmem:[#allocation11 + $0x280] ss:$16 sps:$4 sm:$0xff]  }
 0x384   :  { %6799 = vmatprep.subr.bf16.mxu0 %v8679_v18  ;;  %v8743_v18 = vld [vmem:[#allocation11 + $0x288] ss:$16 sps:$4 sm:$0xff]  }
 0x386   :  { %6636 = vmatpush1.bf16.msra.mxu1 %v8674_v44  ;;  %v8748_v44 = vld [vmem:[#allocation11 + $0x2a4] ss:$16 sps:$4 sm:$0xff]  }
 0x387   :  { %6800 = vmatpush1.bf16.msra.mxu0 %v8677_v45  ;;  %6637 = vmatprep.subr.bf16.mxu1 %v8682_v62  ;;  %v8751_v45 = vld [vmem:[#allocation11 + $0x2ac] ss:$16 sps:$4 sm:$0xff]   ;;  %v8746_v62 = vld [vmem:[#allocation11 + $0x2a0] ss:$16 sps:$4 sm:$0xff]  }
 0x388   :  { %6801 = vmatprep.subr.bf16.mxu0 %v8685_v47  ;;  %v8749_v47 = vld [vmem:[#allocation11 + $0x2a8] ss:$16 sps:$4 sm:$0xff]  }
 0x38a   :  { %6638 = vmatpush1.bf16.msra.mxu1 %v8680_v34  ;;  %v8754_v34 = vld [vmem:[#allocation11 + $0x2c4] ss:$16 sps:$4 sm:$0xff]  }
 0x38b   :  { %6802 = vmatpush1.bf16.msra.mxu0 %v8683_v48  ;;  %6639 = vmatprep.subr.bf16.mxu1 %v8688_v49  ;;  %v8757_v48 = vld [vmem:[#allocation11 + $0x2cc] ss:$16 sps:$4 sm:$0xff]   ;;  %v8752_v49 = vld [vmem:[#allocation11 + $0x2c0] ss:$16 sps:$4 sm:$0xff]  }
 0x38c   :  { %6803 = vmatprep.subr.bf16.mxu0 %v8691_v9  ;;  %v8755_v9 = vld [vmem:[#allocation11 + $0x2c8] ss:$16 sps:$4 sm:$0xff]  }
 0x38e   :  { %6640 = vmatpush1.bf16.msra.mxu1 %v8686_v51  ;;  %v8760_v51 = vld [vmem:[#allocation11 + $0x2e4] ss:$16 sps:$4 sm:$0xff]  }
 0x38f   :  { %6804 = vmatpush1.bf16.msra.mxu0 %v8689_v52  ;;  %6641 = vmatprep.subr.bf16.mxu1 %v8694_v38  ;;  %v8763_v52 = vld [vmem:[#allocation11 + $0x2ec] ss:$16 sps:$4 sm:$0xff]   ;;  %v8758_v38 = vld [vmem:[#allocation11 + $0x2e0] ss:$16 sps:$4 sm:$0xff]  }
 0x390   :  { %6805 = vmatprep.subr.bf16.mxu0 %v8697_v56  ;;  %v8761_v56 = vld [vmem:[#allocation11 + $0x2e8] ss:$16 sps:$4 sm:$0xff]  }
 0x392   :  { %6642 = vmatpush1.bf16.msra.mxu1 %v8692_v57  ;;  %v8766_v57 = vld [vmem:[#allocation11 + $0x304] ss:$16 sps:$4 sm:$0xff]  }
 0x393   :  { %6806 = vmatpush1.bf16.msra.mxu0 %v8695_v58  ;;  %6643 = vmatprep.subr.bf16.mxu1 %v8700_v59  ;;  %v8769_v58 = vld [vmem:[#allocation11 + $0x30c] ss:$16 sps:$4 sm:$0xff]   ;;  %v8764_v59 = vld [vmem:[#allocation11 + $0x300] ss:$16 sps:$4 sm:$0xff]  }
 0x394   :  { %6807 = vmatprep.subr.bf16.mxu0 %v8703_v35  ;;  %v8767_v35 = vld [vmem:[#allocation11 + $0x308] ss:$16 sps:$4 sm:$0xff]  }
 0x396   :  { %6644 = vmatpush1.bf16.msra.mxu1 %v8698_v2  ;;  %v8772_v2 = vld [vmem:[#allocation11 + $0x324] ss:$16 sps:$4 sm:$0xff]  }
 0x397   :  { %6808 = vmatpush1.bf16.msra.mxu0 %v8701_v4  ;;  %6645 = vmatprep.subr.bf16.mxu1 %v8706_v54  ;;  %v8770_v4 = vld [vmem:[#allocation11 + $0x320] ss:$16 sps:$4 sm:$0xff]   ;;  %v8773_v54 = vld [vmem:[#allocation11 + $0x328] ss:$16 sps:$4 sm:$0xff]  }
 0x398   :  { %6809 = vmatprep.subr.bf16.mxu0 %v8709_v5  ;;  %v8778_v5 = vld [vmem:[#allocation11 + $0x344] ss:$16 sps:$4 sm:$0xff]  }
 0x39a   :  { %6646 = vmatpush1.bf16.msra.mxu1 %v8704_v8  ;;  %v8776_v8 = vld [vmem:[#allocation11 + $0x340] ss:$16 sps:$4 sm:$0xff]  }
 0x39b   :  { %6810 = vmatpush1.bf16.msra.mxu0 %v8707_v13  ;;  %6647 = vmatprep.subr.bf16.mxu1 %v8712_v23  ;;  %v8784_v13 = vld [vmem:[#allocation11 + $0x364] ss:$16 sps:$4 sm:$0xff]   ;;  %v8787_v23 = vld [vmem:[#allocation11 + $0x36c] ss:$16 sps:$4 sm:$0xff]  }
 0x39c   :  { %6811 = vmatprep.subr.bf16.mxu0 %v8715_v15  ;;  %v8782_v15 = vld [vmem:[#allocation11 + $0x360] ss:$16 sps:$4 sm:$0xff]  }
 0x39e   :  { %6648 = vmatpush1.bf16.msra.mxu1 %v8710_v19  ;;  %v8790_v19 = vld [vmem:[#allocation11 + $0x384] ss:$16 sps:$4 sm:$0xff]  }
 0x39f   :  { %6812 = vmatpush1.bf16.msra.mxu0 %v8713_v7  ;;  %6658 = vmatprep.subr.bf16.mxu1 %v8718_v24  ;;  %v8788_v7 = vld [vmem:[#allocation11 + $0x380] ss:$16 sps:$4 sm:$0xff]   ;;  %v8791_v24 = vld [vmem:[#allocation11 + $0x388] ss:$16 sps:$4 sm:$0xff]  }
 0x3a0   :  { %6822 = vmatprep.subr.bf16.mxu0 %v8721_v55  ;;  %v8796_v55 = vld [vmem:[#allocation11 + $0x3a4] ss:$16 sps:$4 sm:$0xff]  }
 0x3a1   :  { %6650 = vmatmul.mubr.bf16.vlgmr.msra.gmra.mrb[20].mxu1 %v5308_v50 }
 0x3a2   :  { %6814 = vmatmul.mubr.bf16.vlgmr.msra.gmra.mrb[16].mxu0 %v5308_v50  ;;  %6659 = vmatpush1.bf16.msra.mxu1 %v8716_v41  ;;  %v8794_v41 = vld [vmem:[#allocation11 + $0x3a0] ss:$16 sps:$4 sm:$0xff]   ;;  %v2375_v50 = vrot.slane %v9572_v37, %v9516_v22 }
 0x3a3   :  { %6690 = vmatprep.mubr.bf16.mxu1 %v5311_v28  ;;  %6823 = vmatpush1.bf16.msra.mxu0 %v8719_v27  ;;  %v8797_v27 = vld [vmem:[#allocation11 + $0x3a8] ss:$16 sps:$4 sm:$0xff]  }
 0x3a4   :  { %6854 = vmatprep.mubr.bf16.mxu0 %v5311_v28  ;;  %6660 = vmatprep.subr.bf16.mxu1 %v8724_v25  ;;  %v8802_v25 = vld [vmem:[#allocation11 + $0x3c4] ss:$16 sps:$4 sm:$0xff]   ;;  %v8805_v28 = vld [vmem:[#allocation11 + $0x3cc] ss:$16 sps:$4 sm:$0xff]  }
 0x3a5   :  { %6824 = vmatprep.subr.bf16.mxu0 %v8727_v21  ;;  %v8800_v21 = vld [vmem:[#allocation11 + $0x3c0] ss:$16 sps:$4 sm:$0xff]  }
 0x3a6   :  { %6661 = vmatpush1.bf16.msra.mxu1 %v8722_v29  ;;  %v8262_v29 = vadd.f32 %v9576_v42, %v2375_v50  ;;  %v8815_v42 = vld [vmem:[#allocation11 + $0x408] ss:$16 sps:$4 sm:$0xff]   ;;  %v8872_v50 = vld [vmem:[#allocation11 + $0x540] ss:$16 sps:$4 sm:$0xff]  }
 0x3a7   :  { %6825 = vmatpush1.bf16.msra.mxu0 %v8725_v30  ;;  %6662 = vmatprep.subr.bf16.mxu1 %v8730_v32  ;;  %v8803_v30 = vld [vmem:[#allocation11 + $0x3c8] ss:$16 sps:$4 sm:$0xff]   ;;  %v8808_v32 = vld [vmem:[#allocation11 + $0x3e4] ss:$16 sps:$4 sm:$0xff]  }
 0x3a8   :  { %6826 = vmatprep.subr.bf16.mxu0 %v8733_v33  ;;  %v8811_v33 = vld [vmem:[#allocation11 + $0x3ec] ss:$16 sps:$4 sm:$0xff]  }
 0x3aa   :  { %6663 = vmatpush1.bf16.msra.mxu1 %v8728_v36  ;;  %v8806_v36 = vld [vmem:[#allocation11 + $0x3e0] ss:$16 sps:$4 sm:$0xff]  }
 0x3ab   :  { %6827 = vmatpush1.bf16.msra.mxu0 %v8731_v39  ;;  %6664 = vmatprep.subr.bf16.mxu1 %v8736_v40  ;;  %v5302_v39 = vmax.f32 %v8262_v29, 0.0  ;;  %v8809_v40 = vld [vmem:[#allocation11 + $0x3e8] ss:$16 sps:$4 sm:$0xff]  }
 0x3ac   :  { %6828 = vmatprep.subr.bf16.mxu0 %v8739_v31  ;;  %v8814_v31 = vld [vmem:[#allocation11 + $0x404] ss:$16 sps:$4 sm:$0xff]   ;;  %v8881_v29 = vld [vmem:[#allocation11 + $0x568] ss:$16 sps:$4 sm:$0xff]  }
 0x3ae   :  { %6665 = vmatpush1.bf16.msra.mxu1 %v8734_v43  ;;  %v8817_v43 = vld [vmem:[#allocation11 + $0x40c] ss:$16 sps:$4 sm:$0xff]  }
 0x3af   :  { %6829 = vmatpush1.bf16.msra.mxu0 %v8737_v0  ;;  %6666 = vmatprep.subr.bf16.mxu1 %v8742_v11  ;;  %v8812_v0 = vld [vmem:[#allocation11 + $0x400] ss:$16 sps:$4 sm:$0xff]   ;;  %v5310_v11 = vpack.c.bf16 %v5302_v39, %v5302_v39  ;;  %v8892_v39 = vld [vmem:[#allocation11 + $0x5a4] ss:$16 sps:$4 sm:$0xff]  }
 0x3b0   :  { %6830 = vmatprep.subr.bf16.mxu0 %v8745_v12  ;;  %v8820_v12 = vld [vmem:[#allocation11 + $0x424] ss:$16 sps:$4 sm:$0xff]  }
 0x3b2   :  { %6667 = vmatpush1.bf16.msra.mxu1 %v8740_v60  ;;  %v8823_v60 = vld [vmem:[#allocation11 + $0x42c] ss:$16 sps:$4 sm:$0xff]  }
 0x3b3   :  { %6831 = vmatpush1.bf16.msra.mxu0 %v8743_v18  ;;  %6668 = vmatprep.subr.bf16.mxu1 %v8748_v44  ;;  %v8818_v18 = vld [vmem:[#allocation11 + $0x420] ss:$16 sps:$4 sm:$0xff]   ;;  %v8821_v44 = vld [vmem:[#allocation11 + $0x428] ss:$16 sps:$4 sm:$0xff]  }
 0x3b4   :  { %6832 = vmatprep.subr.bf16.mxu0 %v8751_v45  ;;  %v8826_v45 = vld [vmem:[#allocation11 + $0x444] ss:$16 sps:$4 sm:$0xff]  }
 0x3b6   :  { %6669 = vmatpush1.bf16.msra.mxu1 %v8746_v62  ;;  %v8829_v62 = vld [vmem:[#allocation11 + $0x44c] ss:$16 sps:$4 sm:$0xff]  }
 0x3b7   :  { %6833 = vmatpush1.bf16.msra.mxu0 %v8749_v47  ;;  %6670 = vmatprep.subr.bf16.mxu1 %v8754_v34  ;;  %v8824_v47 = vld [vmem:[#allocation11 + $0x440] ss:$16 sps:$4 sm:$0xff]   ;;  %v8827_v34 = vld [vmem:[#allocation11 + $0x448] ss:$16 sps:$4 sm:$0xff]  }
 0x3b8   :  { %6834 = vmatprep.subr.bf16.mxu0 %v8757_v48  ;;  %v8832_v48 = vld [vmem:[#allocation11 + $0x464] ss:$16 sps:$4 sm:$0xff]  }
 0x3ba   :  { %6671 = vmatpush1.bf16.msra.mxu1 %v8752_v49  ;;  %v8835_v49 = vld [vmem:[#allocation11 + $0x46c] ss:$16 sps:$4 sm:$0xff]  }
 0x3bb   :  { %6835 = vmatpush1.bf16.msra.mxu0 %v8755_v9  ;;  %6672 = vmatprep.subr.bf16.mxu1 %v8760_v51  ;;  %v8830_v9 = vld [vmem:[#allocation11 + $0x460] ss:$16 sps:$4 sm:$0xff]   ;;  %v8833_v51 = vld [vmem:[#allocation11 + $0x468] ss:$16 sps:$4 sm:$0xff]  }
 0x3bc   :  { %6836 = vmatprep.subr.bf16.mxu0 %v8763_v52  ;;  %v8838_v52 = vld [vmem:[#allocation11 + $0x484] ss:$16 sps:$4 sm:$0xff]  }
 0x3be   :  { %6673 = vmatpush1.bf16.msra.mxu1 %v8758_v38  ;;  %v8841_v38 = vld [vmem:[#allocation11 + $0x48c] ss:$16 sps:$4 sm:$0xff]  }
 0x3bf   :  { %6837 = vmatpush1.bf16.msra.mxu0 %v8761_v56  ;;  %6674 = vmatprep.subr.bf16.mxu1 %v8766_v57  ;;  %v8836_v56 = vld [vmem:[#allocation11 + $0x480] ss:$16 sps:$4 sm:$0xff]   ;;  %v8839_v57 = vld [vmem:[#allocation11 + $0x488] ss:$16 sps:$4 sm:$0xff]  }
 0x3c0   :  { %6838 = vmatprep.subr.bf16.mxu0 %v8769_v58  ;;  %v8844_v58 = vld [vmem:[#allocation11 + $0x4a4] ss:$16 sps:$4 sm:$0xff]  }
 0x3c2   :  { %6675 = vmatpush1.bf16.msra.mxu1 %v8764_v59  ;;  %v8847_v59 = vld [vmem:[#allocation11 + $0x4ac] ss:$16 sps:$4 sm:$0xff]  }
 0x3c3   :  { %6839 = vmatpush1.bf16.msra.mxu0 %v8767_v35  ;;  %6676 = vmatprep.subr.bf16.mxu1 %v8772_v2  ;;  %v8842_v35 = vld [vmem:[#allocation11 + $0x4a0] ss:$16 sps:$4 sm:$0xff]   ;;  %v8845_v2 = vld [vmem:[#allocation11 + $0x4a8] ss:$16 sps:$4 sm:$0xff]  }
 0x3c4   :  { %6840 = vmatprep.subr.bf16.mxu0 %v8775_v3  ;;  %v8850_v3 = vld [vmem:[#allocation11 + $0x4c4] ss:$16 sps:$4 sm:$0xff]  }
 0x3c6   :  { %6677 = vmatpush1.bf16.msra.mxu1 %v8770_v4  ;;  %v8853_v4 = vld [vmem:[#allocation11 + $0x4cc] ss:$16 sps:$4 sm:$0xff]  }
 0x3c7   :  { %6841 = vmatpush1.bf16.msra.mxu0 %v8773_v54  ;;  %6678 = vmatprep.subr.bf16.mxu1 %v8778_v5  ;;  %v8848_v54 = vld [vmem:[#allocation11 + $0x4c0] ss:$16 sps:$4 sm:$0xff]   ;;  %v8851_v5 = vld [vmem:[#allocation11 + $0x4c8] ss:$16 sps:$4 sm:$0xff]  }
 0x3c8   :  { %6842 = vmatprep.subr.bf16.mxu0 %v8781_v6  ;;  %v8856_v6 = vld [vmem:[#allocation11 + $0x4e4] ss:$16 sps:$4 sm:$0xff]  }
 0x3ca   :  { %6679 = vmatpush1.bf16.msra.mxu1 %v8776_v8  ;;  %v8859_v8 = vld [vmem:[#allocation11 + $0x4ec] ss:$16 sps:$4 sm:$0xff]  }
 0x3cb   :  { %6843 = vmatpush1.bf16.msra.mxu0 %v8779_v10  ;;  %6680 = vmatprep.subr.bf16.mxu1 %v8784_v13  ;;  %v8854_v10 = vld [vmem:[#allocation11 + $0x4e0] ss:$16 sps:$4 sm:$0xff]   ;;  %v8857_v13 = vld [vmem:[#allocation11 + $0x4e8] ss:$16 sps:$4 sm:$0xff]  }
 0x3cc   :  { %6844 = vmatprep.subr.bf16.mxu0 %v8787_v23  ;;  %v8862_v23 = vld [vmem:[#allocation11 + $0x504] ss:$16 sps:$4 sm:$0xff]  }
 0x3ce   :  { %6681 = vmatpush1.bf16.msra.mxu1 %v8782_v15  ;;  %v8865_v15 = vld [vmem:[#allocation11 + $0x50c] ss:$16 sps:$4 sm:$0xff]  }
 0x3cf   :  { %6845 = vmatpush1.bf16.msra.mxu0 %v8785_v16  ;;  %6682 = vmatprep.subr.bf16.mxu1 %v8790_v19  ;;  %v8860_v16 = vld [vmem:[#allocation11 + $0x500] ss:$16 sps:$4 sm:$0xff]   ;;  %v8863_v19 = vld [vmem:[#allocation11 + $0x508] ss:$16 sps:$4 sm:$0xff]  }
 0x3d0   :  { %6846 = vmatprep.subr.bf16.mxu0 %v8793_v17  ;;  %v8868_v17 = vld [vmem:[#allocation11 + $0x524] ss:$16 sps:$4 sm:$0xff]  }
 0x3d2   :  { %6683 = vmatpush1.bf16.msra.mxu1 %v8788_v7  ;;  %v8871_v7 = vld [vmem:[#allocation11 + $0x52c] ss:$16 sps:$4 sm:$0xff]  }
 0x3d3   :  { %6847 = vmatpush1.bf16.msra.mxu0 %v8791_v24  ;;  %6684 = vmatprep.subr.bf16.mxu1 %v8796_v55  ;;  %v8866_v24 = vld [vmem:[#allocation11 + $0x520] ss:$16 sps:$4 sm:$0xff]   ;;  %v8869_v55 = vld [vmem:[#allocation11 + $0x528] ss:$16 sps:$4 sm:$0xff]  }
 0x3d4   :  { %6848 = vmatprep.subr.bf16.mxu0 %v8799_v26  ;;  %v8874_v26 = vld [vmem:[#allocation11 + $0x544] ss:$16 sps:$4 sm:$0xff]  }
 0x3d6   :  { %6685 = vmatpush1.bf16.msra.mxu1 %v8794_v41  ;;  %v8877_v41 = vld [vmem:[#allocation11 + $0x54c] ss:$16 sps:$4 sm:$0xff]  }
 0x3d7   :  { %6849 = vmatpush1.bf16.msra.mxu0 %v8797_v27  ;;  %6686 = vmatprep.subr.bf16.mxu1 %v8802_v25  ;;  %v8875_v27 = vld [vmem:[#allocation11 + $0x548] ss:$16 sps:$4 sm:$0xff]   ;;  %v8880_v25 = vld [vmem:[#allocation11 + $0x564] ss:$16 sps:$4 sm:$0xff]  }
 0x3d8   :  { %6850 = vmatprep.subr.bf16.mxu0 %v8805_v28  ;;  %v8883_v28 = vld [vmem:[#allocation11 + $0x56c] ss:$16 sps:$4 sm:$0xff]  }
 0x3da   :  { %6687 = vmatpush1.bf16.msra.mxu1 %v8800_v21  ;;  %v8878_v21 = vld [vmem:[#allocation11 + $0x560] ss:$16 sps:$4 sm:$0xff]  }
 0x3db   :  { %6851 = vmatpush1.bf16.msra.mxu0 %v8803_v30  ;;  %6688 = vmatprep.subr.bf16.mxu1 %v8808_v32  ;;  %v8886_v30 = vld [vmem:[#allocation11 + $0x584] ss:$16 sps:$4 sm:$0xff]   ;;  %v8889_v32 = vld [vmem:[#allocation11 + $0x58c] ss:$16 sps:$4 sm:$0xff]  }
 0x3dc   :  { %6852 = vmatprep.subr.bf16.mxu0 %v8811_v33  ;;  %v8884_v33 = vld [vmem:[#allocation11 + $0x580] ss:$16 sps:$4 sm:$0xff]  }
 0x3de   :  { %6689 = vmatpush1.bf16.msra.mxu1 %v8806_v36  ;;  %v8887_v36 = vld [vmem:[#allocation11 + $0x588] ss:$16 sps:$4 sm:$0xff]  }
 0x3df   :  { %6853 = vmatpush1.bf16.msra.mxu0 %v8809_v40  ;;  %6699 = vmatprep.subr.bf16.mxu1 %v8814_v31  ;;  %v8895_v40 = vld [vmem:[#allocation11 + $0x5ac] ss:$16 sps:$4 sm:$0xff]   ;;  %v8890_v31 = vld [vmem:[#allocation11 + $0x5a0] ss:$16 sps:$4 sm:$0xff]  }
 0x3e0   :  { %6863 = vmatprep.subr.bf16.mxu0 %v8817_v43  ;;  %v8893_v43 = vld [vmem:[#allocation11 + $0x5a8] ss:$16 sps:$4 sm:$0xff]  }
 0x3e1   :  { %6691 = vmatmul.mubr.bf16.vlgmr.msra.gmra.mrb[20].mxu1 %v5310_v11 }
 0x3e2   :  { %6855 = vmatmul.mubr.bf16.vlgmr.msra.gmra.mrb[16].mxu0 %v5310_v11  ;;  %6700 = vmatpush1.bf16.msra.mxu1 %v8812_v0  ;;  %v8898_v0 = vld [vmem:[#allocation11 + $0x5c4] ss:$16 sps:$4 sm:$0xff]   ;;  %v8901_v11 = vld [vmem:[#allocation11 + $0x5cc] ss:$16 sps:$4 sm:$0xff]  }
 0x3e3   :  { %6864 = vmatpush1.bf16.msra.mxu0 %v8815_v42  ;;  %6701 = vmatprep.subr.bf16.mxu1 %v8820_v12  ;;  %v8896_v42 = vld [vmem:[#allocation11 + $0x5c0] ss:$16 sps:$4 sm:$0xff]   ;;  %v8899_v12 = vld [vmem:[#allocation11 + $0x5c8] ss:$16 sps:$4 sm:$0xff]  }
 0x3e4   :  { %6865 = vmatprep.subr.bf16.mxu0 %v8823_v60  ;;  %v8904_v60 = vld [vmem:[#allocation11 + $0x5e4] ss:$16 sps:$4 sm:$0xff]  }
 0x3e6   :  { %6702 = vmatpush1.bf16.msra.mxu1 %v8818_v18  ;;  %v8907_v18 = vld [vmem:[#allocation11 + $0x5ec] ss:$16 sps:$4 sm:$0xff]  }
 0x3e7   :  { %6866 = vmatpush1.bf16.msra.mxu0 %v8821_v44  ;;  %6703 = vmatprep.subr.bf16.mxu1 %v8826_v45  ;;  %v8902_v44 = vld [vmem:[#allocation11 + $0x5e0] ss:$16 sps:$4 sm:$0xff]   ;;  %v8905_v45 = vld [vmem:[#allocation11 + $0x5e8] ss:$16 sps:$4 sm:$0xff]  }
 0x3e8   :  { %6867 = vmatprep.subr.bf16.mxu0 %v8829_v62  ;;  %v8910_v62 = vld [vmem:[#allocation11 + $0x604] ss:$16 sps:$4 sm:$0xff]  }
 0x3ea   :  { %6704 = vmatpush1.bf16.msra.mxu1 %v8824_v47  ;;  %v8913_v47 = vld [vmem:[#allocation11 + $0x60c] ss:$16 sps:$4 sm:$0xff]  }
 0x3eb   :  { %6868 = vmatpush1.bf16.msra.mxu0 %v8827_v34  ;;  %6705 = vmatprep.subr.bf16.mxu1 %v8832_v48  ;;  %v2394_v34 = vsub.s32 7, %v9477_v61  ;;  %v2383_v48 = vrot.slane %v9572_v37, %v1131_v14 }
 0x3ec   :  { %6869 = vmatprep.subr.bf16.mxu0 %v8835_v49  ;;  %v2387_v49 = vrot.slane %v9572_v37, %v1135_v53  ;;  %v8911_v53 = vld [vmem:[#allocation11 + $0x608] ss:$16 sps:$4 sm:$0xff]  }
 0x3ee   :  { %6706 = vmatpush1.bf16.msra.mxu1 %v8830_v9  ;;  %v2395_v9 = vrot.slane %v9572_v37, %v2394_v34  ;;  %v8916_v37 = vld [vmem:[#allocation11 + $0x624] ss:$16 sps:$4 sm:$0xff]   ;;  %v8965_v34 = vld [vmem:[#allocation11 + $0x728] ss:$16 sps:$4 sm:$0xff]  }
 0x3ef   :  { %6870 = vmatpush1.bf16.msra.mxu0 %v8833_v51  ;;  %6707 = vmatprep.subr.bf16.mxu1 %v8838_v52 }
 0x3f0   :  { %6871 = vmatprep.subr.bf16.mxu0 %v8841_v38 }
 0x3f2   :  { %6708 = vmatpush1.bf16.msra.mxu1 %v8836_v56 }
 0x3f3   :  { %6872 = vmatpush1.bf16.msra.mxu0 %v8839_v57  ;;  %6709 = vmatprep.subr.bf16.mxu1 %v8844_v58 }
 0x3f4   :  { %6873 = vmatprep.subr.bf16.mxu0 %v8847_v59 }
 0x3f6   :  { %6710 = vmatpush1.bf16.msra.mxu1 %v8842_v35 }
 0x3f7   :  { %6874 = vmatpush1.bf16.msra.mxu0 %v8845_v2  ;;  %6711 = vmatprep.subr.bf16.mxu1 %v8850_v3 }
 0x3f8   :  { %6875 = vmatprep.subr.bf16.mxu0 %v8853_v4 }
 0x3fa   :  { %6712 = vmatpush1.bf16.msra.mxu1 %v8848_v54 }
 0x3fb   :  { %6876 = vmatpush1.bf16.msra.mxu0 %v8851_v5  ;;  %6713 = vmatprep.subr.bf16.mxu1 %v8856_v6 }
 0x3fc   :  { %6877 = vmatprep.subr.bf16.mxu0 %v8859_v8  ;;  %v8908_v8 = vld [vmem:[#allocation11 + $0x600] ss:$16 sps:$4 sm:$0xff]  }
 0x3fe   :  { %6714 = vmatpush1.bf16.msra.mxu1 %v8854_v10 }
 0x3ff   :  { %6878 = vmatpush1.bf16.msra.mxu0 %v8857_v13  ;;  %6715 = vmatprep.subr.bf16.mxu1 %v8862_v23  ;;  %v8919_v13 = vld [vmem:[#allocation11 + $0x62c] ss:$16 sps:$4 sm:$0xff]  }
 0x400   :  { %6879 = vmatprep.subr.bf16.mxu0 %v8865_v15  ;;  %v8914_v15 = vld [vmem:[#allocation11 + $0x620] ss:$16 sps:$4 sm:$0xff]  }
 0x402   :  { %6716 = vmatpush1.bf16.msra.mxu1 %v8860_v16  ;;  %v8917_v16 = vld [vmem:[#allocation11 + $0x628] ss:$16 sps:$4 sm:$0xff]  }
 0x403   :  { %6880 = vmatpush1.bf16.msra.mxu0 %v8863_v19  ;;  %6717 = vmatprep.subr.bf16.mxu1 %v8868_v17  ;;  %v8922_v19 = vld [vmem:[#allocation11 + $0x644] ss:$16 sps:$4 sm:$0xff]   ;;  %v8925_v17 = vld [vmem:[#allocation11 + $0x64c] ss:$16 sps:$4 sm:$0xff]  }
 0x404   :  { %6881 = vmatprep.subr.bf16.mxu0 %v8871_v7  ;;  %v8920_v7 = vld [vmem:[#allocation11 + $0x640] ss:$16 sps:$4 sm:$0xff]  }
 0x406   :  { %6718 = vmatpush1.bf16.msra.mxu1 %v8866_v24  ;;  %v8923_v24 = vld [vmem:[#allocation11 + $0x648] ss:$16 sps:$4 sm:$0xff]  }
 0x407   :  { %6882 = vmatpush1.bf16.msra.mxu0 %v8869_v55  ;;  %6719 = vmatprep.subr.bf16.mxu1 %v8874_v26  ;;  %v8928_v55 = vld [vmem:[#allocation11 + $0x664] ss:$16 sps:$4 sm:$0xff]   ;;  %v8931_v26 = vld [vmem:[#allocation11 + $0x66c] ss:$16 sps:$4 sm:$0xff]  }
 0x408   :  { %6883 = vmatprep.subr.bf16.mxu0 %v8877_v41  ;;  %v8926_v41 = vld [vmem:[#allocation11 + $0x660] ss:$16 sps:$4 sm:$0xff]  }
 0x40a   :  { %6720 = vmatpush1.bf16.msra.mxu1 %v8872_v50  ;;  %v8929_v50 = vld [vmem:[#allocation11 + $0x668] ss:$16 sps:$4 sm:$0xff]  }
 0x40b   :  { %6884 = vmatpush1.bf16.msra.mxu0 %v8875_v27  ;;  %6721 = vmatprep.subr.bf16.mxu1 %v8880_v25  ;;  %v8934_v27 = vld [vmem:[#allocation11 + $0x684] ss:$16 sps:$4 sm:$0xff]   ;;  %v8937_v25 = vld [vmem:[#allocation11 + $0x68c] ss:$16 sps:$4 sm:$0xff]  }
 0x40c   :  { %6885 = vmatprep.subr.bf16.mxu0 %v8883_v28  ;;  %v8932_v28 = vld [vmem:[#allocation11 + $0x680] ss:$16 sps:$4 sm:$0xff]  }
 0x40e   :  { %6722 = vmatpush1.bf16.msra.mxu1 %v8878_v21  ;;  %v8935_v21 = vld [vmem:[#allocation11 + $0x688] ss:$16 sps:$4 sm:$0xff]  }
 0x40f   :  { %6886 = vmatpush1.bf16.msra.mxu0 %v8881_v29  ;;  %6723 = vmatprep.subr.bf16.mxu1 %v8886_v30  ;;  %v8940_v29 = vld [vmem:[#allocation11 + $0x6a4] ss:$16 sps:$4 sm:$0xff]   ;;  %v8943_v30 = vld [vmem:[#allocation11 + $0x6ac] ss:$16 sps:$4 sm:$0xff]  }
 0x410   :  { %6887 = vmatprep.subr.bf16.mxu0 %v8889_v32  ;;  %v8938_v32 = vld [vmem:[#allocation11 + $0x6a0] ss:$16 sps:$4 sm:$0xff]  }
 0x412   :  { %6724 = vmatpush1.bf16.msra.mxu1 %v8884_v33  ;;  %v8941_v33 = vld [vmem:[#allocation11 + $0x6a8] ss:$16 sps:$4 sm:$0xff]  }
 0x413   :  { %6888 = vmatpush1.bf16.msra.mxu0 %v8887_v36  ;;  %6725 = vmatprep.subr.bf16.mxu1 %v8892_v39  ;;  %v8946_v36 = vld [vmem:[#allocation11 + $0x6c4] ss:$16 sps:$4 sm:$0xff]   ;;  %v8949_v39 = vld [vmem:[#allocation11 + $0x6cc] ss:$16 sps:$4 sm:$0xff]  }
 0x414   :  { %6889 = vmatprep.subr.bf16.mxu0 %v8895_v40  ;;  %v8944_v40 = vld [vmem:[#allocation11 + $0x6c0] ss:$16 sps:$4 sm:$0xff]  }
 0x416   :  { %6726 = vmatpush1.bf16.msra.mxu1 %v8890_v31  ;;  %v8947_v31 = vld [vmem:[#allocation11 + $0x6c8] ss:$16 sps:$4 sm:$0xff]  }
 0x417   :  { %6890 = vmatpush1.bf16.msra.mxu0 %v8893_v43  ;;  %6727 = vmatprep.subr.bf16.mxu1 %v8898_v0  ;;  %v8952_v43 = vld [vmem:[#allocation11 + $0x6e4] ss:$16 sps:$4 sm:$0xff]   ;;  %v8955_v0 = vld [vmem:[#allocation11 + $0x6ec] ss:$16 sps:$4 sm:$0xff]  }
 0x418   :  { %6891 = vmatprep.subr.bf16.mxu0 %v8901_v11  ;;  %v8950_v11 = vld [vmem:[#allocation11 + $0x6e0] ss:$16 sps:$4 sm:$0xff]  }
 0x41a   :  { %6728 = vmatpush1.bf16.msra.mxu1 %v8896_v42  ;;  %v8953_v42 = vld [vmem:[#allocation11 + $0x6e8] ss:$16 sps:$4 sm:$0xff]  }
 0x41b   :  { %6892 = vmatpush1.bf16.msra.mxu0 %v8899_v12  ;;  %6729 = vmatprep.subr.bf16.mxu1 %v8904_v60  ;;  %v8958_v12 = vld [vmem:[#allocation11 + $0x704] ss:$16 sps:$4 sm:$0xff]   ;;  %v8961_v60 = vld [vmem:[#allocation11 + $0x70c] ss:$16 sps:$4 sm:$0xff]  }
 0x41c   :  { %6893 = vmatprep.subr.bf16.mxu0 %v8907_v18  ;;  %v8956_v18 = vld [vmem:[#allocation11 + $0x700] ss:$16 sps:$4 sm:$0xff]  }
 0x41e   :  { %6730 = vmatpush1.bf16.msra.mxu1 %v8902_v44  ;;  %v8959_v44 = vld [vmem:[#allocation11 + $0x708] ss:$16 sps:$4 sm:$0xff]  }
 0x41f   :  { %6894 = vmatpush1.bf16.msra.mxu0 %v8905_v45  ;;  %6740 = vmatprep.subr.bf16.mxu1 %v8910_v62  ;;  %v8964_v45 = vld [vmem:[#allocation11 + $0x724] ss:$16 sps:$4 sm:$0xff]   ;;  %v8967_v62 = vld [vmem:[#allocation11 + $0x72c] ss:$16 sps:$4 sm:$0xff]  }
 0x420   :  { %6904 = vmatprep.subr.bf16.mxu0 %v8913_v47  ;;  %v8962_v47 = vld [vmem:[#allocation11 + $0x720] ss:$16 sps:$4 sm:$0xff]  }
 0x434   :  { %v5129_v51 = vpop.f32.mrb[16].mxu1 }
 0x435   :  { %v8264_v52 = vadd.f32 %v5129_v51, %v2383_v48  ;;  %v9601_v38 = vpop.f32.mrb[12].mxu0  ;;  %v5131_v56 = vpop.f32.mrb[17].mxu1  ;;  %v8970_v48 = vld [vmem:[#allocation11 + $0x744] ss:$16 sps:$4 sm:$0xff]   ;;  %v8971_v51 = vld [vmem:[#allocation11 + $0x748] ss:$16 sps:$4 sm:$0xff]  }
 0x436   :  { %v8265_v57 = vadd.f32 %v5131_v56, %v2387_v49  ;;  %v5295_v58 = vpop.f32.mrb[13].mxu0  ;;  %v5133_v59 = vpop.f32.mrb[18].mxu1  ;;  %v8973_v49 = vld [vmem:[#allocation11 + $0x74c] ss:$16 sps:$4 sm:$0xff]  }
 0x437   :  { %v5304_v35 = vmax.f32 %v8264_v52, 0.0  ;;  %v8267_v2 = vadd.f32 %v5295_v58, %v2395_v9  ;;  %v5297_v3 = vpop.f32.mrb[14].mxu0  ;;  %v5134_v4 = vpop.f32.mrb[19].mxu1  ;;  %v8968_v9 = vld [vmem:[#allocation11 + $0x740] ss:$16 sps:$4 sm:$0xff]  }
 0x438   :  { %v5305_v54 = vmax.f32 %v8265_v57, 0.0  ;;  %v5298_v14 = vpop.f32.mrb[15].mxu0  ;;  %v8976_v52 = vld [vmem:[#allocation11 + $0x764] ss:$16 sps:$4 sm:$0xff]   ;;  %v8979_v56 = vld [vmem:[#allocation11 + $0x76c] ss:$16 sps:$4 sm:$0xff]  }
 0x439   :  { %v5307_v5 = vmax.f32 %v8267_v2, 0.0  ;;  %v5312_v10 = vpack.c.bf16 %v5304_v35, %v5304_v35  ;;  %v8974_v57 = vld [vmem:[#allocation11 + $0x760] ss:$16 sps:$4 sm:$0xff]   ;;  %v8977_v58 = vld [vmem:[#allocation11 + $0x768] ss:$16 sps:$4 sm:$0xff]  }
 0x43a   :  { %v5313_v6 = vpack.c.bf16 %v5305_v54, %v5305_v54  ;;  %v8982_v59 = vld [vmem:[#allocation11 + $0x784] ss:$16 sps:$4 sm:$0xff]   ;;  %v8985_v35 = vld [vmem:[#allocation11 + $0x78c] ss:$16 sps:$4 sm:$0xff]   ;;  %v8980_v2 = vld [vmem:[#allocation11 + $0x780] ss:$16 sps:$4 sm:$0xff]  }
 0x43b   :  { %v5315_v23 = vpack.c.bf16 %v5307_v5, %v5307_v5  ;;  %v8983_v3 = vld [vmem:[#allocation11 + $0x788] ss:$16 sps:$4 sm:$0xff]   ;;  %v8988_v4 = vld [vmem:[#allocation11 + $0x7a4] ss:$16 sps:$4 sm:$0xff]   ;;  %v8991_v54 = vld [vmem:[#allocation11 + $0x7ac] ss:$16 sps:$4 sm:$0xff]  }
 0x43c   :  { %6731 = vmatprep.mubr.bf16.mxu1 %v5313_v6  ;;  %6895 = vmatprep.mubr.bf16.mxu0 %v5313_v6  ;;  %v8986_v14 = vld [vmem:[#allocation11 + $0x7a0] ss:$16 sps:$4 sm:$0xff]   ;;  %v8989_v5 = vld [vmem:[#allocation11 + $0x7a8] ss:$16 sps:$4 sm:$0xff]  }
 0x43d   :  { %6732 = vmatmul.mubr.bf16.vlgmr.msra.gmra.mrb[20].mxu1 %v5312_v10  ;;  %6896 = vmatmul.mubr.bf16.vlgmr.msra.gmra.mrb[16].mxu0 %v5312_v10  ;;  %v9036_v6 = vld [vmem:[#allocation10] sm:$0xff] }
 0x43e   :  { %6741 = vmatpush1.bf16.msra.mxu1 %v8908_v8  ;;  %6905 = vmatpush1.bf16.msra.mxu0 %v8911_v53  ;;  %v2391_v8 = vrot.slane %v9036_v6, %v1139_v46  ;;  %v8994_v53 = vld [vmem:[#allocation11 + $0x7c4] ss:$16 sps:$4 sm:$0xff]   ;;  %v8997_v10 = vld [vmem:[#allocation11 + $0x7cc] ss:$16 sps:$4 sm:$0xff]  }
 0x43f   :  { %6772 = vmatprep.mubr.bf16.mxu1 %v5315_v23  ;;  %6936 = vmatprep.mubr.bf16.mxu0 %v5315_v23  ;;  %v9004_v46 = vld [vmem:[#allocation14 + $0x40] sm:$0xff]  }
 0x440   :  { %6742 = vmatprep.subr.bf16.mxu1 %v8916_v37  ;;  %6906 = vmatprep.subr.bf16.mxu0 %v8919_v13  ;;  %v8992_v37 = vld [vmem:[#allocation11 + $0x7c0] ss:$16 sps:$4 sm:$0xff]   ;;  %v8995_v13 = vld [vmem:[#allocation11 + $0x7c8] ss:$16 sps:$4 sm:$0xff]   ;;  %v8266_v23 = vadd.f32 %v9601_v38, %v2391_v8 }
 0x441   :  { %v9008_v38 = vld [vmem:[#allocation14 + $0x48] sm:$0xff]  }
 0x442   :  { %6743 = vmatpush1.bf16.msra.mxu1 %v8914_v15  ;;  %6907 = vmatpush1.bf16.msra.mxu0 %v8917_v16  ;;  %v9000_v15 = vld [vmem:[#allocation11 + $0x7e4] ss:$16 sps:$4 sm:$0xff]   ;;  %v9003_v16 = vld [vmem:[#allocation11 + $0x7ec] ss:$16 sps:$4 sm:$0xff]   ;;  %v5306_v61 = vmax.f32 %v8266_v23, 0.0 }
 0x443   :  { %6744 = vmatprep.subr.bf16.mxu1 %v8922_v19  ;;  %6908 = vmatprep.subr.bf16.mxu0 %v8925_v17  ;;  %v8998_v19 = vld [vmem:[#allocation11 + $0x7e0] ss:$16 sps:$4 sm:$0xff]   ;;  %v9001_v17 = vld [vmem:[#allocation11 + $0x7e8] ss:$16 sps:$4 sm:$0xff]  }
 0x446   :  { %6745 = vmatpush1.bf16.msra.mxu1 %v8920_v7  ;;  %6909 = vmatpush1.bf16.msra.mxu0 %v8923_v24  ;;  %v9005_v7 = vld [vmem:[#allocation14 + $0xc0] sm:$0xff]  }
 0x447   :  { %6746 = vmatprep.subr.bf16.mxu1 %v8928_v55  ;;  %6910 = vmatprep.subr.bf16.mxu0 %v8931_v26  ;;  %v9006_v24 = vld [vmem:[#allocation14] sm:$0xff]   ;;  %v5314_v26 = vpack.c.bf16 %v5306_v61, %v5306_v61 }
 0x448   :  { %v9007_v55 = vld [vmem:[#allocation14 + $0x80] sm:$0xff]  }
 0x44a   :  { %6747 = vmatpush1.bf16.msra.mxu1 %v8926_v41  ;;  %6911 = vmatpush1.bf16.msra.mxu0 %v8929_v50  ;;  %v9009_v41 = vld [vmem:[#allocation14 + $0xc8] sm:$0xff]  }
 0x44b   :  { %6748 = vmatprep.subr.bf16.mxu1 %v8934_v27  ;;  %6912 = vmatprep.subr.bf16.mxu0 %v8937_v25  ;;  %v9010_v50 = vld [vmem:[#allocation14 + $0x8] sm:$0xff]   ;;  %v9012_v25 = vld [vmem:[#allocation14 + $0x50] sm:$0xff]  }
 0x44c   :  { %v9011_v27 = vld [vmem:[#allocation14 + $0x88] sm:$0xff]  }
 0x44e   :  { %6749 = vmatpush1.bf16.msra.mxu1 %v8932_v28  ;;  %6913 = vmatpush1.bf16.msra.mxu0 %v8935_v21  ;;  %v9013_v28 = vld [vmem:[#allocation14 + $0xd0] sm:$0xff]  }
 0x44f   :  { %6750 = vmatprep.subr.bf16.mxu1 %v8940_v29  ;;  %6914 = vmatprep.subr.bf16.mxu0 %v8943_v30  ;;  %v9014_v21 = vld [vmem:[#allocation14 + $0x10] sm:$0xff]   ;;  %v9016_v30 = vld [vmem:[#allocation14 + $0x58] sm:$0xff]  }
 0x450   :  { %v9015_v29 = vld [vmem:[#allocation14 + $0x90] sm:$0xff]  }
 0x452   :  { %6751 = vmatpush1.bf16.msra.mxu1 %v8938_v32  ;;  %6915 = vmatpush1.bf16.msra.mxu0 %v8941_v33  ;;  %v9017_v32 = vld [vmem:[#allocation14 + $0xd8] sm:$0xff]  }
 0x453   :  { %6752 = vmatprep.subr.bf16.mxu1 %v8946_v36  ;;  %6916 = vmatprep.subr.bf16.mxu0 %v8949_v39  ;;  %v9018_v33 = vld [vmem:[#allocation14 + $0x18] sm:$0xff]   ;;  %v9020_v39 = vld [vmem:[#allocation14 + $0x60] sm:$0xff]  }
 0x454   :  { %v9019_v36 = vld [vmem:[#allocation14 + $0x98] sm:$0xff]  }
 0x456   :  { %6753 = vmatpush1.bf16.msra.mxu1 %v8944_v40  ;;  %6917 = vmatpush1.bf16.msra.mxu0 %v8947_v31  ;;  %v9021_v40 = vld [vmem:[#allocation14 + $0xe0] sm:$0xff]  }
 0x457   :  { %6754 = vmatprep.subr.bf16.mxu1 %v8952_v43  ;;  %6918 = vmatprep.subr.bf16.mxu0 %v8955_v0  ;;  %v9022_v31 = vld [vmem:[#allocation14 + $0x20] sm:$0xff]   ;;  %v9024_v0 = vld [vmem:[#allocation14 + $0x68] sm:$0xff]  }
 0x458   :  { %v9023_v43 = vld [vmem:[#allocation14 + $0xa0] sm:$0xff]  }
 0x45a   :  { %6755 = vmatpush1.bf16.msra.mxu1 %v8950_v11  ;;  %6919 = vmatpush1.bf16.msra.mxu0 %v8953_v42  ;;  %v9025_v11 = vld [vmem:[#allocation14 + $0xe8] sm:$0xff]  }
 0x45b   :  { %6756 = vmatprep.subr.bf16.mxu1 %v8958_v12  ;;  %6920 = vmatprep.subr.bf16.mxu0 %v8961_v60  ;;  %v9026_v42 = vld [vmem:[#allocation14 + $0x28] sm:$0xff]   ;;  %v9028_v60 = vld [vmem:[#allocation14 + $0x70] sm:$0xff]  }
 0x45c   :  { %v9027_v12 = vld [vmem:[#allocation14 + $0xa8] sm:$0xff]  }
 0x45e   :  { %6757 = vmatpush1.bf16.msra.mxu1 %v8956_v18  ;;  %6921 = vmatpush1.bf16.msra.mxu0 %v8959_v44  ;;  %v9029_v18 = vld [vmem:[#allocation14 + $0xf0] sm:$0xff]  }
 0x45f   :  { %6758 = vmatprep.subr.bf16.mxu1 %v8964_v45  ;;  %6922 = vmatprep.subr.bf16.mxu0 %v8967_v62  ;;  %v9030_v44 = vld [vmem:[#allocation14 + $0x30] sm:$0xff]   ;;  %v9032_v62 = vld [vmem:[#allocation14 + $0x78] sm:$0xff]  }
 0x460   :  { %v9031_v45 = vld [vmem:[#allocation14 + $0xb0] sm:$0xff]  }
 0x462   :  { %6759 = vmatpush1.bf16.msra.mxu1 %v8962_v47  ;;  %6923 = vmatpush1.bf16.msra.mxu0 %v8965_v34  ;;  %v9033_v47 = vld [vmem:[#allocation14 + $0xf8] sm:$0xff]  }
 0x463   :  { %6760 = vmatprep.subr.bf16.mxu1 %v8970_v48  ;;  %6924 = vmatprep.subr.bf16.mxu0 %v8973_v49  ;;  %v9034_v34 = vld [vmem:[#allocation14 + $0x38] sm:$0xff]  }
 0x464   :  { %v9035_v48 = vld [vmem:[#allocation14 + $0xb8] sm:$0xff]  }
 0x465   :  { %v1044_v49 = vld [vmem:[#allocation13] sm:$0xf] }
 0x466   :  { %6761 = vmatpush1.bf16.msra.mxu1 %v8968_v9  ;;  %6925 = vmatpush1.bf16.msra.mxu0 %v8971_v51  ;;  %v5320_v9 = vrot.slane %v1044_v49, %v9480_v63  ;;  %v5328_v51 = vrot.slane %v1044_v49, %v9516_v22 }
 0x467   :  { %6762 = vmatprep.subr.bf16.mxu1 %v8976_v52  ;;  %6926 = vmatprep.subr.bf16.mxu0 %v8979_v56  ;;  %v5324_v52 = vrot.slane %v1044_v49, %v9485_v1  ;;  %v5332_v56 = vrot.slane %v1044_v49, %v9492_v20 }
 0x46a   :  { %6763 = vmatpush1.bf16.msra.mxu1 %v8974_v57  ;;  %6927 = vmatpush1.bf16.msra.mxu0 %v8977_v58 }
 0x46b   :  { %6764 = vmatprep.subr.bf16.mxu1 %v8982_v59  ;;  %6928 = vmatprep.subr.bf16.mxu0 %v8985_v35 }
 0x46e   :  { %6765 = vmatpush1.bf16.msra.mxu1 %v8980_v2  ;;  %6929 = vmatpush1.bf16.msra.mxu0 %v8983_v3 }
 0x46f   :  { %6766 = vmatprep.subr.bf16.mxu1 %v8988_v4  ;;  %6930 = vmatprep.subr.bf16.mxu0 %v8991_v54 }
 0x472   :  { %6767 = vmatpush1.bf16.msra.mxu1 %v8986_v14  ;;  %6931 = vmatpush1.bf16.msra.mxu0 %v8989_v5 }
 0x473   :  { %6768 = vmatprep.subr.bf16.mxu1 %v8994_v53  ;;  %6932 = vmatprep.subr.bf16.mxu0 %v8997_v10 }
 0x476   :  { %6769 = vmatpush1.bf16.msra.mxu1 %v8992_v37  ;;  %6933 = vmatpush1.bf16.msra.mxu0 %v8995_v13 }
 0x477   :  { %6770 = vmatprep.subr.bf16.mxu1 %v9000_v15  ;;  %6934 = vmatprep.subr.bf16.mxu0 %v9003_v16  ;;  %v8126_v16 = vld [vmem:[#allocation16] ss:$0 sm:$0xff] }
 0x47a   :  { %6771 = vmatpush1.bf16.msra.mxu1 %v8998_v19  ;;  %6935 = vmatpush1.bf16.msra.mxu0 %v9001_v17 }
 0x47b   :  { %8190 = vmatprep.subr.bf16.mxu1 %v9004_v46  ;;  %8212 = vmatprep.subr.bf16.mxu0 %v9005_v7 }
 0x47d   :  { %6773 = vmatmul.mubr.bf16.vlgmr.msra.gmra.mrb[20].mxu1 %v5314_v26  ;;  %6937 = vmatmul.mubr.bf16.vlgmr.msra.gmra.mrb[16].mxu0 %v5314_v26 }
 0x47e   :  { %8191 = vmatpush3.bf16.msra.mxu1 %v9006_v24  ;;  %8213 = vmatpush3.bf16.msra.mxu0 %v9007_v55 }
 0x47f   :  { %8192 = vmatprep.subr.bf16.mxu1 %v9008_v38  ;;  %8214 = vmatprep.subr.bf16.mxu0 %v9009_v41 }
 0x482   :  { %8193 = vmatpush3.bf16.msra.mxu1 %v9010_v50  ;;  %8215 = vmatpush3.bf16.msra.mxu0 %v9011_v27 }
 0x483   :  { %8194 = vmatprep.subr.bf16.mxu1 %v9012_v25  ;;  %8216 = vmatprep.subr.bf16.mxu0 %v9013_v28 }
 0x486   :  { %8195 = vmatpush3.bf16.msra.mxu1 %v9014_v21  ;;  %8217 = vmatpush3.bf16.msra.mxu0 %v9015_v29 }
 0x487   :  { %8196 = vmatprep.subr.bf16.mxu1 %v9016_v30  ;;  %8218 = vmatprep.subr.bf16.mxu0 %v9017_v32 }
 0x48a   :  { %8197 = vmatpush3.bf16.msra.mxu1 %v9018_v33  ;;  %8219 = vmatpush3.bf16.msra.mxu0 %v9019_v36 }
 0x48b   :  { %8198 = vmatprep.subr.bf16.mxu1 %v9020_v39  ;;  %8220 = vmatprep.subr.bf16.mxu0 %v9021_v40 }
 0x48e   :  { %8199 = vmatpush3.bf16.msra.mxu1 %v9022_v31  ;;  %8221 = vmatpush3.bf16.msra.mxu0 %v9023_v43 }
 0x48f   :  { %8200 = vmatprep.subr.bf16.mxu1 %v9024_v0  ;;  %8222 = vmatprep.subr.bf16.mxu0 %v9025_v11 }
 0x492   :  { %8201 = vmatpush3.bf16.msra.mxu1 %v9026_v42  ;;  %8223 = vmatpush3.bf16.msra.mxu0 %v9027_v12 }
 0x493   :  { %8202 = vmatprep.subr.bf16.mxu1 %v9028_v60  ;;  %8224 = vmatprep.subr.bf16.mxu0 %v9029_v18 }
 0x496   :  { %8203 = vmatpush3.bf16.msra.mxu1 %v9030_v44  ;;  %8225 = vmatpush3.bf16.msra.mxu0 %v9031_v45 }
 0x497   :  { %8204 = vmatprep.subr.bf16.mxu1 %v9032_v62  ;;  %8226 = vmatprep.subr.bf16.mxu0 %v9033_v47 }
 0x49a   :  { %8205 = vmatpush3.bf16.msra.mxu1 %v9034_v34  ;;  %8227 = vmatpush3.bf16.msra.mxu0 %v9035_v48 }
 0x550   :  { %v6774_v57 = vpop.f32.mrb[20].mxu1  ;;  %v6938_v58 = vpop.f32.mrb[16].mxu0 }
 0x551   :  { %v8268_v59 = vadd.f32 %v6774_v57, %v5320_v9  ;;  %v8270_v35 = vadd.f32 %v6938_v58, %v5328_v51  ;;  %v6776_v2 = vpop.f32.mrb[21].mxu1  ;;  %v6940_v3 = vpop.f32.mrb[17].mxu0 }
 0x552   :  { %v8269_v4 = vadd.f32 %v6776_v2, %v5324_v52  ;;  %v8271_v54 = vadd.f32 %v6940_v3, %v5332_v56  ;;  %v6778_v14 = vpop.f32.mrb[22].mxu1  ;;  %v6942_v5 = vpop.f32.mrb[18].mxu0 }
 0x553   :  { %v6945_v6 = vmax.f32 %v8268_v59, 0.0  ;;  %v6947_v8 = vmax.f32 %v8270_v35, 0.0  ;;  %v6779_v53 = vpop.f32.mrb[23].mxu1  ;;  %v6943_v63 = vpop.f32.mrb[19].mxu0 }
 0x554   :  { %v6946_v10 = vmax.f32 %v8269_v4, 0.0  ;;  %v6948_v22 = vmax.f32 %v8271_v54, 0.0 }
 0x555   :  { %v6949_v13 = vpack.c.bf16 %v6945_v6, %v6945_v6  ;;  %v6951_v20 = vpack.c.bf16 %v6947_v8, %v6947_v8 }
 0x556   :  { %v6950_v37 = vpack.c.bf16 %v6946_v10, %v6946_v10  ;;  %v6952_v1 = vpack.c.bf16 %v6948_v22, %v6948_v22 }
 0x558   :  { %7183 = vmatprep.mubr.bf16.mxu1 %v6950_v37  ;;  %7223 = vmatprep.mubr.bf16.mxu0 %v6952_v1 }
 0x559   :  { %7184 = vmatmul.mubr.bf16.vlgmr.msra.gmra.mrb[24].mxu1 %v6949_v13  ;;  %7224 = vmatmul.mubr.bf16.vlgmr.msra.gmra.mrb[20].mxu0 %v6951_v20 }
 0x62c   :  { %v8206_v23 = vpop.f32.mrb[24].mxu1  ;;  %v8228_v15 = vpop.f32.mrb[20].mxu0 }
 0x62d   :  { %v8207_v19 = vpop.f32.mrb[25].mxu1  ;;  %v8229_v17 = vpop.f32.mrb[21].mxu0 }
 0x62e   :  { %v8208_v61 = vadd.f32 %v8207_v19, %v8206_v23  ;;  %v8230_v46 = vadd.f32 %v8229_v17, %v8228_v15  ;;  %v8209_v7 = vpop.f32.mrb[26].mxu1  ;;  %v8231_v24 = vpop.f32.mrb[22].mxu0 }
 0x62f   :  { %v8210_v55 = vpop.f32.mrb[27].mxu1  ;;  %v8232_v26 = vpop.f32.mrb[23].mxu0 }
 0x630   :  { %v7186_v38 = vadd.f32 %v8208_v61, %v8126_v16 }
 0x632   :  { %v7226_v41 = vadd.f32 %v8230_v46, %v7186_v38 }
 0x634   :  { %7231 = vst [vmem:[#allocation17] sm:$0xff] %v7226_v41 }
 0x635   :  { %9246 = shalt.err (!%p9243_p6)
}
 0x636   :  { %s9247_s22 = scalar_lea.hbm %s9631_s9, 128 }
 0x637   :  { %p9248_p7 = scmp.ne.s32.totalorder %s9631_s9, %s9247_s22  ;;  %p9251_p8 = scmp.lt.u32.totalorder %s9247_s22, %s9631_s9 }
 0x639   :  { %p9253_p9 = pnand %p9251_p8, %p9248_p7 }
 0x63b   :  { %9256 = shalt.err (!%p9253_p9)
}
 0x63c   :  { %7241 = dma.vmem_to_hbm [thread:$0]  %s7239_s26, 128, %s9631_s9, [#allocation4]  }
 0x63d   :  { %9267 = dma.done.wait [#allocation4], 128  }
 0x63e   :  { %9268 = vsyncadd [#allocation4], 4294967168 }
 0x63f   :  { %7245 = vsyncpa [#allocation3], 1 }
 0x640   :  { %7246 = vsyncpa [#allocation6], 1 }
 0x641   :  { %7247 = vsyncpa [#allocation9], 1 }
 0x642   :  { %7248 = vsyncpa [#allocation12], 1 }
 0x643   :  { %7249 = vsyncpa [#allocation15], 1 }
 0x644   :  { %7250 = vsyncpa [#allocation4], 1 }

</bundles_post_ra>
